<compile_context>
chip_gen: v7x
topology: tpu7x:2x2x1
jax: 0.10.0
libtpu: 0.0.40
codegen_flags: <defaults>
</compile_context>

<pallas_src>
import functools

import jax
import jax.numpy as jnp
import numpy as np
from jax.experimental import pallas as pl
from jax.experimental.pallas import tpu as pltpu


def _gelu_tanh(x):
    c = 0.7978845608028654  # sqrt(2/pi)
    return 0.5 * x * (1.0 + jnp.tanh(c * (x + 0.044715 * x * x * x)))


def _swap_leading(x):
    """(A, B, L) -> (B, A, L); keeps the lane (last) dim in place."""
    if hasattr(pltpu, "einshape"):
        try:
            return pltpu.einshape("abl->bal", x)
        except Exception:  # fall back to a plain transpose if einshape rejects it
            pass
    return jnp.transpose(x, (1, 0, 2))


# ----------------------------------------------------------------------------- kernel
def s4_model_kernel(x_ref, kt_ref, d_ref, w1_ref, b1_ref, w2_ref, b2_ref,
                    lng_ref, lnb_ref, enc_w_ref, enc_b_ref, dec_w_ref, dec_b_ref,
                    out_ref, h_scr, *, n_layers, h_real, tb):
    li = pl.program_id(1)
    f32 = jnp.float32
    bf16 = jnp.bfloat16

    # -------------------------------------------------- encoder (only at layer 0)
    @pl.when(li == 0)
    def _encode():
        x3 = x_ref[...].astype(bf16)                              # (TB, d_in, L)
        enc_w = enc_w_ref[...]                                    # (Hp, d_in) bf16
        rows = [jnp.dot(enc_w, x3[b], preferred_element_type=f32)
                for b in range(tb)]
        h_scr[...] = jnp.stack(rows, axis=0) + enc_b_ref[...]     # (TB, Hp, L)

    h3 = h_scr[...]                                               # (TB, Hp, L) f32

    # ---- bidirectional depthwise S4 conv as a channel-batched Toeplitz matmul (MXU)
    zt = _swap_leading(h3).astype(bf16)                           # (Hp, TB, L)
    kt = kt_ref[0]                                                # (Hp, L, L) bf16
    yt = jnp.einsum("hbm,hlm->hbl", zt, kt,
                    preferred_element_type=f32)                   # (Hp, TB, L) f32
    y = _swap_leading(yt)                                         # (TB, Hp, L)

    y = y + d_ref[0] * h3                                         # D skip  d:(1,Hp,1)
    y = _gelu_tanh(y)                                             # dropout = identity

    # ---- output_linear Conv1d(H -> 2H) + GLU, split into two HxH matmuls
    y16 = y.astype(bf16)
    w1 = w1_ref[0]                                                # (Hp, Hp) bf16
    w2 = w2_ref[0]
    vals = [jnp.dot(w1, y16[b], preferred_element_type=f32) for b in range(tb)]
    gates = [jnp.dot(w2, y16[b], preferred_element_type=f32) for b in range(tb)]
    val = jnp.stack(vals, axis=0) + b1_ref[0]                     # (TB, Hp, L)
    gate = jnp.stack(gates, axis=0) + b2_ref[0]
    z = val * jax.nn.sigmoid(gate)

    # ---- residual + post LayerNorm over the real d_model channels (eps = 1e-5)
    h_new = z + h3
    hp = h_new.shape[1]
    mu = jnp.sum(h_new, axis=1, keepdims=True) * (1.0 / h_real)   # (TB, 1, L)
    diff = h_new - mu
    ssq = jnp.sum(diff * diff, axis=1, keepdims=True)
    if hp != h_real:
        # padded channels are exactly zero -> remove their (0 - mu)^2 contribution
        ssq = ssq - (hp - h_real) * (mu * mu)
    var = ssq * (1.0 / h_real)
    hn = diff * jax.lax.rsqrt(var + 1e-5) * lng_ref[0] + lnb_ref[0]
    h_scr[...] = hn

    # ---------------------------------------- mean pool over L + decoder (last layer)
    @pl.when(li == n_layers - 1)
    def _decode():
        pooled = jnp.mean(hn, axis=2).astype(bf16)                # (TB, Hp)
        out_ref[...] = (jnp.dot(pooled, dec_w_ref[...],
                                preferred_element_type=f32) + dec_b_ref[...])


# ----------------------------------------------------------------------------- wrapper
def _round_up(x, m):
    return (x + m - 1) // m * m


def s4_model_forward(x_ncl, params, *, tb=8):
    """x_ncl: (B, d_input, L) float32, PyTorch NCL convention (transposed_input=True)."""
    (enc_w, enc_b, k0_all, k1_all, d_all, wout_all, bout_all,
     ln_g_all, ln_b_all, dec_w, dec_b) = params
    B, d_input, L = x_ncl.shape
    n_layers, H, _ = k0_all.shape
    d_output = dec_w.shape[0]

    Hp = _round_up(H, 8)            # channel dim lives on sublanes -> 8-align
    Op = _round_up(d_output, 128)   # lane-dense output slab
    Bp = _round_up(B, tb)
    ph = Hp - H

    xp = jnp.pad(x_ncl.astype(jnp.float32), ((0, Bp - B), (0, 0), (0, 0)))

    # Toeplitz operator equivalent to the bidirectional FFT convolution:
    #   y[b,h,l] = sum_{m<=l} k0[h,l-m] z[b,h,m] + sum_{m>l} k1[h,m-l-1] z[b,h,m]
    # stored as kt[layer, h, l, m] (per layer, streamed through the grid).
    l_idx = jnp.arange(L)[:, None]
    m_idx = jnp.arange(L)[None, :]
    dlm = l_idx - m_idx                                            # (L, L)  [l, m]
    k0g = k0_all[:, :, jnp.clip(dlm, 0, L - 1)]                    # (nl, H, L, L)
    k1g = k1_all[:, :, jnp.clip(-dlm - 1, 0, L - 1)]
    t = jnp.where((dlm >= 0)[None, None], k0g, k1g)                # (nl, H, L, L)
    kt = jnp.pad(t, ((0, 0), (0, ph), (0, 0), (0, 0))).astype(jnp.bfloat16)

    enc_w_p = jnp.pad(enc_w, ((0, ph), (0, 0))).astype(jnp.bfloat16)        # (Hp, d_in)
    enc_b_p = jnp.pad(enc_b, ((0, ph),))[None, :, None]                      # (1, Hp, 1)
    d_p = jnp.pad(d_all, ((0, 0), (0, ph)))[:, None, :, None]                # (nl,1,Hp,1)
    w1_p = jnp.pad(wout_all[:, :H, :], ((0, 0), (0, ph), (0, ph))).astype(jnp.bfloat16)
    w2_p = jnp.pad(wout_all[:, H:, :], ((0, 0), (0, ph), (0, ph))).astype(jnp.bfloat16)
    b1_p = jnp.pad(bout_all[:, :H], ((0, 0), (0, ph)))[:, None, :, None]
    b2_p = jnp.pad(bout_all[:, H:], ((0, 0), (0, ph)))[:, None, :, None]
    lng_p = jnp.pad(ln_g_all, ((0, 0), (0, ph)))[:, None, :, None]
    lnb_p = jnp.pad(ln_b_all, ((0, 0), (0, ph)))[:, None, :, None]
    dec_wt_p = jnp.pad(dec_w.T, ((0, ph), (0, Op - d_output))).astype(jnp.bfloat16)
    dec_b_p = jnp.pad(dec_b, ((0, Op - d_output),))[None, :]                 # (1, Op)

    kernel = functools.partial(s4_model_kernel, n_layers=n_layers, h_real=H, tb=tb)

    # explicit VMEM budget: per-step working set (double-buffered streamed blocks)
    kt_block = Hp * L * L * 2
    per_step = (2 * (kt_block + 2 * Hp * Hp * 2 + tb * d_input * L * 4 + tb * Op * 4)
                + 6 * tb * Hp * L * 4)
    vmem_limit = int(min(64 * 2 ** 20, max(32 * 2 ** 20, per_step + 8 * 2 ** 20)))

    out = pl.pallas_call(
        kernel,
        out_shape=jax.ShapeDtypeStruct((Bp, Op), jnp.float32),
        grid=(Bp // tb, n_layers),
        in_specs=[
            pl.BlockSpec((tb, d_input, L), lambda i, l: (i, 0, 0)),      # x
            pl.BlockSpec((1, Hp, L, L), lambda i, l: (l, 0, 0, 0)),      # Toeplitz
            pl.BlockSpec((1, 1, Hp, 1), lambda i, l: (l, 0, 0, 0)),      # D skip
            pl.BlockSpec((1, Hp, Hp), lambda i, l: (l, 0, 0)),           # GLU W1
            pl.BlockSpec((1, 1, Hp, 1), lambda i, l: (l, 0, 0, 0)),      # GLU b1
            pl.BlockSpec((1, Hp, Hp), lambda i, l: (l, 0, 0)),           # GLU W2
            pl.BlockSpec((1, 1, Hp, 1), lambda i, l: (l, 0, 0, 0)),      # GLU b2
            pl.BlockSpec((1, 1, Hp, 1), lambda i, l: (l, 0, 0, 0)),      # LN gamma
            pl.BlockSpec((1, 1, Hp, 1), lambda i, l: (l, 0, 0, 0)),      # LN beta
            pl.BlockSpec((Hp, d_input), lambda i, l: (0, 0)),            # encoder W
            pl.BlockSpec((1, Hp, 1), lambda i, l: (0, 0, 0)),            # encoder b
            pl.BlockSpec((Hp, Op), lambda i, l: (0, 0)),                 # decoder W^T
            pl.BlockSpec((1, Op), lambda i, l: (0, 0)),                  # decoder b
        ],
        out_specs=pl.BlockSpec((tb, Op), lambda i, l: (i, 0)),
        scratch_shapes=[pltpu.VMEM((tb, Hp, L), jnp.float32)],
        compiler_params=pltpu.CompilerParams(
            dimension_semantics=("parallel", "arbitrary"),
            vmem_limit_bytes=vmem_limit),
    )(xp, kt, d_p, w1_p, b1_p, w2_p, b2_p, lng_p, lnb_p,
      enc_w_p, enc_b_p, dec_wt_p, dec_b_p)
    return out[:B, :d_output]                                            # (B, d_output)


# ----------------------------------------------------------------------------- reference
def reference_forward(x_ncl, params):
    """Pure-JAX reference mirroring the PyTorch forward (FFT conv, NCL layout).

    Matmul inputs are rounded to bf16 (with f32 accumulation) at the same points as
    the kernel so the comparison isolates structural correctness."""
    (enc_w, enc_b, k0_all, k1_all, d_all, wout_all, bout_all,
     ln_g_all, ln_b_all, dec_w, dec_b) = params
    B, d_input, L = x_ncl.shape
    n_layers, H, _ = k0_all.shape
    bf = lambda a: a.astype(jnp.bfloat16).astype(jnp.float32)
    P = jax.lax.Precision.HIGHEST

    h = jnp.einsum('ci,bil->bcl', bf(enc_w), bf(x_ncl), precision=P) \
        + enc_b[None, :, None]
    for li in range(n_layers):
        z = h
        k0, k1 = bf(k0_all[li]), bf(k1_all[li])
        k = jnp.pad(k0, ((0, 0), (0, L))) + jnp.pad(k1[:, ::-1], ((0, 0), (L, 0)))
        kf = jnp.fft.rfft(k, n=2 * L, axis=-1)
        uf = jnp.fft.rfft(bf(z), n=2 * L, axis=-1)
        y = jnp.fft.irfft(uf * kf[None], n=2 * L, axis=-1)[..., :L]
        y = y + d_all[li][None, :, None] * z
        y = _gelu_tanh(y)
        w1, w2 = wout_all[li, :H], wout_all[li, H:]
        b1, b2 = bout_all[li, :H], bout_all[li, H:]
        val = jnp.einsum('oh,bhl->bol', bf(w1), bf(y), precision=P) + b1[None, :, None]
        gate = jnp.einsum('oh,bhl->bol', bf(w2), bf(y), precision=P) + b2[None, :, None]
        zz = val * jax.nn.sigmoid(gate)
        h = zz + h
        mu = h.mean(axis=1, keepdims=True)
        var = ((h - mu) ** 2).mean(axis=1, keepdims=True)
        h = (h - mu) * jax.lax.rsqrt(var + 1e-5) * ln_g_all[li][None, :, None] \
            + ln_b_all[li][None, :, None]
    pooled = h.mean(axis=-1)                                             # (B, H)
    return jnp.einsum('bh,oh->bo', bf(pooled), bf(dec_w), precision=P) + dec_b[None, :]


# ----------------------------------------------------------------------------- main
if __name__ == "__main__":
    B, d_input, d_model, d_output, n_layers, L = 12, 3, 20, 5, 2, 128
    d_state = 8  # only used by the (synthetic) SSKernel generation

    key = jax.random.PRNGKey(0)
    ks = jax.random.split(key, 10)

    def rn(k, shape, scale):
        return scale * jax.random.normal(k, shape, dtype=jnp.float32)

    enc_w = rn(ks[0], (d_model, d_input), 0.5)           # Conv1d(d_input, d_model, 1)
    enc_b = rn(ks[1], (d_model,), 0.1)
    decay = jnp.exp(-jnp.arange(L, dtype=jnp.float32) / 16.0)
    k0_all = rn(ks[2], (n_layers, d_model, L), 0.3) * decay   # forward SSM kernel
    k1_all = rn(ks[3], (n_layers, d_model, L), 0.3) * decay   # backward SSM kernel
    d_all = rn(ks[4], (n_layers, d_model), 1.0)               # S4 "D" skip term
    wout_all = rn(ks[5], (n_layers, 2 * d_model, d_model), 0.2)  # output_linear (GLU)
    bout_all = rn(ks[6], (n_layers, 2 * d_model), 0.1)
    ln_g_all = jnp.ones((n_layers, d_model), jnp.float32)
    ln_b_all = jnp.zeros((n_layers, d_model), jnp.float32)
    dec_w = rn(ks[7], (d_output, d_model), 0.3)               # Linear(d_model, d_output)
    dec_b = rn(ks[8], (d_output,), 0.1)

    params = (enc_w, enc_b, k0_all, k1_all, d_all, wout_all, bout_all,
              ln_g_all, ln_b_all, dec_w, dec_b)

    x = rn(ks[9], (B, d_input, L), 1.0)                       # (B, d_input, L) NCL

    out = jax.block_until_ready(s4_model_forward(x, params))
    ref = jax.block_until_ready(reference_forward(x, params))

    assert out.shape == (B, d_output), out.shape
    if not np.allclose(np.asarray(out), np.asarray(ref), rtol=5e-3, atol=5e-3):
        err = float(np.max(np.abs(np.asarray(out) - np.asarray(ref))))
        raise AssertionError(
            f"Pallas kernel mismatch vs JAX reference (max |err| = {err}):\n{out}\n{ref}")
    print("KERNEL_OK")
</pallas_src>

<mosaic_0001>
module attributes {stable_mosaic.version = 11 : i64} {
  func.func @s4_model_kernel(%arg0: i32, %arg1: i32, %arg2: memref<8x3x128xf32, #tpu.memory_space<vmem>>, %arg3: memref<1x24x128x128xbf16, #tpu.memory_space<vmem>>, %arg4: memref<1x1x24x1xf32, #tpu.memory_space<vmem>>, %arg5: memref<1x24x24xbf16, #tpu.memory_space<vmem>>, %arg6: memref<1x1x24x1xf32, #tpu.memory_space<vmem>>, %arg7: memref<1x24x24xbf16, #tpu.memory_space<vmem>>, %arg8: memref<1x1x24x1xf32, #tpu.memory_space<vmem>>, %arg9: memref<1x1x24x1xf32, #tpu.memory_space<vmem>>, %arg10: memref<1x1x24x1xf32, #tpu.memory_space<vmem>>, %arg11: memref<24x3xbf16, #tpu.memory_space<vmem>>, %arg12: memref<1x24x1xf32, #tpu.memory_space<vmem>>, %arg13: memref<24x128xbf16, #tpu.memory_space<vmem>>, %arg14: memref<1x128xf32, #tpu.memory_space<vmem>>, %arg15: memref<8x128xf32, #tpu.memory_space<vmem>>, %arg16: memref<8x24x128xf32, #tpu.memory_space<vmem>>) attributes {dimension_semantics = [#tpu.dimension_semantics<parallel>, #tpu.dimension_semantics<arbitrary>], iteration_bounds = array<i64: 2, 2>, scalar_prefetch = 0 : i64, scratch_operands = 1 : i64, tpu.core_type = #tpu.core_type<tc>, window_params = [{transform_indices = @transform_0, window_bounds = array<i64: 8, 3, 128>}, {transform_indices = @transform_1, window_bounds = array<i64: 1, 24, 128, 128>}, {transform_indices = @transform_2, window_bounds = array<i64: 1, 1, 24, 1>}, {transform_indices = @transform_3, window_bounds = array<i64: 1, 24, 24>}, {transform_indices = @transform_4, window_bounds = array<i64: 1, 1, 24, 1>}, {transform_indices = @transform_5, window_bounds = array<i64: 1, 24, 24>}, {transform_indices = @transform_6, window_bounds = array<i64: 1, 1, 24, 1>}, {transform_indices = @transform_7, window_bounds = array<i64: 1, 1, 24, 1>}, {transform_indices = @transform_8, window_bounds = array<i64: 1, 1, 24, 1>}, {pipeline_mode = #tpu.pipeline_mode<synchronous>, transform_indices = @transform_9, window_bounds = array<i64: 24, 3>}, {pipeline_mode = #tpu.pipeline_mode<synchronous>, transform_indices = @transform_10, window_bounds = array<i64: 1, 24, 1>}, {pipeline_mode = #tpu.pipeline_mode<synchronous>, transform_indices = @transform_11, window_bounds = array<i64: 24, 128>}, {pipeline_mode = #tpu.pipeline_mode<synchronous>, transform_indices = @transform_12, window_bounds = array<i64: 1, 128>}, {transform_indices = @transform_13, window_bounds = array<i64: 8, 128>}]} {
    %c0_i32 = arith.constant 0 : i32
    %0 = arith.cmpi eq, %arg1, %c0_i32 : i32
    %1 = arith.extui %0 : i1 to i32
    %c0_i32_0 = arith.constant 0 : i32
    %2 = arith.cmpi ne, %1, %c0_i32_0 : i32
    scf.if %2 {
      %c0_64 = arith.constant 0 : index
      %c0_65 = arith.constant 0 : index
      %c0_66 = arith.constant 0 : index
      %146 = vector.load %arg2[%c0_64, %c0_65, %c0_66] : memref<8x3x128xf32, #tpu.memory_space<vmem>>, vector<8x3x128xf32>
      %147 = arith.truncf %146 : vector<8x3x128xf32> to vector<8x3x128xbf16>
      %c0_67 = arith.constant 0 : index
      %c0_68 = arith.constant 0 : index
      %148 = vector.load %arg11[%c0_67, %c0_68] : memref<24x3xbf16, #tpu.memory_space<vmem>>, vector<24x3xbf16>
      %149 = vector.extract_strided_slice %147 {offsets = [0, 0, 0], sizes = [1, 3, 128], strides = [1, 1, 1]} : vector<8x3x128xbf16> to vector<1x3x128xbf16>
      %150 = vector.shape_cast %149 : vector<1x3x128xbf16> to vector<3x128xbf16>
      %cst_69 = arith.constant dense<0.000000e+00> : vector<24x128xf32>
      %151 = tpu.matmul %148, %150, %cst_69 {dimension_numbers = #tpu.dot_dimension_numbers<[1], [0], [0], [1], [0, 0, 1, 1], [], []>} : vector<24x3xbf16>, vector<3x128xbf16>, vector<24x128xf32> -> vector<24x128xf32>
      %152 = vector.extract_strided_slice %147 {offsets = [1, 0, 0], sizes = [1, 3, 128], strides = [1, 1, 1]} : vector<8x3x128xbf16> to vector<1x3x128xbf16>
      %153 = vector.shape_cast %152 : vector<1x3x128xbf16> to vector<3x128xbf16>
      %cst_70 = arith.constant dense<0.000000e+00> : vector<24x128xf32>
      %154 = tpu.matmul %148, %153, %cst_70 {dimension_numbers = #tpu.dot_dimension_numbers<[1], [0], [0], [1], [0, 0, 1, 1], [], []>} : vector<24x3xbf16>, vector<3x128xbf16>, vector<24x128xf32> -> vector<24x128xf32>
      %155 = vector.extract_strided_slice %147 {offsets = [2, 0, 0], sizes = [1, 3, 128], strides = [1, 1, 1]} : vector<8x3x128xbf16> to vector<1x3x128xbf16>
      %156 = vector.shape_cast %155 : vector<1x3x128xbf16> to vector<3x128xbf16>
      %cst_71 = arith.constant dense<0.000000e+00> : vector<24x128xf32>
      %157 = tpu.matmul %148, %156, %cst_71 {dimension_numbers = #tpu.dot_dimension_numbers<[1], [0], [0], [1], [0, 0, 1, 1], [], []>} : vector<24x3xbf16>, vector<3x128xbf16>, vector<24x128xf32> -> vector<24x128xf32>
      %158 = vector.extract_strided_slice %147 {offsets = [3, 0, 0], sizes = [1, 3, 128], strides = [1, 1, 1]} : vector<8x3x128xbf16> to vector<1x3x128xbf16>
      %159 = vector.shape_cast %158 : vector<1x3x128xbf16> to vector<3x128xbf16>
      %cst_72 = arith.constant dense<0.000000e+00> : vector<24x128xf32>
      %160 = tpu.matmul %148, %159, %cst_72 {dimension_numbers = #tpu.dot_dimension_numbers<[1], [0], [0], [1], [0, 0, 1, 1], [], []>} : vector<24x3xbf16>, vector<3x128xbf16>, vector<24x128xf32> -> vector<24x128xf32>
      %161 = vector.extract_strided_slice %147 {offsets = [4, 0, 0], sizes = [1, 3, 128], strides = [1, 1, 1]} : vector<8x3x128xbf16> to vector<1x3x128xbf16>
      %162 = vector.shape_cast %161 : vector<1x3x128xbf16> to vector<3x128xbf16>
      %cst_73 = arith.constant dense<0.000000e+00> : vector<24x128xf32>
      %163 = tpu.matmul %148, %162, %cst_73 {dimension_numbers = #tpu.dot_dimension_numbers<[1], [0], [0], [1], [0, 0, 1, 1], [], []>} : vector<24x3xbf16>, vector<3x128xbf16>, vector<24x128xf32> -> vector<24x128xf32>
      %164 = vector.extract_strided_slice %147 {offsets = [5, 0, 0], sizes = [1, 3, 128], strides = [1, 1, 1]} : vector<8x3x128xbf16> to vector<1x3x128xbf16>
      %165 = vector.shape_cast %164 : vector<1x3x128xbf16> to vector<3x128xbf16>
      %cst_74 = arith.constant dense<0.000000e+00> : vector<24x128xf32>
      %166 = tpu.matmul %148, %165, %cst_74 {dimension_numbers = #tpu.dot_dimension_numbers<[1], [0], [0], [1], [0, 0, 1, 1], [], []>} : vector<24x3xbf16>, vector<3x128xbf16>, vector<24x128xf32> -> vector<24x128xf32>
      %167 = vector.extract_strided_slice %147 {offsets = [6, 0, 0], sizes = [1, 3, 128], strides = [1, 1, 1]} : vector<8x3x128xbf16> to vector<1x3x128xbf16>
      %168 = vector.shape_cast %167 : vector<1x3x128xbf16> to vector<3x128xbf16>
      %cst_75 = arith.constant dense<0.000000e+00> : vector<24x128xf32>
      %169 = tpu.matmul %148, %168, %cst_75 {dimension_numbers = #tpu.dot_dimension_numbers<[1], [0], [0], [1], [0, 0, 1, 1], [], []>} : vector<24x3xbf16>, vector<3x128xbf16>, vector<24x128xf32> -> vector<24x128xf32>
      %170 = vector.extract_strided_slice %147 {offsets = [7, 0, 0], sizes = [1, 3, 128], strides = [1, 1, 1]} : vector<8x3x128xbf16> to vector<1x3x128xbf16>
      %171 = vector.shape_cast %170 : vector<1x3x128xbf16> to vector<3x128xbf16>
      %cst_76 = arith.constant dense<0.000000e+00> : vector<24x128xf32>
      %172 = tpu.matmul %148, %171, %cst_76 {dimension_numbers = #tpu.dot_dimension_numbers<[1], [0], [0], [1], [0, 0, 1, 1], [], []>} : vector<24x3xbf16>, vector<3x128xbf16>, vector<24x128xf32> -> vector<24x128xf32>
      %173 = vector.shape_cast %151 : vector<24x128xf32> to vector<1x24x128xf32>
      %174 = vector.shape_cast %154 : vector<24x128xf32> to vector<1x24x128xf32>
      %175 = vector.shape_cast %157 : vector<24x128xf32> to vector<1x24x128xf32>
      %176 = vector.shape_cast %160 : vector<24x128xf32> to vector<1x24x128xf32>
      %177 = vector.shape_cast %163 : vector<24x128xf32> to vector<1x24x128xf32>
      %178 = vector.shape_cast %166 : vector<24x128xf32> to vector<1x24x128xf32>
      %179 = vector.shape_cast %169 : vector<24x128xf32> to vector<1x24x128xf32>
      %180 = vector.shape_cast %172 : vector<24x128xf32> to vector<1x24x128xf32>
      %181 = tpu.concatenate %173, %174, %175, %176, %177, %178, %179, %180 in 0 : vector<1x24x128xf32>, vector<1x24x128xf32>, vector<1x24x128xf32>, vector<1x24x128xf32>, vector<1x24x128xf32>, vector<1x24x128xf32>, vector<1x24x128xf32>, vector<1x24x128xf32> -> vector<8x24x128xf32>
      %c0_77 = arith.constant 0 : index
      %c0_78 = arith.constant 0 : index
      %c0_79 = arith.constant 0 : index
      %182 = vector.load %arg12[%c0_77, %c0_78, %c0_79] : memref<1x24x1xf32, #tpu.memory_space<vmem>>, vector<1x24x1xf32>
      %183 = vector.broadcast %182 : vector<1x24x1xf32> to vector<8x24x128xf32>
      %184 = arith.addf %181, %183 : vector<8x24x128xf32>
      %c0_80 = arith.constant 0 : index
      %c0_81 = arith.constant 0 : index
      %c0_82 = arith.constant 0 : index
      %185 = vector.load %arg16[%c0_80, %c0_81, %c0_82] : memref<8x24x128xf32, #tpu.memory_space<vmem>>, vector<8x24x128xf32>
      tpu.vector_store %arg16[%c0_80, %c0_81, %c0_82], %184 {strides = array<i32>} : memref<8x24x128xf32, #tpu.memory_space<vmem>>, vector<8x24x128xf32>,
    } else {
    }
    %c0 = arith.constant 0 : index
    %c0_1 = arith.constant 0 : index
    %c0_2 = arith.constant 0 : index
    %3 = vector.load %arg16[%c0, %c0_1, %c0_2] : memref<8x24x128xf32, #tpu.memory_space<vmem>>, vector<8x24x128xf32>
    %4 = tpu.transpose %3, [1, 0, 2] : vector<8x24x128xf32> -> vector<24x8x128xf32>
    %5 = arith.truncf %4 : vector<24x8x128xf32> to vector<24x8x128xbf16>
    %c0_3 = arith.constant 0 : index
    %c0_4 = arith.constant 0 : index
    %c0_5 = arith.constant 0 : index
    %c0_6 = arith.constant 0 : index
    %6 = vector.load %arg3[%c0_3, %c0_4, %c0_5, %c0_6] : memref<1x24x128x128xbf16, #tpu.memory_space<vmem>>, vector<1x24x128x128xbf16>
    %7 = vector.shape_cast %6 : vector<1x24x128x128xbf16> to vector<24x128x128xbf16>
    "tpu.trace_start"() <{level = 10 : i32, message = "hbm,hlm->hbl"}> : () -> ()
    %cst = arith.constant dense<0.000000e+00> : vector<24x8x128xf32>
    %8 = tpu.matmul %5, %7, %cst {dimension_numbers = #tpu.dot_dimension_numbers<[2], [2], [1], [1], [0, 0, 0, 1, 1, 1], [0], [0]>} : vector<24x8x128xbf16>, vector<24x128x128xbf16>, vector<24x8x128xf32> -> vector<24x8x128xf32>
    "tpu.trace_stop"() : () -> ()
    %9 = tpu.transpose %8, [1, 0, 2] : vector<24x8x128xf32> -> vector<8x24x128xf32>
    %c0_7 = arith.constant 0 : index
    %c0_8 = arith.constant 0 : index
    %c0_9 = arith.constant 0 : index
    %c0_10 = arith.constant 0 : index
    %10 = vector.load %arg4[%c0_7, %c0_8, %c0_9, %c0_10] : memref<1x1x24x1xf32, #tpu.memory_space<vmem>>, vector<1x1x24x1xf32>
    %11 = vector.shape_cast %10 : vector<1x1x24x1xf32> to vector<1x24x1xf32>
    %12 = vector.broadcast %11 : vector<1x24x1xf32> to vector<8x24x128xf32>
    %13 = arith.mulf %12, %3 : vector<8x24x128xf32>
    %14 = arith.addf %9, %13 : vector<8x24x128xf32>
    %cst_11 = arith.constant 5.000000e-01 : f32
    %15 = vector.broadcast %cst_11 : f32 to vector<8x24x128xf32>
    %16 = arith.mulf %15, %14 : vector<8x24x128xf32>
    %cst_12 = arith.constant 4.471500e-02 : f32
    %17 = vector.broadcast %cst_12 : f32 to vector<8x24x128xf32>
    %18 = arith.mulf %17, %14 : vector<8x24x128xf32>
    %19 = arith.mulf %18, %14 : vector<8x24x128xf32>
    %20 = arith.mulf %19, %14 : vector<8x24x128xf32>
    %21 = arith.addf %14, %20 : vector<8x24x128xf32>
    %cst_13 = arith.constant 0.797884583 : f32
    %22 = vector.broadcast %cst_13 : f32 to vector<8x24x128xf32>
    %23 = arith.mulf %22, %21 : vector<8x24x128xf32>
    %24 = math.tanh %23 : vector<8x24x128xf32>
    %cst_14 = arith.constant 1.000000e+00 : f32
    %25 = vector.broadcast %cst_14 : f32 to vector<8x24x128xf32>
    %26 = arith.addf %25, %24 : vector<8x24x128xf32>
    %27 = arith.mulf %16, %26 : vector<8x24x128xf32>
    %28 = arith.truncf %27 : vector<8x24x128xf32> to vector<8x24x128xbf16>
    %c0_15 = arith.constant 0 : index
    %c0_16 = arith.constant 0 : index
    %c0_17 = arith.constant 0 : index
    %29 = vector.load %arg5[%c0_15, %c0_16, %c0_17] : memref<1x24x24xbf16, #tpu.memory_space<vmem>>, vector<1x24x24xbf16>
    %30 = vector.shape_cast %29 : vector<1x24x24xbf16> to vector<24x24xbf16>
    %c0_18 = arith.constant 0 : index
    %c0_19 = arith.constant 0 : index
    %c0_20 = arith.constant 0 : index
    %31 = vector.load %arg7[%c0_18, %c0_19, %c0_20] : memref<1x24x24xbf16, #tpu.memory_space<vmem>>, vector<1x24x24xbf16>
    %32 = vector.shape_cast %31 : vector<1x24x24xbf16> to vector<24x24xbf16>
    %33 = vector.extract_strided_slice %28 {offsets = [0, 0, 0], sizes = [1, 24, 128], strides = [1, 1, 1]} : vector<8x24x128xbf16> to vector<1x24x128xbf16>
    %34 = vector.shape_cast %33 : vector<1x24x128xbf16> to vector<24x128xbf16>
    %cst_21 = arith.constant dense<0.000000e+00> : vector<24x128xf32>
    %35 = tpu.matmul %30, %34, %cst_21 {dimension_numbers = #tpu.dot_dimension_numbers<[1], [0], [0], [1], [0, 0, 1, 1], [], []>} : vector<24x24xbf16>, vector<24x128xbf16>, vector<24x128xf32> -> vector<24x128xf32>
    %36 = vector.extract_strided_slice %28 {offsets = [1, 0, 0], sizes = [1, 24, 128], strides = [1, 1, 1]} : vector<8x24x128xbf16> to vector<1x24x128xbf16>
    %37 = vector.shape_cast %36 : vector<1x24x128xbf16> to vector<24x128xbf16>
    %cst_22 = arith.constant dense<0.000000e+00> : vector<24x128xf32>
    %38 = tpu.matmul %30, %37, %cst_22 {dimension_numbers = #tpu.dot_dimension_numbers<[1], [0], [0], [1], [0, 0, 1, 1], [], []>} : vector<24x24xbf16>, vector<24x128xbf16>, vector<24x128xf32> -> vector<24x128xf32>
    %39 = vector.extract_strided_slice %28 {offsets = [2, 0, 0], sizes = [1, 24, 128], strides = [1, 1, 1]} : vector<8x24x128xbf16> to vector<1x24x128xbf16>
    %40 = vector.shape_cast %39 : vector<1x24x128xbf16> to vector<24x128xbf16>
    %cst_23 = arith.constant dense<0.000000e+00> : vector<24x128xf32>
    %41 = tpu.matmul %30, %40, %cst_23 {dimension_numbers = #tpu.dot_dimension_numbers<[1], [0], [0], [1], [0, 0, 1, 1], [], []>} : vector<24x24xbf16>, vector<24x128xbf16>, vector<24x128xf32> -> vector<24x128xf32>
    %42 = vector.extract_strided_slice %28 {offsets = [3, 0, 0], sizes = [1, 24, 128], strides = [1, 1, 1]} : vector<8x24x128xbf16> to vector<1x24x128xbf16>
    %43 = vector.shape_cast %42 : vector<1x24x128xbf16> to vector<24x128xbf16>
    %cst_24 = arith.constant dense<0.000000e+00> : vector<24x128xf32>
    %44 = tpu.matmul %30, %43, %cst_24 {dimension_numbers = #tpu.dot_dimension_numbers<[1], [0], [0], [1], [0, 0, 1, 1], [], []>} : vector<24x24xbf16>, vector<24x128xbf16>, vector<24x128xf32> -> vector<24x128xf32>
    %45 = vector.extract_strided_slice %28 {offsets = [4, 0, 0], sizes = [1, 24, 128], strides = [1, 1, 1]} : vector<8x24x128xbf16> to vector<1x24x128xbf16>
    %46 = vector.shape_cast %45 : vector<1x24x128xbf16> to vector<24x128xbf16>
    %cst_25 = arith.constant dense<0.000000e+00> : vector<24x128xf32>
    %47 = tpu.matmul %30, %46, %cst_25 {dimension_numbers = #tpu.dot_dimension_numbers<[1], [0], [0], [1], [0, 0, 1, 1], [], []>} : vector<24x24xbf16>, vector<24x128xbf16>, vector<24x128xf32> -> vector<24x128xf32>
    %48 = vector.extract_strided_slice %28 {offsets = [5, 0, 0], sizes = [1, 24, 128], strides = [1, 1, 1]} : vector<8x24x128xbf16> to vector<1x24x128xbf16>
    %49 = vector.shape_cast %48 : vector<1x24x128xbf16> to vector<24x128xbf16>
    %cst_26 = arith.constant dense<0.000000e+00> : vector<24x128xf32>
    %50 = tpu.matmul %30, %49, %cst_26 {dimension_numbers = #tpu.dot_dimension_numbers<[1], [0], [0], [1], [0, 0, 1, 1], [], []>} : vector<24x24xbf16>, vector<24x128xbf16>, vector<24x128xf32> -> vector<24x128xf32>
    %51 = vector.extract_strided_slice %28 {offsets = [6, 0, 0], sizes = [1, 24, 128], strides = [1, 1, 1]} : vector<8x24x128xbf16> to vector<1x24x128xbf16>
    %52 = vector.shape_cast %51 : vector<1x24x128xbf16> to vector<24x128xbf16>
    %cst_27 = arith.constant dense<0.000000e+00> : vector<24x128xf32>
    %53 = tpu.matmul %30, %52, %cst_27 {dimension_numbers = #tpu.dot_dimension_numbers<[1], [0], [0], [1], [0, 0, 1, 1], [], []>} : vector<24x24xbf16>, vector<24x128xbf16>, vector<24x128xf32> -> vector<24x128xf32>
    %54 = vector.extract_strided_slice %28 {offsets = [7, 0, 0], sizes = [1, 24, 128], strides = [1, 1, 1]} : vector<8x24x128xbf16> to vector<1x24x128xbf16>
    %55 = vector.shape_cast %54 : vector<1x24x128xbf16> to vector<24x128xbf16>
    %cst_28 = arith.constant dense<0.000000e+00> : vector<24x128xf32>
    %56 = tpu.matmul %30, %55, %cst_28 {dimension_numbers = #tpu.dot_dimension_numbers<[1], [0], [0], [1], [0, 0, 1, 1], [], []>} : vector<24x24xbf16>, vector<24x128xbf16>, vector<24x128xf32> -> vector<24x128xf32>
    %57 = vector.extract_strided_slice %28 {offsets = [0, 0, 0], sizes = [1, 24, 128], strides = [1, 1, 1]} : vector<8x24x128xbf16> to vector<1x24x128xbf16>
    %58 = vector.shape_cast %57 : vector<1x24x128xbf16> to vector<24x128xbf16>
    %cst_29 = arith.constant dense<0.000000e+00> : vector<24x128xf32>
    %59 = tpu.matmul %32, %58, %cst_29 {dimension_numbers = #tpu.dot_dimension_numbers<[1], [0], [0], [1], [0, 0, 1, 1], [], []>} : vector<24x24xbf16>, vector<24x128xbf16>, vector<24x128xf32> -> vector<24x128xf32>
    %60 = vector.extract_strided_slice %28 {offsets = [1, 0, 0], sizes = [1, 24, 128], strides = [1, 1, 1]} : vector<8x24x128xbf16> to vector<1x24x128xbf16>
    %61 = vector.shape_cast %60 : vector<1x24x128xbf16> to vector<24x128xbf16>
    %cst_30 = arith.constant dense<0.000000e+00> : vector<24x128xf32>
    %62 = tpu.matmul %32, %61, %cst_30 {dimension_numbers = #tpu.dot_dimension_numbers<[1], [0], [0], [1], [0, 0, 1, 1], [], []>} : vector<24x24xbf16>, vector<24x128xbf16>, vector<24x128xf32> -> vector<24x128xf32>
    %63 = vector.extract_strided_slice %28 {offsets = [2, 0, 0], sizes = [1, 24, 128], strides = [1, 1, 1]} : vector<8x24x128xbf16> to vector<1x24x128xbf16>
    %64 = vector.shape_cast %63 : vector<1x24x128xbf16> to vector<24x128xbf16>
    %cst_31 = arith.constant dense<0.000000e+00> : vector<24x128xf32>
    %65 = tpu.matmul %32, %64, %cst_31 {dimension_numbers = #tpu.dot_dimension_numbers<[1], [0], [0], [1], [0, 0, 1, 1], [], []>} : vector<24x24xbf16>, vector<24x128xbf16>, vector<24x128xf32> -> vector<24x128xf32>
    %66 = vector.extract_strided_slice %28 {offsets = [3, 0, 0], sizes = [1, 24, 128], strides = [1, 1, 1]} : vector<8x24x128xbf16> to vector<1x24x128xbf16>
    %67 = vector.shape_cast %66 : vector<1x24x128xbf16> to vector<24x128xbf16>
    %cst_32 = arith.constant dense<0.000000e+00> : vector<24x128xf32>
    %68 = tpu.matmul %32, %67, %cst_32 {dimension_numbers = #tpu.dot_dimension_numbers<[1], [0], [0], [1], [0, 0, 1, 1], [], []>} : vector<24x24xbf16>, vector<24x128xbf16>, vector<24x128xf32> -> vector<24x128xf32>
    %69 = vector.extract_strided_slice %28 {offsets = [4, 0, 0], sizes = [1, 24, 128], strides = [1, 1, 1]} : vector<8x24x128xbf16> to vector<1x24x128xbf16>
    %70 = vector.shape_cast %69 : vector<1x24x128xbf16> to vector<24x128xbf16>
    %cst_33 = arith.constant dense<0.000000e+00> : vector<24x128xf32>
    %71 = tpu.matmul %32, %70, %cst_33 {dimension_numbers = #tpu.dot_dimension_numbers<[1], [0], [0], [1], [0, 0, 1, 1], [], []>} : vector<24x24xbf16>, vector<24x128xbf16>, vector<24x128xf32> -> vector<24x128xf32>
    %72 = vector.extract_strided_slice %28 {offsets = [5, 0, 0], sizes = [1, 24, 128], strides = [1, 1, 1]} : vector<8x24x128xbf16> to vector<1x24x128xbf16>
    %73 = vector.shape_cast %72 : vector<1x24x128xbf16> to vector<24x128xbf16>
    %cst_34 = arith.constant dense<0.000000e+00> : vector<24x128xf32>
    %74 = tpu.matmul %32, %73, %cst_34 {dimension_numbers = #tpu.dot_dimension_numbers<[1], [0], [0], [1], [0, 0, 1, 1], [], []>} : vector<24x24xbf16>, vector<24x128xbf16>, vector<24x128xf32> -> vector<24x128xf32>
    %75 = vector.extract_strided_slice %28 {offsets = [6, 0, 0], sizes = [1, 24, 128], strides = [1, 1, 1]} : vector<8x24x128xbf16> to vector<1x24x128xbf16>
    %76 = vector.shape_cast %75 : vector<1x24x128xbf16> to vector<24x128xbf16>
    %cst_35 = arith.constant dense<0.000000e+00> : vector<24x128xf32>
    %77 = tpu.matmul %32, %76, %cst_35 {dimension_numbers = #tpu.dot_dimension_numbers<[1], [0], [0], [1], [0, 0, 1, 1], [], []>} : vector<24x24xbf16>, vector<24x128xbf16>, vector<24x128xf32> -> vector<24x128xf32>
    %78 = vector.extract_strided_slice %28 {offsets = [7, 0, 0], sizes = [1, 24, 128], strides = [1, 1, 1]} : vector<8x24x128xbf16> to vector<1x24x128xbf16>
    %79 = vector.shape_cast %78 : vector<1x24x128xbf16> to vector<24x128xbf16>
    %cst_36 = arith.constant dense<0.000000e+00> : vector<24x128xf32>
    %80 = tpu.matmul %32, %79, %cst_36 {dimension_numbers = #tpu.dot_dimension_numbers<[1], [0], [0], [1], [0, 0, 1, 1], [], []>} : vector<24x24xbf16>, vector<24x128xbf16>, vector<24x128xf32> -> vector<24x128xf32>
    %81 = vector.shape_cast %35 : vector<24x128xf32> to vector<1x24x128xf32>
    %82 = vector.shape_cast %38 : vector<24x128xf32> to vector<1x24x128xf32>
    %83 = vector.shape_cast %41 : vector<24x128xf32> to vector<1x24x128xf32>
    %84 = vector.shape_cast %44 : vector<24x128xf32> to vector<1x24x128xf32>
    %85 = vector.shape_cast %47 : vector<24x128xf32> to vector<1x24x128xf32>
    %86 = vector.shape_cast %50 : vector<24x128xf32> to vector<1x24x128xf32>
    %87 = vector.shape_cast %53 : vector<24x128xf32> to vector<1x24x128xf32>
    %88 = vector.shape_cast %56 : vector<24x128xf32> to vector<1x24x128xf32>
    %89 = tpu.concatenate %81, %82, %83, %84, %85, %86, %87, %88 in 0 : vector<1x24x128xf32>, vector<1x24x128xf32>, vector<1x24x128xf32>, vector<1x24x128xf32>, vector<1x24x128xf32>, vector<1x24x128xf32>, vector<1x24x128xf32>, vector<1x24x128xf32> -> vector<8x24x128xf32>
    %c0_37 = arith.constant 0 : index
    %c0_38 = arith.constant 0 : index
    %c0_39 = arith.constant 0 : index
    %c0_40 = arith.constant 0 : index
    %90 = vector.load %arg6[%c0_37, %c0_38, %c0_39, %c0_40] : memref<1x1x24x1xf32, #tpu.memory_space<vmem>>, vector<1x1x24x1xf32>
    %91 = vector.shape_cast %90 : vector<1x1x24x1xf32> to vector<1x24x1xf32>
    %92 = vector.broadcast %91 : vector<1x24x1xf32> to vector<8x24x128xf32>
    %93 = arith.addf %89, %92 : vector<8x24x128xf32>
    %94 = vector.shape_cast %59 : vector<24x128xf32> to vector<1x24x128xf32>
    %95 = vector.shape_cast %62 : vector<24x128xf32> to vector<1x24x128xf32>
    %96 = vector.shape_cast %65 : vector<24x128xf32> to vector<1x24x128xf32>
    %97 = vector.shape_cast %68 : vector<24x128xf32> to vector<1x24x128xf32>
    %98 = vector.shape_cast %71 : vector<24x128xf32> to vector<1x24x128xf32>
    %99 = vector.shape_cast %74 : vector<24x128xf32> to vector<1x24x128xf32>
    %100 = vector.shape_cast %77 : vector<24x128xf32> to vector<1x24x128xf32>
    %101 = vector.shape_cast %80 : vector<24x128xf32> to vector<1x24x128xf32>
    %102 = tpu.concatenate %94, %95, %96, %97, %98, %99, %100, %101 in 0 : vector<1x24x128xf32>, vector<1x24x128xf32>, vector<1x24x128xf32>, vector<1x24x128xf32>, vector<1x24x128xf32>, vector<1x24x128xf32>, vector<1x24x128xf32>, vector<1x24x128xf32> -> vector<8x24x128xf32>
    %c0_41 = arith.constant 0 : index
    %c0_42 = arith.constant 0 : index
    %c0_43 = arith.constant 0 : index
    %c0_44 = arith.constant 0 : index
    %103 = vector.load %arg8[%c0_41, %c0_42, %c0_43, %c0_44] : memref<1x1x24x1xf32, #tpu.memory_space<vmem>>, vector<1x1x24x1xf32>
    %104 = vector.shape_cast %103 : vector<1x1x24x1xf32> to vector<1x24x1xf32>
    %105 = vector.broadcast %104 : vector<1x24x1xf32> to vector<8x24x128xf32>
    %106 = arith.addf %102, %105 : vector<8x24x128xf32>
    %107 = arith.negf %106 : vector<8x24x128xf32>
    %108 = math.exp %107 : vector<8x24x128xf32>
    %cst_45 = arith.constant 1.000000e+00 : f32
    %109 = vector.broadcast %cst_45 : f32 to vector<8x24x128xf32>
    %110 = arith.addf %109, %108 : vector<8x24x128xf32>
    %111 = arith.divf %109, %110 : vector<8x24x128xf32>
    %112 = arith.mulf %93, %111 : vector<8x24x128xf32>
    %113 = arith.addf %112, %3 : vector<8x24x128xf32>
    %cst_46 = arith.constant dense<0.000000e+00> : vector<8x128xf32>
    %114 = vector.multi_reduction <add>, %113, %cst_46 [1] : vector<8x24x128xf32> to vector<8x128xf32>
    %115 = vector.shape_cast %114 : vector<8x128xf32> to vector<8x1x128xf32>
    %cst_47 = arith.constant 5.000000e-02 : f32
    %116 = vector.broadcast %cst_47 : f32 to vector<8x1x128xf32>
    %117 = arith.mulf %115, %116 : vector<8x1x128xf32>
    %118 = vector.broadcast %117 : vector<8x1x128xf32> to vector<8x24x128xf32>
    %119 = arith.subf %113, %118 : vector<8x24x128xf32>
    %120 = arith.mulf %119, %119 : vector<8x24x128xf32>
    %cst_48 = arith.constant dense<0.000000e+00> : vector<8x128xf32>
    %121 = vector.multi_reduction <add>, %120, %cst_48 [1] : vector<8x24x128xf32> to vector<8x128xf32>
    %122 = vector.shape_cast %121 : vector<8x128xf32> to vector<8x1x128xf32>
    %123 = arith.mulf %117, %117 : vector<8x1x128xf32>
    %cst_49 = arith.constant 4.000000e+00 : f32
    %124 = vector.broadcast %cst_49 : f32 to vector<8x1x128xf32>
    %125 = arith.mulf %124, %123 : vector<8x1x128xf32>
    %126 = arith.subf %122, %125 : vector<8x1x128xf32>
    %cst_50 = arith.constant 5.000000e-02 : f32
    %127 = vector.broadcast %cst_50 : f32 to vector<8x1x128xf32>
    %128 = arith.mulf %126, %127 : vector<8x1x128xf32>
    %cst_51 = arith.constant 9.99999974E-6 : f32
    %129 = vector.broadcast %cst_51 : f32 to vector<8x1x128xf32>
    %130 = arith.addf %128, %129 : vector<8x1x128xf32>
    %131 = math.rsqrt %130 : vector<8x1x128xf32>
    %132 = vector.broadcast %131 : vector<8x1x128xf32> to vector<8x24x128xf32>
    %133 = arith.mulf %119, %132 : vector<8x24x128xf32>
    %c0_52 = arith.constant 0 : index
    %c0_53 = arith.constant 0 : index
    %c0_54 = arith.constant 0 : index
    %c0_55 = arith.constant 0 : index
    %134 = vector.load %arg9[%c0_52, %c0_53, %c0_54, %c0_55] : memref<1x1x24x1xf32, #tpu.memory_space<vmem>>, vector<1x1x24x1xf32>
    %135 = vector.shape_cast %134 : vector<1x1x24x1xf32> to vector<1x24x1xf32>
    %136 = vector.broadcast %135 : vector<1x24x1xf32> to vector<8x24x128xf32>
    %137 = arith.mulf %133, %136 : vector<8x24x128xf32>
    %c0_56 = arith.constant 0 : index
    %c0_57 = arith.constant 0 : index
    %c0_58 = arith.constant 0 : index
    %c0_59 = arith.constant 0 : index
    %138 = vector.load %arg10[%c0_56, %c0_57, %c0_58, %c0_59] : memref<1x1x24x1xf32, #tpu.memory_space<vmem>>, vector<1x1x24x1xf32>
    %139 = vector.shape_cast %138 : vector<1x1x24x1xf32> to vector<1x24x1xf32>
    %140 = vector.broadcast %139 : vector<1x24x1xf32> to vector<8x24x128xf32>
    %141 = arith.addf %137, %140 : vector<8x24x128xf32>
    %c0_60 = arith.constant 0 : index
    %c0_61 = arith.constant 0 : index
    %c0_62 = arith.constant 0 : index
    %142 = vector.load %arg16[%c0_60, %c0_61, %c0_62] : memref<8x24x128xf32, #tpu.memory_space<vmem>>, vector<8x24x128xf32>
    tpu.vector_store %arg16[%c0_60, %c0_61, %c0_62], %141 {strides = array<i32>} : memref<8x24x128xf32, #tpu.memory_space<vmem>>, vector<8x24x128xf32>,
    %c1_i32 = arith.constant 1 : i32
    %143 = arith.cmpi eq, %arg1, %c1_i32 : i32
    %144 = arith.extui %143 : i1 to i32
    %c0_i32_63 = arith.constant 0 : i32
    %145 = arith.cmpi ne, %144, %c0_i32_63 : i32
    scf.if %145 {
      %cst_64 = arith.constant dense<0.000000e+00> : vector<8x24xf32>
      %146 = vector.multi_reduction <add>, %141, %cst_64 [2] : vector<8x24x128xf32> to vector<8x24xf32>
      %cst_65 = arith.constant 1.280000e+02 : f32
      %147 = vector.broadcast %cst_65 : f32 to vector<8x24xf32>
      %148 = arith.divf %146, %147 : vector<8x24xf32>
      %149 = arith.truncf %148 : vector<8x24xf32> to vector<8x24xbf16>
      %c0_66 = arith.constant 0 : index
      %c0_67 = arith.constant 0 : index
      %150 = vector.load %arg13[%c0_66, %c0_67] : memref<24x128xbf16, #tpu.memory_space<vmem>>, vector<24x128xbf16>
      %cst_68 = arith.constant dense<0.000000e+00> : vector<8x128xf32>
      %151 = tpu.matmul %149, %150, %cst_68 {dimension_numbers = #tpu.dot_dimension_numbers<[1], [0], [0], [1], [0, 0, 1, 1], [], []>} : vector<8x24xbf16>, vector<24x128xbf16>, vector<8x128xf32> -> vector<8x128xf32>
      %c0_69 = arith.constant 0 : index
      %c0_70 = arith.constant 0 : index
      %152 = vector.load %arg14[%c0_69, %c0_70] : memref<1x128xf32, #tpu.memory_space<vmem>>, vector<1x128xf32>
      %153 = vector.broadcast %152 : vector<1x128xf32> to vector<8x128xf32>
      %154 = arith.addf %151, %153 : vector<8x128xf32>
      %c0_71 = arith.constant 0 : index
      %c0_72 = arith.constant 0 : index
      %155 = vector.load %arg15[%c0_71, %c0_72] : memref<8x128xf32, #tpu.memory_space<vmem>>, vector<8x128xf32>
      tpu.vector_store %arg15[%c0_71, %c0_72], %154 {strides = array<i32>} : memref<8x128xf32, #tpu.memory_space<vmem>>, vector<8x128xf32>,
    } else {
    }
    return
  }
  func.func @transform_0(%arg0: i32, %arg1: i32) -> (i32, i32, i32) {
    %c0_i32 = arith.constant 0 : i32
    %c0_i32_0 = arith.constant 0 : i32
    %c0_i32_1 = arith.constant 0 : i32
    return %arg0, %c0_i32, %c0_i32_0 : i32, i32, i32
  }
  func.func @transform_1(%arg0: i32, %arg1: i32) -> (i32, i32, i32, i32) {
    %c0_i32 = arith.constant 0 : i32
    %c0_i32_0 = arith.constant 0 : i32
    %c0_i32_1 = arith.constant 0 : i32
    %c0_i32_2 = arith.constant 0 : i32
    return %arg1, %c0_i32, %c0_i32_0, %c0_i32_1 : i32, i32, i32, i32
  }
  func.func @transform_2(%arg0: i32, %arg1: i32) -> (i32, i32, i32, i32) {
    %c0_i32 = arith.constant 0 : i32
    %c0_i32_0 = arith.constant 0 : i32
    %c0_i32_1 = arith.constant 0 : i32
    %c0_i32_2 = arith.constant 0 : i32
    return %arg1, %c0_i32, %c0_i32_0, %c0_i32_1 : i32, i32, i32, i32
  }
  func.func @transform_3(%arg0: i32, %arg1: i32) -> (i32, i32, i32) {
    %c0_i32 = arith.constant 0 : i32
    %c0_i32_0 = arith.constant 0 : i32
    %c0_i32_1 = arith.constant 0 : i32
    return %arg1, %c0_i32, %c0_i32_0 : i32, i32, i32
  }
  func.func @transform_4(%arg0: i32, %arg1: i32) -> (i32, i32, i32, i32) {
    %c0_i32 = arith.constant 0 : i32
    %c0_i32_0 = arith.constant 0 : i32
    %c0_i32_1 = arith.constant 0 : i32
    %c0_i32_2 = arith.constant 0 : i32
    return %arg1, %c0_i32, %c0_i32_0, %c0_i32_1 : i32, i32, i32, i32
  }
  func.func @transform_5(%arg0: i32, %arg1: i32) -> (i32, i32, i32) {
    %c0_i32 = arith.constant 0 : i32
    %c0_i32_0 = arith.constant 0 : i32
    %c0_i32_1 = arith.constant 0 : i32
    return %arg1, %c0_i32, %c0_i32_0 : i32, i32, i32
  }
  func.func @transform_6(%arg0: i32, %arg1: i32) -> (i32, i32, i32, i32) {
    %c0_i32 = arith.constant 0 : i32
    %c0_i32_0 = arith.constant 0 : i32
    %c0_i32_1 = arith.constant 0 : i32
    %c0_i32_2 = arith.constant 0 : i32
    return %arg1, %c0_i32, %c0_i32_0, %c0_i32_1 : i32, i32, i32, i32
  }
  func.func @transform_7(%arg0: i32, %arg1: i32) -> (i32, i32, i32, i32) {
    %c0_i32 = arith.constant 0 : i32
    %c0_i32_0 = arith.constant 0 : i32
    %c0_i32_1 = arith.constant 0 : i32
    %c0_i32_2 = arith.constant 0 : i32
    return %arg1, %c0_i32, %c0_i32_0, %c0_i32_1 : i32, i32, i32, i32
  }
  func.func @transform_8(%arg0: i32, %arg1: i32) -> (i32, i32, i32, i32) {
    %c0_i32 = arith.constant 0 : i32
    %c0_i32_0 = arith.constant 0 : i32
    %c0_i32_1 = arith.constant 0 : i32
    %c0_i32_2 = arith.constant 0 : i32
    return %arg1, %c0_i32, %c0_i32_0, %c0_i32_1 : i32, i32, i32, i32
  }
  func.func @transform_9(%arg0: i32, %arg1: i32) -> (i32, i32) {
    %c0_i32 = arith.constant 0 : i32
    %c0_i32_0 = arith.constant 0 : i32
    %c0_i32_1 = arith.constant 0 : i32
    return %c0_i32, %c0_i32_0 : i32, i32
  }
  func.func @transform_10(%arg0: i32, %arg1: i32) -> (i32, i32, i32) {
    %c0_i32 = arith.constant 0 : i32
    %c0_i32_0 = arith.constant 0 : i32
    %c0_i32_1 = arith.constant 0 : i32
    %c0_i32_2 = arith.constant 0 : i32
    return %c0_i32, %c0_i32_0, %c0_i32_1 : i32, i32, i32
  }
  func.func @transform_11(%arg0: i32, %arg1: i32) -> (i32, i32) {
    %c0_i32 = arith.constant 0 : i32
    %c0_i32_0 = arith.constant 0 : i32
    %c0_i32_1 = arith.constant 0 : i32
    return %c0_i32, %c0_i32_0 : i32, i32
  }
  func.func @transform_12(%arg0: i32, %arg1: i32) -> (i32, i32) {
    %c0_i32 = arith.constant 0 : i32
    %c0_i32_0 = arith.constant 0 : i32
    %c0_i32_1 = arith.constant 0 : i32
    return %c0_i32, %c0_i32_0 : i32, i32
  }
  func.func @transform_13(%arg0: i32, %arg1: i32) -> (i32, i32) {
    %c0_i32 = arith.constant 0 : i32
    %c0_i32_0 = arith.constant 0 : i32
    return %arg0, %c0_i32 : i32, i32
  }
}

</mosaic_0001>

<bundles_post_ra>
// kernel: tpu_custom_call.1
= control target key start
LH: loop header
LB: loop body
LE: loop exit
PB: predicated region body
PF: predicated region fallthrough
CT: control target
= control target key end

     0   :  { %s11576_s0 = inlined_call_operand.vmem [shape: f32[16,3,128], index: 0, kind: input, shape index: {}]   ;;  %s11577_s1 = inlined_call_operand.hbm [shape: bf16[2,24,128,128], index: 1, kind: input, shape index: {}]   ;;  %s11578_s2 = inlined_call_operand.vmem [shape: f32[2,1,24,1], index: 2, kind: input, shape index: {}]   ;;  %s11579_s3 = inlined_call_operand.hbm [shape: bf16[2,24,24], index: 3, kind: input, shape index: {}]   ;;  %s11580_s4 = inlined_call_operand.vmem [shape: f32[2,1,24,1], index: 4, kind: input, shape index: {}]   ;;  %s11581_s5 = inlined_call_operand.hbm [shape: bf16[2,24,24], index: 5, kind: input, shape index: {}]   ;;  %s11582_s6 = inlined_call_operand.vmem [shape: f32[2,1,24,1], index: 6, kind: input, shape index: {}]   ;;  %s11583_s7 = inlined_call_operand.vmem [shape: f32[2,1,24,1], index: 7, kind: input, shape index: {}]   ;;  %s11584_s8 = inlined_call_operand.vmem [shape: f32[2,1,24,1], index: 8, kind: input, shape index: {}]   ;;  %s11585_s9 = inlined_call_operand.vmem [shape: bf16[24,3], index: 9, kind: input, shape index: {}]   ;;  %s11586_s10 = inlined_call_operand.vmem [shape: f32[1,24,1], index: 10, kind: input, shape index: {}]   ;;  %s11587_s11 = inlined_call_operand.hbm [shape: bf16[24,128], index: 11, kind: input, shape index: {}]   ;;  %s11588_s12 = inlined_call_operand.hbm [shape: f32[1,128], index: 12, kind: input, shape index: {}]   ;;  %s11589_s13 = inlined_call_operand.hbm [shape: f32[16,128], index: 13, kind: output, shape index: {}]  }
   0x1   :  { %11616 = sst [smem:[#allocation27_spill]] %s11576_s0 }
   0x2   :  { %11617 = sst [smem:[#allocation28_spill]] %s11577_s1 }
   0x3   :  { %11618 = sst [smem:[#allocation29_spill]] %s11578_s2 }
   0x4   :  { %11619 = sst [smem:[#allocation30_spill]] %s11579_s3 }
   0x5   :  { %11620 = sst [smem:[#allocation31_spill]] %s11580_s4 }
   0x6   :  { %11621 = sst [smem:[#allocation32_spill]] %s11582_s6 }
   0x7   :  { %11622 = sst [smem:[#allocation33_spill]] %s11583_s7 }
   0x8   :  { %11623 = sst [smem:[#allocation34_spill]] %s11584_s8 }
   0x9   :  { %11624 = sst [smem:[#allocation35_spill]] %s11585_s9 }
   0xa   :  { %11625 = sst [smem:[#allocation36_spill]] %s11586_s10 }
   0xb   :  { %11626 = sst [smem:[#allocation37_spill]] %s11587_s11 }
   0xc   :  { %11627 = sst [smem:[#allocation38_spill]] %s11588_s12 }
   0xd   :  { %11628 = sst [smem:[#allocation39_spill]] %s11589_s13 }
   0xe   :  { %18 = vsyncpa [#allocation4], 0 }
   0xf   :  { %20 = vsyncpa [#allocation4 + $0x1], 0 }
  0x10   :  { %21 = vsyncpa [#allocation7], 0 }
  0x11   :  { %23 = vsyncpa [#allocation7 + $0x1], 0 }
  0x12   :  { %24 = vsyncpa [#allocation10], 0 }
  0x13   :  { %25 = vsyncpa [#allocation5], 0 }
  0x14   :  { %27 = vsyncpa [#allocation5 + $0x1], 0  ;;  %s9138_s25 = smov 0   ;;  %s9140_s26 = smov 0  }
  0x15   :  { %s9142_s27 = smov 0   ;;  %s9144_s28 = smov 0  }
  0x16   :  { %s9146_s29 = smov 0   ;;  %s9148_s30 = smov 0  }
  0x17   :  { %s9150_s14 = smov 0   ;;  %s9152_s15 = smov 0  }
  0x18   :  { %s9154_s16 = smov 0   ;;  %s9156_s17 = smov 0  }
  0x19   :  { %s9158_s18 = smov 0  }
  0x1a LB: > { %11629 = sst [smem:[#allocation17_spill]] %s9009_s25  ;;  %s9192_s19 = sadd.s32 4294967295, %s9049_s18   ;;  %s9049_s18 = sphi %s9158_s18, %s33_s18   ;;  %s9045_s17 = sphi %s9156_s17, %s11695_s17   ;;  %s9041_s16 = sphi %s9154_s16, %s11694_s16   ;;  %s9037_s15 = sphi %s9152_s15, %s11685_s15   ;;  %s9033_s14 = sphi %s9150_s14, %s11693_s14   ;;  %s9029_s30 = sphi %s9148_s30, %s11683_s30   ;;  %s9025_s29 = sphi %s9146_s29, %s11692_s29   ;;  %s9021_s28 = sphi %s9144_s28, %s11691_s28   ;;  %s9017_s27 = sphi %s9142_s27, %s11690_s27   ;;  %s9013_s26 = sphi %s9140_s26, %s11689_s26   ;;  %s9009_s25 = sphi %s9138_s25, %s11688_s25  }
  0x1b   : > { %11630 = sst [smem:[#allocation18_spill]] %s9029_s30  ;;  %s6902_s20 = sadd.s32 4294967294, %s9049_s18  }
  0x1c   : > { %11631 = sst [smem:[#allocation19_spill]] %s9041_s16  ;;  %p85_p0 = scmp.ne.s32.totalorder %s9029_s30, %s9025_s29 }
  0x1d   : > { %11632 = sst [smem:[#allocation20_spill]] %s9045_s17  ;;  %p86_p1 = scmp.eq.s32.totalorder %s9049_s18, 0 }
  0x1e   : > { %p91_p2 = scmp.ne.s32.totalorder %s9025_s29, %s9021_s28  ;;  %p11597_p3 = scmp.eq.s32.totalorder %s9192_s19, 0 }
  0x1f   : > { %p9202_p4 = por %p86_p1, %p85_p0  ;;  %p380_p5 = scmp.ne.s32.totalorder %s9017_s27, %s9013_s26 }
  0x20   : > { %p9210_p6 = por %p11597_p3, %p91_p2  ;;  %p381_p7 = scmp.eq.s32.totalorder %s9192_s19, 3 }
  0x21   : > { %s11633_s23 = scalar_select %p9202_p4, 1, 0 }
  0x22   : > { %s11634_s24 = scalar_select %p9210_p6, 1, 0 }
  0x23   : > { %p386_p8 = scmp.ne.s32.totalorder %s9013_s26, %s9009_s25  ;;  %p387_p9 = scmp.eq.s32.totalorder %s6902_s20, 3 }
  0x24   : > { %p9217_p10 = por %p381_p7, %p380_p5  ;;  %p6903_p11 = scmp.ge.s32.totalorder %s9049_s18, 1 }
  0x25   : > { %p9222_p12 = por %p387_p9, %p386_p8  ;;  %p394_p13 = scmp.lt.s32.totalorder %s9049_s18, 5 }
  0x26   : > { %s11635_s21 = scalar_select %p9217_p10, 1, 0 }
  0x27   : > { %s11637_s28 = scalar_select %p9222_p12, 1, 0 }
  0x28   : > { %11636 = sst [smem:[#allocation21_spill]] %s11635_s21  ;;  %p9227_p0 = pnand %p6903_p11, %p394_p13 }
  0x29   : > { %11638 = sst [smem:[#allocation22_spill]] %s11637_s28  ;;  %s9051_s13 = smov [#allocation9]  }
  0x2a   : > { %s11639_s22 = scalar_select %p9227_p0, 1, 0 }
  0x2b   : > { %s412_s10 = sshll.u32 %s9051_s13, 4  ;;  %p8213_p1 = pneg %p9227_p0  ;;  %s413_s10 = int_to_ptr.vmem [resolvable:$true] %s412_s10 }
  0x2c   : > { %s42_s25 = sadd.s32 1, %s9041_s16  ;;  %s11641_s11 = sld [smem:[#allocation37_spill]] }
  0x2d   : > { %p9235_p2 = pnand %p8213_p1, %p11597_p3 }
  0x2f   : > { %s11640_s20 = scalar_select %p9235_p2, 1, 0 }
  0x30   : > { %p11610_p7 = pneg %p9235_p2 }
  0x32   : > { %s8773_s9 = scalar_lea.hbm %s11641_s11, 192 }
  0x33   : > { %p8774_p5 = scmp.ne.s32.totalorder %s11641_s11, %s8773_s9  ;;  %p8780_p11 = scmp.lt.u32.totalorder %s8773_s9, %s11641_s11 }
  0x35   : > { %p8776_p8 = pnand %p11610_p7, %p8774_p5 }
  0x37   : > { %p8777_p9 = pneg %p8776_p8 }
  0x39   : > { %p8782_p13 = pnand %p8780_p11, %p8777_p9 }
  0x3b   : > { %8785 = shalt.err (!%p8782_p13)
}
  0x3c   : > { %s8786_s4 = scalar_lea.vmem %s413_s10, 192  ;;  %p8794_p10 = scmp.lt.s32.totalorder %s413_s10, %s413_s10 }
  0x3d   : > { %p8787_p1 = scmp.ne.s32.totalorder %s413_s10, %s8786_s4  ;;  %p8795_p6 = scmp.lt.s32.totalorder %s8786_s4, %s8786_s4 }
  0x3f   : > { %p8789_p3 = pnand %p8787_p1, %p11610_p7  ;;  %p8796_p0 = por %p8795_p6, %p8794_p10 }
  0x41   : > { %p8790_p12 = pneg %p8789_p3 }
  0x43   : > { %p8797_p4 = pnand %p8796_p0, %p8790_p12 }
  0x45   : > { %8800 = shalt.err (!%p8797_p4)
}
  0x46   : > { %s11601_s7 = smov 64   ;;  %s11603_s6 = smov 4  }
  0x47   : > { %8216 = dma.hbm_to_vmem [thread:$0]  (!%p9235_p2), %s11641_s11, 192, %s413_s10, [#allocation10], %s11601_s7, %s11601_s7, %s11603_s6  }
  0x48   : > { %p43_p3 = scmp.ge.s32.totalorder %s42_s25, 2  ;;  %s45_s9 = sadd.s32 1, %s9045_s17 }
  0x49   : > { %p8236_p4 = scmp.lt.s32.totalorder %s9049_s18, 4  ;;  %s9268_s21 = sand.u32 1, %s9029_s30  }
  0x4a   : > { %s11697_s25 = smov (%p43_p3, %s42_s25), 0  ;;  %s11699_s9 = smov (!%p43_p3, %s45_s9), %s9045_s17 }
  0x4b   : > { %11642 = sst [smem:[#allocation23_spill]] %s11697_s25  ;;  %s75_s28 = ssub.s32 %s9041_s16, %s11697_s25 }
  0x4c   : > { %p11643_p6 = scmp.ne.s32.totalorder %s11633_s23, 0  ;;  %p47_p12 = scmp.ge.s32.totalorder %s11699_s9, 2 }
  0x4d   : > { %p76_p0 = scmp.eq.s32.totalorder %s75_s28, 0  ;;  %s475_s10 = sand.u32 1, %s9049_s18  }
  0x4e   : > { %p9277_p10 = pnand %p8236_p4, %p11643_p6  ;;  %s11701_s9 = smov (%p47_p12, %s11699_s9), 0 }
  0x4f   : > { %11645 = sst [smem:[#allocation24_spill]] %s11701_s9  ;;  %s11646_s4 = sadd.s32 1, %s9029_s30 }
  0x50   : > { %s9287_s8 = scalar_select %p76_p0, %s9029_s30, %s11646_s4  }
  0x51   : > { %s367_s7 = ssub.s32 %s9045_s17, %s11701_s9  ;;  %s11608_s6 = smul.u32 12, %s9268_s21 }
  0x52   : > { %11647 = sst [smem:[#allocation25_spill]] %s9287_s8  ;;  %p368_p5 = scmp.eq.s32.totalorder %s367_s7, 0 }
  0x53   : > { %s11609_s11 = smul.u32 192, %s9041_s16  ;;  %s11648_s25 = sadd.s32 1, %s9017_s27 }
  0x54   : > { %s9296_s23 = scalar_select %p368_p5, %s9017_s27, %s11648_s25  }
  0x55   : > { %s11650_s3 = sld [smem:[#allocation30_spill]]  ;;  %s479_s4 = scalar_lea.vmem [#allocation6], %s11608_s6 }
  0x56   : > { %11649 = sst [smem:[#allocation26_spill]] %s9296_s23  ;;  %s486_s8 = sshll.u32 %s479_s4, 4  ;;  %s9307_s8 = int_to_ptr.vmem [resolvable:$true] %s486_s8 }
  0x57   : > { %s9054_s9 = smov [#allocation11]   ;;  %s9311_s25 = scalar_lea.sflag [#allocation7], %s475_s10 }
  0x58   : > { %s426_s7 = sshll.u32 %s9054_s9, 4  ;;  %p9317_p9 = pneg %p9277_p10  ;;  %s9309_s7 = int_to_ptr.vmem [resolvable:$true] %s426_s7 }
  0x5b   : > { %s9303_s28 = scalar_lea.hbm %s11650_s3, %s11609_s11  ;;  %s8806_s9 = scalar_lea.hbm %s11650_s3, 384 }
  0x5c   : > { %s8801_s17 = scalar_lea.hbm %s9303_s28, 192  ;;  %p8807_p1 = scmp.lt.u32.totalorder %s9303_s28, %s11650_s3 }
  0x5d   : > { %p8802_p8 = scmp.ne.s32.totalorder %s9303_s28, %s8801_s17  ;;  %p8808_p3 = scmp.lt.u32.totalorder %s8806_s9, %s8801_s17 }
  0x5e   : > { %p8810_p6 = scmp.lt.u32.totalorder %s8801_s17, %s9303_s28 }
  0x5f   : > { %p8804_p11 = pnand %p9317_p9, %p8802_p8  ;;  %p8809_p4 = por %p8808_p3, %p8807_p1 }
  0x61   : > { %p8805_p13 = pneg %p8804_p11  ;;  %p8811_p12 = por %p8810_p6, %p8809_p4 }
  0x63   : > { %p8812_p0 = pnand %p8811_p12, %p8805_p13 }
  0x65   : > { %8815 = shalt.err (!%p8812_p0)
}
  0x66   : > { %s8816_s10 = scalar_lea.vmem %s9307_s8, 192  ;;  %s9055_s2 = smov [#allocation6]  }
  0x67   : > { %p8817_p5 = scmp.ne.s32.totalorder %s9307_s8, %s8816_s10  ;;  %s8821_s4 = sshll.u32 %s9055_s2, 4  ;;  %s8822_s4 = int_to_ptr.vmem [resolvable:$false] %s8821_s4 }
  0x68   : > { %s8823_s11 = scalar_lea.vmem %s8822_s4, 384  ;;  %p8824_p7 = scmp.lt.s32.totalorder %s9307_s8, %s8822_s4 }
  0x69   : > { %p8819_p8 = pnand %p8817_p5, %p9317_p9  ;;  %p8825_p2 = scmp.lt.s32.totalorder %s8823_s11, %s8816_s10 }
  0x6b   : > { %p8820_p11 = pneg %p8819_p8  ;;  %p8826_p1 = por %p8825_p2, %p8824_p7 }
  0x6d   : > { %p8827_p3 = pnand %p8826_p1, %p8820_p11 }
  0x6f   : > { %8830 = shalt.err (!%p8827_p3)
}
  0x70   : > { %s11652_s17 = smov 4   ;;  %s11653_s6 = smov 64  }
  0x71   : > { %8226 = dma.hbm_to_vmem [thread:$0]  (!%p9277_p10), %s9303_s28, 192, %s9307_s8, %s9311_s25, %s11653_s6, %s11653_s6, %s11652_s17  }
  0x72   : > { %s11654_s12 = sld [smem:[#allocation38_spill]]  ;;  %p11655_p7 = scmp.ne.s32.totalorder %s11640_s20, 0 }
  0x74   : > { %p11656_p13 = pneg %p11655_p7 }
  0x78   : > { %s8831_s2 = scalar_lea.hbm %s11654_s12, 16 }
  0x79   : > { %p8832_p2 = scmp.ne.s32.totalorder %s11654_s12, %s8831_s2  ;;  %p8838_p12 = scmp.lt.u32.totalorder %s8831_s2, %s11654_s12 }
  0x7b   : > { %p8834_p4 = pnand %p8832_p2, %p11656_p13 }
  0x7d   : > { %p8835_p6 = pneg %p8834_p4 }
  0x7f   : > { %p8840_p0 = pnand %p8838_p12, %p8835_p6 }
  0x81   : > { %8843 = shalt.err (!%p8840_p0)
}
  0x82   : > { %s8844_s3 = scalar_lea.vmem %s9309_s7, 16  ;;  %p11657_p8 = pmov %p11656_p13 }
  0x83   : > { %p8845_p5 = scmp.ne.s32.totalorder %s9309_s7, %s8844_s3  ;;  %s8851_s30 = scalar_lea.vmem %s9309_s7, 32 }
  0x84   : > { %p8852_p3 = scmp.lt.s32.totalorder %s9309_s7, %s9309_s7  ;;  %p8853_p2 = scmp.lt.s32.totalorder %s8851_s30, %s8844_s3 }
  0x85   : > { %p8847_p11 = pnand %p8845_p5, %p11657_p8 }
  0x86   : > { %p8854_p13 = por %p8853_p2, %p8852_p3 }
  0x87   : > { %p8848_p1 = pneg %p8847_p11 }
  0x89   : > { %p8855_p4 = pnand %p8854_p13, %p8848_p1 }
  0x8b   : > { %8858 = shalt.err (!%p8855_p4)
}
  0x8c   : > { %8219 = dma.hbm_to_vmem [thread:$0]  (!%p11655_p7), %s11654_s12, 16, %s9309_s7, [#allocation10]  }
  0x8d   : > { %s8188_s9 = smul.u32 1536, %s9268_s21  ;;  %s11659_s1 = sld [smem:[#allocation28_spill]] }
  0x8e   : > { %s8189_s2 = smul.u32 24576, %s9041_s16 }
  0x8f   : > { %s11658_s4 = smul.u32 192, %s9041_s16  ;;  %s450_s8 = scalar_lea.vmem [#allocation3], %s8188_s9 }
  0x90   : > { %s457_s28 = sshll.u32 %s450_s8, 4  ;;  %s11660_s7 = smul.u32 12, %s9268_s21  ;;  %s9384_s28 = int_to_ptr.vmem [resolvable:$true] %s457_s28 }
  0x91   : > { %s9377_s3 = scalar_lea.hbm %s11581_s5, %s11658_s4  ;;  %s447_s4 = scalar_lea.sflag [#allocation4], %s9268_s21 }
  0x92   : > { %s9388_s12 = scalar_lea.vmem [#allocation8], %s11660_s7 }
  0x93   : > { %s9382_s23 = scalar_lea.hbm %s11659_s1, %s8189_s2  ;;  %s515_s10 = sshll.u32 %s9388_s12, 4  ;;  %s9420_s10 = int_to_ptr.vmem [resolvable:$true] %s515_s10 }
  0x94   : > { %s8859_s11 = scalar_lea.hbm %s9382_s23, 24576  ;;  %s8864_s30 = scalar_lea.hbm %s11659_s1, 49152 }
  0x95   : > { %p8860_p7 = scmp.ne.s32.totalorder %s9382_s23, %s8859_s11  ;;  %p8865_p0 = scmp.lt.u32.totalorder %s9382_s23, %s11659_s1 }
  0x96   : > { %p8866_p5 = scmp.lt.u32.totalorder %s8864_s30, %s8859_s11  ;;  %p8868_p11 = scmp.lt.u32.totalorder %s8859_s11, %s9382_s23 }
  0x97   : > { %p8862_p6 = pnand %p8860_p7, %p9317_p9 }
  0x98   : > { %p8867_p8 = por %p8866_p5, %p8865_p0 }
  0x99   : > { %p8863_p12 = pneg %p8862_p6 }
  0x9a   : > { %p8869_p1 = por %p8868_p11, %p8867_p8 }
  0x9c   : > { %p8870_p3 = pnand %p8869_p1, %p8863_p12 }
  0x9e   : > { %8873 = shalt.err (!%p8870_p3)
}
  0x9f   : > { %s8874_s8 = scalar_lea.vmem %s9384_s28, 24576  ;;  %s9056_s7 = smov [#allocation3]  }
  0xa0   : > { %p8875_p2 = scmp.ne.s32.totalorder %s9384_s28, %s8874_s8  ;;  %s8879_s2 = sshll.u32 %s9056_s7, 4  ;;  %s8880_s2 = int_to_ptr.vmem [resolvable:$false] %s8879_s2 }
  0xa1   : > { %s8881_s16 = scalar_lea.vmem %s8880_s2, 49152  ;;  %p8882_p7 = scmp.lt.s32.totalorder %s9384_s28, %s8880_s2 }
  0xa2   : > { %p8877_p13 = pnand %p8875_p2, %p9317_p9  ;;  %p8883_p6 = scmp.lt.s32.totalorder %s8881_s16, %s8874_s8 }
  0xa4   : > { %p8878_p4 = pneg %p8877_p13  ;;  %p8884_p0 = por %p8883_p6, %p8882_p7 }
  0xa6   : > { %p8885_p5 = pnand %p8884_p0, %p8878_p4 }
  0xa8   : > { %8888 = shalt.err (!%p8885_p5)
}
  0xa9   : > { %8223 = dma.hbm_to_vmem [thread:$0]  (!%p9277_p10), %s9382_s23, 24576, %s9384_s28, %s447_s4, %s11653_s6, %s11653_s6, %s11652_s17  }
  0xaa   : > { %s8889_s11 = scalar_lea.hbm %s9377_s3, 192  ;;  %s8894_s21 = scalar_lea.hbm %s11581_s5, 384 }
  0xab   : > { %p8890_p12 = scmp.ne.s32.totalorder %s9377_s3, %s8889_s11  ;;  %p8895_p1 = scmp.lt.u32.totalorder %s9377_s3, %s11581_s5 }
  0xac   : > { %p8896_p3 = scmp.lt.u32.totalorder %s8894_s21, %s8889_s11  ;;  %p8898_p13 = scmp.lt.u32.totalorder %s8889_s11, %s9377_s3 }
  0xad   : > { %p8892_p8 = pnand %p8890_p12, %p9317_p9 }
  0xae   : > { %p8897_p2 = por %p8896_p3, %p8895_p1 }
  0xaf   : > { %p8893_p11 = pneg %p8892_p8 }
  0xb0   : > { %p8899_p4 = por %p8898_p13, %p8897_p2 }
  0xb2   : > { %p8900_p7 = pnand %p8899_p4, %p8893_p11 }
  0xb4   : > { %8903 = shalt.err (!%p8900_p7)
}
  0xb5   : > { %s8904_s12 = scalar_lea.vmem %s9420_s10, 192  ;;  %s9057_s23 = smov [#allocation8]  }
  0xb6   : > { %p8905_p6 = scmp.ne.s32.totalorder %s9420_s10, %s8904_s12  ;;  %s8909_s28 = sshll.u32 %s9057_s23, 4  ;;  %s8910_s28 = int_to_ptr.vmem [resolvable:$false] %s8909_s28 }
  0xb7   : > { %s8911_s4 = scalar_lea.vmem %s8910_s28, 384  ;;  %p8912_p12 = scmp.lt.s32.totalorder %s9420_s10, %s8910_s28 }
  0xb8   : > { %p8907_p0 = pnand %p8905_p6, %p9317_p9  ;;  %p8913_p8 = scmp.lt.s32.totalorder %s8911_s4, %s8904_s12 }
  0xba   : > { %p8908_p5 = pneg %p8907_p0  ;;  %p8914_p1 = por %p8913_p8, %p8912_p12 }
  0xbc   : > { %p8915_p3 = pnand %p8914_p1, %p8908_p5 }
  0xbe   : > { %8918 = shalt.err (!%p8915_p3)
}
  0xbf   : > { %8229 = dma.hbm_to_vmem [thread:$0]  (!%p9277_p10), %s9377_s3, 192, %s9420_s10, %s9311_s25, %s11653_s6, %s11653_s6, %s11652_s17  }
  0xc0   : > { %p11661_p9 = scmp.ne.s32.totalorder %s11639_s22, 0 }
  0xc1   : > { %s553_s0 = sand.u32 (!%p11661_p9), 1, %s9025_s29   ;;  %p11662_p11 = scmp.ne.s32.totalorder (!%p11661_p9), %s11634_s24, 0 }
  0xc2   : > { %551 = sbr.rel (%p11661_p9) target bundleno = 2305 (0x901), region = 72  ;;  %s554_s2 = scalar_lea.sflag (!%p11661_p9), [#allocation4], %s553_s0 }
  0xc3   : > { %s8194_s7 = smul.u32 (!%p11661_p9), 1536, %s553_s0 }
  0xc5   : > { %s9450_s16 = scalar_lea.vmem (!%p11661_p9), [#allocation3], %s8194_s7 }
  0xc9   : > { %8992 = dma.done.wait (%p11662_p11), %s554_s2, 24576  }
  0xca   : > { %8994 = vsyncadd (%p11662_p11), %s554_s2, 4294942720  ;;  %s562_s13 = sand.u32 1, %s9192_s19   ;;  %s8195_s11 = smul.u32 12, %s553_s0 }
  0xcb   : > { %s563_s25 = scalar_lea.sflag [#allocation7], %s562_s13 }
  0xcc   : > { %s9457_s17 = scalar_lea.vmem [#allocation6], %s8195_s11 }
  0xcd   : > { %8996 = dma.done.wait (%p11662_p11), %s563_s25, 384  }
  0xce   : > { %8998 = vsyncadd (%p11662_p11), %s563_s25, 4294966912  ;;  %s9463_s22 = scalar_lea.vmem [#allocation8], %s8195_s11  ;;  %p11663_p10 = scmp.eq.s32.totalorder %s9192_s19, 0 }
  0xd0   : > { %9000 = dma.done.wait (%p11663_p10), [#allocation10], 208   ;;  %p11664_p2 = pmov %p11663_p10 }
  0xd1   : > { %s11615_s6 = sand.u32 1, %s9013_s26   ;;  %s6914_s3 = sshll.u32 %s9037_s15, 3 }
  0xd2   : > { %9002 = vsyncadd (%p11664_p2), [#allocation10], 4294967088  ;;  %s9473_s10 = sshll.u32 %s11615_s6, 3  ;;  %p667_p13 = scmp.lt.s32.totalorder %s6914_s3, 15 }
  0xd3   : > { %p672_p4 = scmp.lt.s32.totalorder %s9033_s14, 1  ;;  %s11665_s19 = sld [smem:[#allocation27_spill]] }
  0xd4   : > { %s11703_s3 = smov (!%p667_p13, %s6914_s3), 15  ;;  %s11666_s28 = sld [smem:[#allocation29_spill]] }
  0xd5   : > { %s673_s24 = scalar_select %p672_p4, %s9033_s14, 1 }
  0xd6   : > { %s6915_s20 = sshll.u32 %s11703_s3, 2  ;;  %s11667_s2 = sld [smem:[#allocation31_spill]] }
  0xd7   : > { %s8196_s8 = smul.u32 24, %s673_s24  ;;  %s11668_s6 = sld [smem:[#allocation32_spill]] }
  0xd8   : > { %s11670_s12 = sld [smem:[#allocation34_spill]]  ;;  %p6921_p7 = scmp.ne.s32.totalorder %s9033_s14, 0 }
  0xd9   : > { %s9480_s9 = scalar_lea.vmem %s11665_s19, %s6915_s20  ;;  %s11669_s20 = sld [smem:[#allocation33_spill]]  ;;  %vm736_vm0 = vcmask (!%p6921_p7), 1040384   ;;  %vm737_vm1 = vcmask (!%p6921_p7), 1041408   ;;  %v9058_v3 = vmov (!%p6921_p7), 65535   ;;  %vm729_vm2 = vcmask (!%p6921_p7), 23552  }
  0xda   : > { %s9485_s4 = scalar_lea.vmem %s11666_s28, %s8196_s8  ;;  %s665_s28 = scalar_lea.vmem [#allocation12], %s9473_s10  ;;  %v702_v0 = vld [vmem:[%s9480_s9] sm:$0x7] (!%p6921_p7)  ;;  %v738_v4 = vsel (!%p6921_p7), %vm736_vm0, 4294967295, %v9058_v3  ;;  %v703_v5 = vld [vmem:[%s9480_s9 + $0x4] sm:$0x7] (!%p6921_p7) }
  0xdb   : > { %701 = sbr.rel (%p6921_p7) target bundleno = 469 (0x1d5), region = 96  ;;  %s11671_s0 = sld [smem:[#allocation35_spill]] (!%p6921_p7)  ;;  %v710_v2 = vpack.c.bf16 (!%p6921_p7), %v702_v0, %v702_v0  ;;  %v739_v6 = vsel (!%p6921_p7), %vm737_vm1, %v738_v4, 0  ;;  %v711_v7 = vpack.c.bf16 (!%p6921_p7), %v703_v5, %v703_v5  ;;  %v704_v9 = vld [vmem:[%s9480_s9 + $0x8] sm:$0x7] (!%p6921_p7)  ;;  %v9059_v11 = vmov (!%p6921_p7), 0  }
  0xdc   : > { %s9490_s13 = scalar_lea.vmem %s11667_s2, %s8196_s8  ;;  %v705_v10 = vld [vmem:[%s9480_s9 + $0xc] sm:$0x7] (!%p6921_p7)  ;;  %8341 = vset.pattern.permute.xlu0 (!%p6921_p7), %v9059_v11  ;;  %8342 = vset.pattern.permute.xlu1 (!%p6921_p7), %v9059_v11  ;;  %v712_v13 = vpack.c.bf16 (!%p6921_p7), %v704_v9, %v704_v9  ;;  %v706_v15 = vld [vmem:[%s9480_s9 + $0x10] sm:$0x7] (!%p6921_p7)  ;;  %v707_v16 = vld [vmem:[%s9480_s9 + $0x14] sm:$0x7] (!%p6921_p7) }
  0xdd   : > { %s9495_s3 = scalar_lea.vmem %s11668_s6, %s8196_s8  ;;  %v741_v8 = vand.u32 (!%p6921_p7), %v739_v6, %v710_v2  ;;  %v792_v12 = vand.u32 (!%p6921_p7), %v739_v6, %v711_v7  ;;  %v713_v14 = vpack.c.bf16 (!%p6921_p7), %v705_v10, %v705_v10  ;;  %v714_v18 = vpack.c.bf16 (!%p6921_p7), %v706_v15, %v706_v15  ;;  %s11672_s25 = sld [smem:[#allocation36_spill]] (!%p6921_p7)  ;;  %v708_v26 = vld [vmem:[%s9480_s9 + $0x18] sm:$0x7] (!%p6921_p7)  ;;  %v709_v27 = vld [vmem:[%s9480_s9 + $0x1c] sm:$0x7] (!%p6921_p7) }
  0xde   : > { %s9505_s23 = scalar_lea.vmem %s11670_s12, %s8196_s8  ;;  %v715_v19 = vpack.c.bf16 (!%p6921_p7), %v707_v16, %v707_v16  ;;  %v843_v21 = vand.u32 (!%p6921_p7), %v739_v6, %v712_v13  ;;  %v716_v29 = vpack.c.bf16 (!%p6921_p7), %v708_v26, %v708_v26  ;;  %v717_v30 = vpack.c.bf16 (!%p6921_p7), %v709_v27, %v709_v27 }
  0xdf   : > { %s9500_s21 = scalar_lea.vmem %s11669_s20, %s8196_s8  ;;  %7508 = vmatprep.subr.bf16.mxu0 (!%p6921_p7), %v741_v8  ;;  %7514 = vmatprep.subr.bf16.mxu1 (!%p6921_p7), %v792_v12  ;;  %v894_v22 = vand.u32 (!%p6921_p7), %v739_v6, %v713_v14  ;;  %v945_v24 = vand.u32 (!%p6921_p7), %v739_v6, %v714_v18 }
  0xe0   : > { %7509 = vmatpush3.bf16.msra.mxu0 (!%p6921_p7), %v741_v8  ;;  %7515 = vmatpush3.bf16.msra.mxu1 (!%p6921_p7), %v792_v12  ;;  %v996_v25 = vand.u32 (!%p6921_p7), %v739_v6, %v715_v19  ;;  %v1047_v31 = vand.u32 (!%p6921_p7), %v739_v6, %v716_v29  ;;  %v1098_v32 = vand.u32 (!%p6921_p7), %v739_v6, %v717_v30 }
  0xe1   : > { %v9513_v1 = vld [vmem:[%s11671_s0] sm:$0xff] (!%p6921_p7)   ;;  %v8344_v17 = vld [vmem:[%s11671_s0 + $0x8] ss:$0 sps:$4 sm:$0xff] (!%p6921_p7)   ;;  %7520 = vmatprep.subr.bf16.mxu0 (!%p6921_p7), %v843_v21  ;;  %7526 = vmatprep.subr.bf16.mxu1 (!%p6921_p7), %v894_v22 }
  0xe2   : > { %7510 = vmatprep.mubr.msk.bf16.mxu0 %vm729_vm2, %v9513_v1  ;;  %7516 = vmatprep.mubr.msk.bf16.mxu1 %vm729_vm2, %v9513_v1 }
  0xe3   : > { %s11673_s20 = smov %s11672_s25  ;;  %v1148_v20 = vld [vmem:[%s11672_s25] sm:$0xff]  ;;  %7511 = vmatmul.mubr.msk.bf16.vlgmr.msra.gmra.mrb[0].mxu0 %vm729_vm2, %v8344_v17  ;;  %7517 = vmatmul.mubr.msk.bf16.vlgmr.msra.gmra.mrb[0].mxu1 %vm729_vm2, %v8344_v17 }
  0xe4   : > { %v1150_v23 = vld [vmem:[%s11673_s20 + $0x10] sm:$0xff]  ;;  %1153 = vperm.xlu0 %8341, %v1148_v20   ;;  %7521 = vmatpush3.bf16.msra.mxu0 %v843_v21  ;;  %v1149_v28 = vld [vmem:[%s11673_s20 + $0x8] sm:$0xff] }
  0xe5   : > { %1163 = vperm.xlu1 %8342, %v1150_v23   ;;  %7527 = vmatpush3.bf16.msra.mxu1 %v894_v22 }
  0xe6   : > { %7522 = vmatprep.mubr.msk.bf16.mxu0 %vm729_vm2, %v9513_v1  ;;  %7528 = vmatprep.mubr.msk.bf16.mxu1 %vm729_vm2, %v9513_v1 }
  0xe7   : > { %7532 = vmatprep.subr.bf16.mxu0 %v945_v24  ;;  %7538 = vmatprep.subr.bf16.mxu1 %v996_v25 }
  0xe8   : > { %1158 = vperm.xlu0 %8341, %v1149_v28  }
  0xeb   : > { %7523 = vmatmul.mubr.msk.bf16.vlgmr.msra.gmra.mrb[4].mxu0 %vm729_vm2, %v8344_v17  ;;  %7529 = vmatmul.mubr.msk.bf16.vlgmr.msra.gmra.mrb[4].mxu1 %vm729_vm2, %v8344_v17 }
  0xec   : > { %7533 = vmatpush3.bf16.msra.mxu0 %v945_v24  ;;  %7539 = vmatpush3.bf16.msra.mxu1 %v996_v25 }
  0xed   : > { %7534 = vmatprep.mubr.msk.bf16.mxu0 %vm729_vm2, %v9513_v1  ;;  %7540 = vmatprep.mubr.msk.bf16.mxu1 %vm729_vm2, %v9513_v1 }
  0xee   : > { %7544 = vmatprep.subr.bf16.mxu0 %v1047_v31  ;;  %7550 = vmatprep.subr.bf16.mxu1 %v1098_v32 }
  0xf3   : > { %7535 = vmatmul.mubr.msk.bf16.vlgmr.msra.gmra.mrb[8].mxu0 %vm729_vm2, %v8344_v17  ;;  %7541 = vmatmul.mubr.msk.bf16.vlgmr.msra.gmra.mrb[8].mxu1 %vm729_vm2, %v8344_v17 }
  0xf4   : > { %7545 = vmatpush3.bf16.msra.mxu0 %v1047_v31  ;;  %7551 = vmatpush3.bf16.msra.mxu1 %v1098_v32 }
  0xf5   : > { %7546 = vmatprep.mubr.msk.bf16.mxu0 %vm729_vm2, %v9513_v1  ;;  %7552 = vmatprep.mubr.msk.bf16.mxu1 %vm729_vm2, %v9513_v1 }
  0xfb   : > { %7547 = vmatmul.mubr.msk.bf16.vlgmr.msra.gmra.mrb[12].mxu0 %vm729_vm2, %v8344_v17  ;;  %7553 = vmatmul.mubr.msk.bf16.vlgmr.msra.gmra.mrb[12].mxu1 %vm729_vm2, %v8344_v17 }
 0x163   : > { %v9558_v33 = vpop.permute.xlu0 %1153 }
 0x164   : > { %v9560_v34 = vpop.permute.xlu1 %1163 }
 0x167   : > { %v9562_v36 = vpop.permute.xlu0 %1158 }
 0x1b6   : > { %v7512_v35 = vpop.f32.mrb[0].mxu0  ;;  %v7518_v37 = vpop.f32.mrb[0].mxu1 }
 0x1b7   : > { %v1168_v38 = vadd.f32 %v7512_v35, %v9560_v34  ;;  %v777_v39 = vpop.f32.mrb[1].mxu0  ;;  %v1171_v40 = vadd.f32 %v7518_v37, %v9560_v34  ;;  %v828_v42 = vpop.f32.mrb[1].mxu1 }
 0x1b8   : > { %v1166_v41 = vadd.f32 %v9558_v33, %v777_v39  ;;  %v7513_v43 = vpop.f32.mrb[2].mxu0  ;;  %v1169_v44 = vadd.f32 %v9558_v33, %v828_v42  ;;  %v7519_v45 = vpop.f32.mrb[2].mxu1 }
 0x1b9   : > { %1192 = vst [vmem:[#allocation2 + $0x10] sm:$0xff] %v1168_v38  ;;  %v780_v46 = vpop.f32.mrb[3].mxu0  ;;  %1195 = vst [vmem:[#allocation2 + $0x28] sm:$0xff] %v1171_v40  ;;  %v831_v48 = vpop.f32.mrb[3].mxu1 }
 0x1ba   : > { %1190 = vst [vmem:[#allocation2] sm:$0xff] %v1166_v41  ;;  %v1167_v47 = vadd.f32 %v9562_v36, %v780_v46  ;;  %1193 = vst [vmem:[#allocation2 + $0x18] sm:$0xff] %v1169_v44  ;;  %v1170_v49 = vadd.f32 %v9562_v36, %v831_v48 }
 0x1bc   : > { %1191 = vst [vmem:[#allocation2 + $0x8] sm:$0xff] %v1167_v47  ;;  %1194 = vst [vmem:[#allocation2 + $0x20] sm:$0xff] %v1170_v49 }
 0x1be   : > { %v7524_v50 = vpop.f32.mrb[4].mxu0  ;;  %v7530_v52 = vpop.f32.mrb[4].mxu1 }
 0x1bf   : > { %v1174_v51 = vadd.f32 %v7524_v50, %v9560_v34  ;;  %v879_v53 = vpop.f32.mrb[5].mxu0  ;;  %v1177_v54 = vadd.f32 %v7530_v52, %v9560_v34  ;;  %v930_v56 = vpop.f32.mrb[5].mxu1 }
 0x1c0   : > { %v1172_v55 = vadd.f32 %v9558_v33, %v879_v53  ;;  %v7525_v57 = vpop.f32.mrb[6].mxu0  ;;  %v1175_v58 = vadd.f32 %v9558_v33, %v930_v56  ;;  %v7531_v59 = vpop.f32.mrb[6].mxu1 }
 0x1c1   : > { %1198 = vst [vmem:[#allocation2 + $0x40] sm:$0xff] %v1174_v51  ;;  %v882_v60 = vpop.f32.mrb[7].mxu0  ;;  %1201 = vst [vmem:[#allocation2 + $0x58] sm:$0xff] %v1177_v54  ;;  %v933_v62 = vpop.f32.mrb[7].mxu1 }
 0x1c2   : > { %1196 = vst [vmem:[#allocation2 + $0x30] sm:$0xff] %v1172_v55  ;;  %v1173_v61 = vadd.f32 %v9562_v36, %v882_v60  ;;  %1199 = vst [vmem:[#allocation2 + $0x48] sm:$0xff] %v1175_v58  ;;  %v1176_v63 = vadd.f32 %v9562_v36, %v933_v62 }
 0x1c4   : > { %1197 = vst [vmem:[#allocation2 + $0x38] sm:$0xff] %v1173_v61  ;;  %1200 = vst [vmem:[#allocation2 + $0x50] sm:$0xff] %v1176_v63 }
 0x1c6   : > { %v7536_v0 = vpop.f32.mrb[8].mxu0  ;;  %v7542_v2 = vpop.f32.mrb[8].mxu1 }
 0x1c7   : > { %v1180_v1 = vadd.f32 %v7536_v0, %v9560_v34  ;;  %v981_v3 = vpop.f32.mrb[9].mxu0  ;;  %v1183_v4 = vadd.f32 %v7542_v2, %v9560_v34  ;;  %v1032_v6 = vpop.f32.mrb[9].mxu1 }
 0x1c8   : > { %v1178_v5 = vadd.f32 %v9558_v33, %v981_v3  ;;  %v7537_v7 = vpop.f32.mrb[10].mxu0  ;;  %v1181_v8 = vadd.f32 %v9558_v33, %v1032_v6  ;;  %v7543_v9 = vpop.f32.mrb[10].mxu1 }
 0x1c9   : > { %1204 = vst [vmem:[#allocation2 + $0x70] sm:$0xff] %v1180_v1  ;;  %v984_v10 = vpop.f32.mrb[11].mxu0  ;;  %1207 = vst [vmem:[#allocation2 + $0x88] sm:$0xff] %v1183_v4  ;;  %v1035_v12 = vpop.f32.mrb[11].mxu1 }
 0x1ca   : > { %1202 = vst [vmem:[#allocation2 + $0x60] sm:$0xff] %v1178_v5  ;;  %v1179_v11 = vadd.f32 %v9562_v36, %v984_v10  ;;  %1205 = vst [vmem:[#allocation2 + $0x78] sm:$0xff] %v1181_v8  ;;  %v1182_v13 = vadd.f32 %v9562_v36, %v1035_v12 }
 0x1cc   : > { %1203 = vst [vmem:[#allocation2 + $0x68] sm:$0xff] %v1179_v11  ;;  %1206 = vst [vmem:[#allocation2 + $0x80] sm:$0xff] %v1182_v13 }
 0x1ce   : > { %v7548_v14 = vpop.f32.mrb[12].mxu0  ;;  %v7554_v16 = vpop.f32.mrb[12].mxu1 }
 0x1cf   : > { %v1186_v15 = vadd.f32 %v7548_v14, %v9560_v34  ;;  %v1083_v17 = vpop.f32.mrb[13].mxu0  ;;  %v1189_v18 = vadd.f32 %v7554_v16, %v9560_v34  ;;  %v1134_v20 = vpop.f32.mrb[13].mxu1 }
 0x1d0   : > { %v1184_v19 = vadd.f32 %v9558_v33, %v1083_v17  ;;  %v7549_v21 = vpop.f32.mrb[14].mxu0  ;;  %v1187_v22 = vadd.f32 %v9558_v33, %v1134_v20  ;;  %v7555_v23 = vpop.f32.mrb[14].mxu1 }
 0x1d1   : > { %1210 = vst [vmem:[#allocation2 + $0xa0] sm:$0xff] %v1186_v15  ;;  %v1086_v24 = vpop.f32.mrb[15].mxu0  ;;  %1213 = vst [vmem:[#allocation2 + $0xb8] sm:$0xff] %v1189_v18  ;;  %v1137_v26 = vpop.f32.mrb[15].mxu1 }
 0x1d2   : > { %1208 = vst [vmem:[#allocation2 + $0x90] sm:$0xff] %v1184_v19  ;;  %v1185_v25 = vadd.f32 %v9562_v36, %v1086_v24  ;;  %1211 = vst [vmem:[#allocation2 + $0xa8] sm:$0xff] %v1187_v22  ;;  %v1188_v27 = vadd.f32 %v9562_v36, %v1137_v26 }
 0x1d4   : > { %1209 = vst [vmem:[#allocation2 + $0x98] sm:$0xff] %v1185_v25  ;;  %1212 = vst [vmem:[#allocation2 + $0xb0] sm:$0xff] %v1188_v27 }
 0x1d5 PF: > { %v8347_v28 = vld [vmem:[%s9450_s16] sm:$0xff]   ;;  %v9060_v29 = vmov 0.0   ;;  %vm9061_vm3 = vmmov 0   ;;  %v8349_v31 = vld [vmem:[%s9450_s16 + $0x8] sm:$0xff]   ;;  %v1243_v33 = vlaneseq  ;;  %v8351_v34 = vld [vmem:[%s9450_s16 + $0x10] sm:$0xff]   ;;  %vm4886_vm4 = vcmask 195584  }
 0x1d6   : > { %7556 = vmatprep.subr.bf16.mxu0 %v9060_v29  ;;  %7576 = vmatprep.subr.bf16.mxu1 %v9060_v29  ;;  %v8348_v30 = vld [vmem:[%s9450_s16 + $0x40] sm:$0xff]   ;;  %v8350_v32 = vld [vmem:[%s9450_s16 + $0x48] sm:$0xff]   ;;  %v8352_v35 = vld [vmem:[%s9450_s16 + $0x50] sm:$0xff]   ;;  %v9062_v42 = vmov 1983009808   ;;  %vm4893_vm5 = vcmask 1043456  }
 0x1d7   : > { %7557 = vmatpush3.bf16.xpose.msra.mxu0 %v8347_v28  ;;  %7572 = vmatprep.mubr.msk.bf16.mxu0 %vm9061_vm3, %v9060_v29  ;;  %v9604_v36 = vld [vmem:[#allocation2] sm:$0xff]  ;;  %v9606_v37 = vld [vmem:[#allocation2 + $0x18] sm:$0xff]  ;;  %v9608_v38 = vld [vmem:[#allocation2 + $0x30] sm:$0xff]  ;;  %v1241_v43 = vunpack.c.l.s4 %v9062_v42  ;;  %v9617_v44 = vshrl.u32 %v1243_v33, 7  ;;  %v9063_v48 = vmov 1934713408  }
 0x1d8   : > { %7577 = vmatpush3.bf16.xpose.msra.mxu1 %v8348_v30  ;;  %7558 = vmatprep.subr.bf16.mxu0 %v9060_v29  ;;  %v9610_v39 = vld [vmem:[#allocation2 + $0x48] sm:$0xff]  ;;  %v9612_v40 = vld [vmem:[#allocation2 + $0x60] sm:$0xff]  ;;  %v9614_v41 = vld [vmem:[#allocation2 + $0x78] sm:$0xff]  ;;  %v1238_v47 = vcombine.low %v9604_v36, %v9608_v38  ;;  %v1305_v49 = vunpack.c.l.s4 %v9063_v48  ;;  %p7192_p6 = scmp.ne.s32.totalorder %s9033_s14, 1 }
 0x1d9   : > { %7578 = vmatprep.subr.bf16.mxu1 %v9060_v29  ;;  %7592 = vmatprep.mubr.msk.bf16.mxu1 %vm9061_vm3, %v9060_v29  ;;  %v9619_v45 = vld [vmem:[#allocation2 + $0x90] sm:$0xff]  ;;  %v9621_v46 = vld [vmem:[#allocation2 + $0xa8] sm:$0xff]  ;;  %v1242_v50 = vunpack.c.0.s8 %v1241_v43  ;;  %v1254_v51 = vcombine.low %v9606_v37, %v9610_v39  ;;  %v8353_v56 = vld [vmem:[%s9450_s16 + $0x18] sm:$0xff]   ;;  %v1255_v48 = vcombine.high %v9606_v37, %v9610_v39  ;;  %vm9066_vm6 = vmmov (!%p7192_p6), 0  }
 0x1da   : > { %v1270_v52 = vcombine.low %v9612_v40, %v9619_v45  ;;  %v1286_v53 = vcombine.low %v9614_v41, %v9621_v46  ;;  %v1306_v55 = vunpack.c.0.s8 %v1305_v49  ;;  %v8354_v57 = vld [vmem:[%s9450_s16 + $0x58] sm:$0xff]   ;;  %v8355_v3 = vld [vmem:[%s9450_s16 + $0x20] sm:$0xff]   ;;  %v8357_v7 = vld [vmem:[%s9450_s16 + $0x28] sm:$0xff]   ;;  %v1271_v49 = vcombine.high %v9612_v40, %v9619_v45 }
 0x1db   : > { %v9634_v54 = vsub.s32 %v1242_v50, %v9617_v44  ;;  %v8356_v6 = vld [vmem:[%s9450_s16 + $0x60] sm:$0xff]   ;;  %v8358_v8 = vld [vmem:[%s9450_s16 + $0x68] sm:$0xff]   ;;  %v8359_v9 = vld [vmem:[%s9450_s16 + $0x30] sm:$0xff]   ;;  %v1287_v50 = vcombine.high %v9614_v41, %v9621_v46  ;;  %vm6494_vm7 = vcmask (!%p7192_p6), 130112   ;;  %vm6501_vm8 = vcmask (!%p7192_p6), 195712  }
 0x1dc   : > { %v9643_v62 = vsub.s32 %v1306_v55, %v9617_v44  ;;  %v8360_v10 = vld [vmem:[%s9450_s16 + $0x70] sm:$0xff]   ;;  %v8361_v13 = vld [vmem:[%s9450_s16 + $0x38] sm:$0xff]   ;;  %v8367_v19 = vld [vmem:[%s9450_s16 + $0x80] sm:$0xff]   ;;  %vm6601_vm9 = vcmask (!%p7192_p6), 1041409   ;;  %vm6603_vm10 = vcmask (!%p7192_p6), 1042434   ;;  %vm6605_vm11 = vcmask (!%p7192_p6), 1043459  }
 0x1dd   : > { %v1246_v58 = vrot.slane %v1238_v47, %v9634_v54  ;;  %v1262_v59 = vrot.slane %v1254_v51, %v9634_v54  ;;  %v1278_v60 = vrot.slane %v1270_v52, %v9634_v54  ;;  %v1294_v61 = vrot.slane %v1286_v53, %v9634_v54  ;;  %v8362_v14 = vld [vmem:[%s9450_s16 + $0x78] sm:$0xff]   ;;  %v8368_v21 = vld [vmem:[%s9450_s16 + $0xc0] sm:$0xff]   ;;  %v8369_v23 = vld [vmem:[%s9450_s16 + $0x88] sm:$0xff]  }
 0x1de   : > { %v8370_v24 = vld [vmem:[%s9450_s16 + $0xc8] sm:$0xff]   ;;  %v8371_v25 = vld [vmem:[%s9450_s16 + $0x90] sm:$0xff]   ;;  %v8373_v27 = vld [vmem:[%s9450_s16 + $0x98] sm:$0xff]   ;;  %v1239_v47 = vcombine.high %v9604_v36, %v9608_v38  ;;  %v9717_v53 = vrot.slane %v1255_v48, %v9634_v54  ;;  %v9720_v55 = vrot.slane %v1271_v49, %v9634_v54  ;;  %v9723_v36 = vrot.slane %v1287_v50, %v9634_v54 }
 0x1df   : > { %7559 = vmatpush3.bf16.xpose.msra.mxu0 %v8349_v31  ;;  %v1303_v63 = vcombine.high %v1246_v58, %v1262_v59  ;;  %v1335_v0 = vcombine.high %v1278_v60, %v1294_v61  ;;  %v1302_v11 = vcombine.low %v1246_v58, %v1262_v59  ;;  %v1334_v12 = vcombine.low %v1278_v60, %v1294_v61  ;;  %v8372_v26 = vld [vmem:[%s9450_s16 + $0xd0] sm:$0xff]   ;;  %v8374_v28 = vld [vmem:[%s9450_s16 + $0xd8] sm:$0xff]   ;;  %v8375_v30 = vld [vmem:[%s9450_s16 + $0xa0] sm:$0xff]  }
 0x1e0   : > { %7579 = vmatpush3.bf16.xpose.msra.mxu1 %v8350_v32  ;;  %7560 = vmatprep.subr.bf16.mxu0 %v9060_v29  ;;  %v8376_v31 = vld [vmem:[%s9450_s16 + $0xe0] sm:$0xff]   ;;  %v8377_v32 = vld [vmem:[%s9450_s16 + $0xa8] sm:$0xff]   ;;  %v8380_v42 = vld [vmem:[%s9450_s16 + $0xf0] sm:$0xff]   ;;  %v9714_v52 = vrot.slane %v1239_v47, %v9634_v54  ;;  %v1351_v38 = vcombine.high %v9720_v55, %v9723_v36  ;;  %vm6607_vm12 = vcmask (!%p7192_p6), 1044484   ;;  %vm6609_vm13 = vcmask (!%p7192_p6), 1045509  }
 0x1e1   : > { %7580 = vmatprep.subr.bf16.mxu1 %v9060_v29  ;;  %v1317_v1 = vrot.slane %v1303_v63, %v9643_v62  ;;  %v1349_v2 = vrot.slane %v1335_v0, %v9643_v62  ;;  %v1310_v15 = vrot.slane %v1302_v11, %v9643_v62  ;;  %v1342_v16 = vrot.slane %v1334_v12, %v9643_v62  ;;  %v8381_v43 = vld [vmem:[%s9450_s16 + $0xb8] sm:$0xff]   ;;  %v8383_v39 = vld [vmem:[%s9450_s16 + $0x100] sm:$0xff]   ;;  %v8385_v59 = vld [vmem:[%s9450_s16 + $0x108] sm:$0xff]  }
 0x1e2   : > { %v8382_v51 = vld [vmem:[%s9450_s16 + $0xf8] sm:$0xff]   ;;  %v1319_v37 = vcombine.high %v9714_v52, %v9717_v53  ;;  %v1365_v41 = vrot.slane %v1351_v38, %v9643_v62  ;;  %v8384_v46 = vld [vmem:[%s9450_s16 + $0x140] sm:$0xff]   ;;  %v8386_v60 = vld [vmem:[%s9450_s16 + $0x148] sm:$0xff]   ;;  %vm6611_vm14 = vcmask (!%p7192_p6), 1046534   ;;  %vm6613_vm15 = vcmask (!%p7192_p6), 1047559  }
 0x1e3   : > { %v9650_v4 = vcombine.low %v1317_v1, %v1349_v2  ;;  %v9652_v5 = vcombine.high %v1317_v1, %v1349_v2  ;;  %v1366_v17 = vcombine.low %v1310_v15, %v1342_v16  ;;  %v1367_v18 = vcombine.high %v1310_v15, %v1342_v16  ;;  %v8387_v61 = vld [vmem:[%s9450_s16 + $0x110] sm:$0xff]   ;;  %v8389_v0 = vld [vmem:[%s9450_s16 + $0x118] sm:$0xff]   ;;  %v8391_v2 = vld [vmem:[%s9450_s16 + $0x120] sm:$0xff]  }
 0x1e4   : > { %v1333_v40 = vrot.slane %v1319_v37, %v9643_v62  ;;  %v8388_v63 = vld [vmem:[%s9450_s16 + $0x150] sm:$0xff]   ;;  %v8390_v1 = vld [vmem:[%s9450_s16 + $0x158] sm:$0xff]   ;;  %v9822_v49 = vld [vmem:[#allocation2 + $0x68] sm:$0xff] }
 0x1e5   : > { %v1646_v20 = vpack.c.bf16 %v1366_v17, %v1366_v17  ;;  %v1647_v22 = vpack.c.bf16 %v1367_v18, %v1367_v18  ;;  %v1648_v45 = vpack.c.bf16 %v9650_v4, %v9650_v4  ;;  %v8393_v4 = vld [vmem:[%s9450_s16 + $0x128] sm:$0xff]   ;;  %v8397_v12 = vld [vmem:[%s9450_s16 + $0x138] sm:$0xff]   ;;  %v8403_v18 = vld [vmem:[%s9450_s16 + $0x180] sm:$0xff]  }
 0x1e6   : > { %v9741_v58 = vcombine.high %v1333_v40, %v1365_v41  ;;  %v9818_v47 = vld [vmem:[#allocation2 + $0x38] sm:$0xff]  ;;  %v9820_v48 = vld [vmem:[#allocation2 + $0x50] sm:$0xff]  ;;  %v9824_v50 = vld [vmem:[#allocation2 + $0x80] sm:$0xff] }
 0x1e7   : > { %7561 = vmatpush3.bf16.xpose.msra.mxu0 %v8351_v34  ;;  %v8378_v34 = vld [vmem:[%s9450_s16 + $0xe8] sm:$0xff]   ;;  %v8417_v38 = vld [vmem:[%s9450_s16 + $0x1b8] sm:$0xff]  }
 0x1e8   : > { %7581 = vmatpush3.bf16.xpose.msra.mxu1 %v8352_v35  ;;  %7562 = vmatprep.subr.bf16.mxu0 %v9060_v29  ;;  %v8379_v35 = vld [vmem:[%s9450_s16 + $0xb0] sm:$0xff]  }
 0x1e9   : > { %7582 = vmatprep.subr.bf16.mxu1 %v9060_v29 }
 0x1ef   : > { %7563 = vmatpush3.bf16.xpose.msra.mxu0 %v8353_v56  ;;  %v1649_v56 = vpack.c.bf16 %v9652_v5, %v9652_v5  ;;  %v8394_v5 = vld [vmem:[%s9450_s16 + $0x168] sm:$0xff]  }
 0x1f0   : > { %7583 = vmatpush3.bf16.xpose.msra.mxu1 %v8354_v57  ;;  %7564 = vmatprep.subr.bf16.mxu0 %v9060_v29  ;;  %v9739_v57 = vcombine.low %v1333_v40, %v1365_v41 }
 0x1f1   : > { %7584 = vmatprep.subr.bf16.mxu1 %v9060_v29 }
 0x1f7   : > { %7565 = vmatpush3.bf16.xpose.msra.mxu0 %v8355_v3  ;;  %v8392_v3 = vld [vmem:[%s9450_s16 + $0x160] sm:$0xff]  }
 0x1f8   : > { %7585 = vmatpush3.bf16.xpose.msra.mxu1 %v8356_v6  ;;  %7566 = vmatprep.subr.bf16.mxu0 %v9060_v29  ;;  %v8395_v6 = vld [vmem:[%s9450_s16 + $0x130] sm:$0xff]  }
 0x1f9   : > { %7586 = vmatprep.subr.bf16.mxu1 %v9060_v29 }
 0x1ff   : > { %7567 = vmatpush3.bf16.xpose.msra.mxu0 %v8357_v7  ;;  %v8396_v7 = vld [vmem:[%s9450_s16 + $0x170] sm:$0xff]  }
 0x200   : > { %7587 = vmatpush3.bf16.xpose.msra.mxu1 %v8358_v8  ;;  %7568 = vmatprep.subr.bf16.mxu0 %v9060_v29  ;;  %v1318_v8 = vcombine.low %v9714_v52, %v9717_v53  ;;  %v9828_v52 = vld [vmem:[#allocation2 + $0xb0] sm:$0xff] }
 0x201   : > { %7588 = vmatprep.subr.bf16.mxu1 %v9060_v29  ;;  %v1422_v37 = vcombine.low %v9824_v50, %v9828_v52 }
 0x207   : > { %7569 = vmatpush3.bf16.xpose.msra.mxu0 %v8359_v9  ;;  %v1350_v9 = vcombine.low %v9720_v55, %v9723_v36 }
 0x208   : > { %7589 = vmatpush3.bf16.xpose.msra.mxu1 %v8360_v10  ;;  %7570 = vmatprep.subr.bf16.mxu0 %v9060_v29  ;;  %v1326_v10 = vrot.slane %v1318_v8, %v9643_v62 }
 0x209   : > { %7590 = vmatprep.subr.bf16.mxu1 %v9060_v29  ;;  %v1358_v11 = vrot.slane %v1350_v9, %v9643_v62 }
 0x20b   : > { %v1371_v15 = vcombine.high %v1326_v10, %v1358_v11 }
 0x20d   : > { %v1651_v17 = vpack.c.bf16 %v1371_v15, %v1371_v15  ;;  %v8426_v15 = vld [vmem:[%s9450_s16 + $0x258] sm:$0xff]  }
 0x20f   : > { %7571 = vmatpush3.bf16.xpose.msra.mxu0 %v8361_v13  ;;  %v8398_v13 = vld [vmem:[%s9450_s16 + $0x178] sm:$0xff]  }
 0x210   : > { %7591 = vmatpush3.bf16.xpose.msra.mxu1 %v8362_v14  ;;  %7596 = vmatprep.subr.bf16.mxu0 %v9060_v29  ;;  %v1370_v14 = vcombine.low %v1326_v10, %v1358_v11 }
 0x211   : > { %7616 = vmatprep.subr.bf16.mxu1 %v9060_v29 }
 0x212   : > { %v1650_v16 = vpack.c.bf16 %v1370_v14, %v1370_v14 }
 0x216   : > { %7573 = vmatmul.mubr.bf16.vlgmr.msra.gmra.mrb[0].mxu0 %v1646_v20  ;;  %v8405_v20 = vld [vmem:[%s9450_s16 + $0x188] sm:$0xff]  }
 0x217   : > { %7593 = vmatmul.mubr.bf16.vlgmr.msra.gmra.mrb[0].mxu1 %v1647_v22  ;;  %7597 = vmatpush3.bf16.xpose.msra.mxu0 %v8367_v19  ;;  %v8404_v19 = vld [vmem:[%s9450_s16 + $0x1c0] sm:$0xff]   ;;  %v8407_v22 = vld [vmem:[%s9450_s16 + $0x190] sm:$0xff]  }
 0x218   : > { %7617 = vmatpush3.bf16.xpose.msra.mxu1 %v8368_v21  ;;  %7598 = vmatprep.subr.bf16.mxu0 %v9060_v29  ;;  %v8406_v21 = vld [vmem:[%s9450_s16 + $0x1c8] sm:$0xff]  }
 0x219   : > { %7618 = vmatprep.subr.bf16.mxu1 %v9060_v29  ;;  %7612 = vmatprep.mubr.msk.bf16.mxu0 %vm9061_vm3, %v9060_v29 }
 0x21a   : > { %7632 = vmatprep.mubr.msk.bf16.mxu1 %vm9061_vm3, %v9060_v29 }
 0x21f   : > { %7599 = vmatpush3.bf16.xpose.msra.mxu0 %v8369_v23  ;;  %v8408_v23 = vld [vmem:[%s9450_s16 + $0x1d0] sm:$0xff]  }
 0x220   : > { %7619 = vmatpush3.bf16.xpose.msra.mxu1 %v8370_v24  ;;  %7600 = vmatprep.subr.bf16.mxu0 %v9060_v29  ;;  %v8409_v24 = vld [vmem:[%s9450_s16 + $0x198] sm:$0xff]  }
 0x221   : > { %7620 = vmatprep.subr.bf16.mxu1 %v9060_v29 }
 0x227   : > { %7601 = vmatpush3.bf16.xpose.msra.mxu0 %v8371_v25  ;;  %v8410_v25 = vld [vmem:[%s9450_s16 + $0x1d8] sm:$0xff]  }
 0x228   : > { %7621 = vmatpush3.bf16.xpose.msra.mxu1 %v8372_v26  ;;  %7602 = vmatprep.subr.bf16.mxu0 %v9060_v29  ;;  %v4574_v26 = vld [vmem:[%s9485_s4] sm:$0xff] }
 0x229   : > { %7622 = vmatprep.subr.bf16.mxu1 %v9060_v29 }
 0x22f   : > { %7603 = vmatpush3.bf16.xpose.msra.mxu0 %v8373_v27  ;;  %v9064_v27 = vmov 0  }
 0x230   : > { %7623 = vmatpush3.bf16.xpose.msra.mxu1 %v8374_v28  ;;  %7604 = vmatprep.subr.bf16.mxu0 %v9060_v29  ;;  %v8411_v28 = vld [vmem:[%s9450_s16 + $0x1a0] sm:$0xff]  }
 0x231   : > { %7624 = vmatprep.subr.bf16.mxu1 %v9060_v29  ;;  %8345 = vset.pattern.permute.xlu0 %v9064_v27 }
 0x232   : > { %8346 = vset.pattern.permute.xlu1 %v9064_v27  ;;  %4579 = vperm.xlu0 %8345, %v4574_v26   ;;  %v8433_v27 = vld [vmem:[%s9450_s16 + $0x238] sm:$0xff]  }
 0x237   : > { %7605 = vmatpush3.bf16.xpose.msra.mxu0 %v8375_v30  ;;  %v8412_v30 = vld [vmem:[%s9450_s16 + $0x1e0] sm:$0xff]  }
 0x238   : > { %7625 = vmatpush3.bf16.xpose.msra.mxu1 %v8376_v31  ;;  %7606 = vmatprep.subr.bf16.mxu0 %v9060_v29  ;;  %v8413_v31 = vld [vmem:[%s9450_s16 + $0x1a8] sm:$0xff]  }
 0x239   : > { %7626 = vmatprep.subr.bf16.mxu1 %v9060_v29 }
 0x23f   : > { %7607 = vmatpush3.bf16.xpose.msra.mxu0 %v8377_v32  ;;  %v8414_v32 = vld [vmem:[%s9450_s16 + $0x1e8] sm:$0xff]  }
 0x240   : > { %7627 = vmatpush3.bf16.xpose.msra.mxu1 %v8378_v34  ;;  %7608 = vmatprep.subr.bf16.mxu0 %v9060_v29  ;;  %v8415_v34 = vld [vmem:[%s9450_s16 + $0x1b0] sm:$0xff]  }
 0x241   : > { %7628 = vmatprep.subr.bf16.mxu1 %v9060_v29 }
 0x247   : > { %7609 = vmatpush3.bf16.xpose.msra.mxu0 %v8379_v35  ;;  %v8416_v35 = vld [vmem:[%s9450_s16 + $0x1f0] sm:$0xff]  }
 0x248   : > { %7629 = vmatpush3.bf16.xpose.msra.mxu1 %v8380_v42  ;;  %7610 = vmatprep.subr.bf16.mxu0 %v9060_v29  ;;  %v9814_v42 = vld [vmem:[#allocation2 + $0x8] sm:$0xff] }
 0x249   : > { %7630 = vmatprep.subr.bf16.mxu1 %v9060_v29  ;;  %v1374_v53 = vcombine.low %v9814_v42, %v9818_v47 }
 0x24b   : > { %v9843_v40 = vrot.slane %v1374_v53, %v9634_v54  ;;  %v8440_v53 = vld [vmem:[%s9450_s16 + $0x2c0] sm:$0xff]  }
 0x24f   : > { %7611 = vmatpush3.bf16.xpose.msra.mxu0 %v8381_v43  ;;  %v9816_v43 = vld [vmem:[#allocation2 + $0x20] sm:$0xff] }
 0x250   : > { %7631 = vmatpush3.bf16.xpose.msra.mxu1 %v8382_v51  ;;  %7636 = vmatprep.subr.bf16.mxu0 %v9060_v29  ;;  %v9826_v51 = vld [vmem:[#allocation2 + $0x98] sm:$0xff]  ;;  %v1390_v55 = vcombine.low %v9816_v43, %v9820_v48 }
 0x251   : > { %7656 = vmatprep.subr.bf16.mxu1 %v9060_v29  ;;  %v1406_v36 = vcombine.low %v9822_v49, %v9826_v51 }
 0x252   : > { %v9846_v41 = vrot.slane %v1390_v55, %v9634_v54  ;;  %v8441_v55 = vld [vmem:[%s9450_s16 + $0x288] sm:$0xff]  }
 0x256   : > { %7613 = vmatmul.mubr.bf16.vlgmr.msra.gmra.mrb[4].mxu0 %v1648_v45  ;;  %v9849_v45 = vrot.slane %v1406_v36, %v9634_v54  ;;  %v8442_v36 = vld [vmem:[%s9450_s16 + $0x2c8] sm:$0xff]  }
 0x257   : > { %7633 = vmatmul.mubr.bf16.vlgmr.msra.gmra.mrb[4].mxu1 %v1649_v56  ;;  %7637 = vmatpush3.bf16.xpose.msra.mxu0 %v8383_v39  ;;  %v8418_v39 = vld [vmem:[%s9450_s16 + $0x1f8] sm:$0xff]   ;;  %v1439_v56 = vcombine.high %v9843_v40, %v9846_v41 }
 0x258   : > { %7657 = vmatpush3.bf16.xpose.msra.mxu1 %v8384_v46  ;;  %7638 = vmatprep.subr.bf16.mxu0 %v9060_v29  ;;  %v9852_v46 = vrot.slane %v1422_v37, %v9634_v54  ;;  %v8443_v37 = vld [vmem:[%s9450_s16 + $0x290] sm:$0xff]  }
 0x259   : > { %7658 = vmatprep.subr.bf16.mxu1 %v9060_v29  ;;  %7652 = vmatprep.mubr.msk.bf16.mxu0 %vm9061_vm3, %v9060_v29 }
 0x25a   : > { %7672 = vmatprep.mubr.msk.bf16.mxu1 %vm9061_vm3, %v9060_v29 }
 0x25f   : > { %7639 = vmatpush3.bf16.xpose.msra.mxu0 %v8385_v59  ;;  %v1471_v59 = vcombine.high %v9849_v45, %v9852_v46 }
 0x260   : > { %7659 = vmatpush3.bf16.xpose.msra.mxu1 %v8386_v60  ;;  %7640 = vmatprep.subr.bf16.mxu0 %v9060_v29  ;;  %v1453_v60 = vrot.slane %v1439_v56, %v9643_v62 }
 0x261   : > { %7660 = vmatprep.subr.bf16.mxu1 %v9060_v29 }
 0x267   : > { %7641 = vmatpush3.bf16.xpose.msra.mxu0 %v8387_v61  ;;  %v1485_v61 = vrot.slane %v1471_v59, %v9643_v62 }
 0x268   : > { %7661 = vmatpush3.bf16.xpose.msra.mxu1 %v8388_v63  ;;  %7642 = vmatprep.subr.bf16.mxu0 %v9060_v29  ;;  %v1652_v63 = vpack.c.bf16 %v9739_v57, %v9739_v57  ;;  %v8421_v57 = vld [vmem:[%s9450_s16 + $0x208] sm:$0xff]  }
 0x269   : > { %7662 = vmatprep.subr.bf16.mxu1 %v9060_v29 }
 0x26f   : > { %7643 = vmatpush3.bf16.xpose.msra.mxu0 %v8389_v0  ;;  %v1653_v0 = vpack.c.bf16 %v9741_v58, %v9741_v58  ;;  %v8422_v58 = vld [vmem:[%s9450_s16 + $0x248] sm:$0xff]  }
 0x270   : > { %7663 = vmatpush3.bf16.xpose.msra.mxu1 %v8390_v1  ;;  %7644 = vmatprep.subr.bf16.mxu0 %v9060_v29  ;;  %v8419_v1 = vld [vmem:[%s9450_s16 + $0x200] sm:$0xff]  }
 0x271   : > { %7664 = vmatprep.subr.bf16.mxu1 %v9060_v29 }
 0x277   : > { %7645 = vmatpush3.bf16.xpose.msra.mxu0 %v8391_v2  ;;  %v9867_v2 = vcombine.low %v1453_v60, %v1485_v61 }
 0x278   : > { %7665 = vmatpush3.bf16.xpose.msra.mxu1 %v8392_v3  ;;  %7646 = vmatprep.subr.bf16.mxu0 %v9060_v29  ;;  %v9869_v3 = vcombine.high %v1453_v60, %v1485_v61 }
 0x279   : > { %7666 = vmatprep.subr.bf16.mxu1 %v9060_v29 }
 0x27f   : > { %7647 = vmatpush3.bf16.xpose.msra.mxu0 %v8393_v4  ;;  %v8420_v4 = vld [vmem:[%s9450_s16 + $0x240] sm:$0xff]  }
 0x280   : > { %7667 = vmatpush3.bf16.xpose.msra.mxu1 %v8394_v5  ;;  %7648 = vmatprep.subr.bf16.mxu0 %v9060_v29  ;;  %v8423_v5 = vld [vmem:[%s9450_s16 + $0x210] sm:$0xff]  }
 0x281   : > { %7668 = vmatprep.subr.bf16.mxu1 %v9060_v29 }
 0x287   : > { %7649 = vmatpush3.bf16.xpose.msra.mxu0 %v8395_v6  ;;  %v8424_v6 = vld [vmem:[%s9450_s16 + $0x250] sm:$0xff]  }
 0x288   : > { %7669 = vmatpush3.bf16.xpose.msra.mxu1 %v8396_v7  ;;  %7650 = vmatprep.subr.bf16.mxu0 %v9060_v29 }
 0x289   : > { %7670 = vmatprep.subr.bf16.mxu1 %v9060_v29 }
 0x28f   : > { %7651 = vmatpush3.bf16.xpose.msra.mxu0 %v8397_v12  ;;  %v8425_v12 = vld [vmem:[%s9450_s16 + $0x218] sm:$0xff]  }
 0x290   : > { %7671 = vmatpush3.bf16.xpose.msra.mxu1 %v8398_v13  ;;  %7676 = vmatprep.subr.bf16.mxu0 %v9060_v29 }
 0x291   : > { %7696 = vmatprep.subr.bf16.mxu1 %v9060_v29 }
 0x296   : > { %7653 = vmatmul.mubr.bf16.vlgmr.msra.gmra.mrb[8].mxu0 %v1650_v16 }
 0x297   : > { %7673 = vmatmul.mubr.bf16.vlgmr.msra.gmra.mrb[8].mxu1 %v1651_v17  ;;  %7677 = vmatpush3.bf16.xpose.msra.mxu0 %v8403_v18  ;;  %v8427_v17 = vld [vmem:[%s9450_s16 + $0x220] sm:$0xff]  }
 0x298   : > { %7697 = vmatpush3.bf16.xpose.msra.mxu1 %v8404_v19  ;;  %7678 = vmatprep.subr.bf16.mxu0 %v9060_v29  ;;  %v8428_v18 = vld [vmem:[%s9450_s16 + $0x260] sm:$0xff]   ;;  %v8429_v19 = vld [vmem:[%s9450_s16 + $0x228] sm:$0xff]  }
 0x299   : > { %7698 = vmatprep.subr.bf16.mxu1 %v9060_v29  ;;  %7692 = vmatprep.mubr.msk.bf16.mxu0 %vm9061_vm3, %v9060_v29 }
 0x29a   : > { %7712 = vmatprep.mubr.msk.bf16.mxu1 %vm9061_vm3, %v9060_v29 }
 0x29f   : > { %7679 = vmatpush3.bf16.xpose.msra.mxu0 %v8405_v20  ;;  %v8430_v20 = vld [vmem:[%s9450_s16 + $0x268] sm:$0xff]  }
 0x2a0   : > { %7699 = vmatpush3.bf16.xpose.msra.mxu1 %v8406_v21  ;;  %7680 = vmatprep.subr.bf16.mxu0 %v9060_v29  ;;  %v8431_v21 = vld [vmem:[%s9450_s16 + $0x230] sm:$0xff]  }
 0x2a1   : > { %7700 = vmatprep.subr.bf16.mxu1 %v9060_v29 }
 0x2a7   : > { %7681 = vmatpush3.bf16.xpose.msra.mxu0 %v8407_v22  ;;  %v8432_v22 = vld [vmem:[%s9450_s16 + $0x270] sm:$0xff]  }
 0x2a8   : > { %7701 = vmatpush3.bf16.xpose.msra.mxu1 %v8408_v23  ;;  %7682 = vmatprep.subr.bf16.mxu0 %v9060_v29  ;;  %v1438_v23 = vcombine.low %v9843_v40, %v9846_v41 }
 0x2a9   : > { %7702 = vmatprep.subr.bf16.mxu1 %v9060_v29 }
 0x2af   : > { %7683 = vmatpush3.bf16.xpose.msra.mxu0 %v8409_v24  ;;  %v1470_v24 = vcombine.low %v9849_v45, %v9852_v46 }
 0x2b0   : > { %7703 = vmatpush3.bf16.xpose.msra.mxu1 %v8410_v25  ;;  %7684 = vmatprep.subr.bf16.mxu0 %v9060_v29  ;;  %v1446_v25 = vrot.slane %v1438_v23, %v9643_v62  ;;  %v8454_v23 = vld [vmem:[%s9450_s16 + $0x2f8] sm:$0xff]  }
 0x2b1   : > { %7704 = vmatprep.subr.bf16.mxu1 %v9060_v29  ;;  %v1478_v26 = vrot.slane %v1470_v24, %v9643_v62 }
 0x2b7   : > { %7685 = vmatpush3.bf16.xpose.msra.mxu0 %v8411_v28  ;;  %v8434_v28 = vld [vmem:[%s9450_s16 + $0x278] sm:$0xff]  }
 0x2b8   : > { %7705 = vmatpush3.bf16.xpose.msra.mxu1 %v8412_v30  ;;  %7686 = vmatprep.subr.bf16.mxu0 %v9060_v29  ;;  %v1502_v30 = vcombine.low %v1446_v25, %v1478_v26 }
 0x2b9   : > { %7706 = vmatprep.subr.bf16.mxu1 %v9060_v29 }
 0x2bf   : > { %7687 = vmatpush3.bf16.xpose.msra.mxu0 %v8413_v31  ;;  %v1503_v31 = vcombine.high %v1446_v25, %v1478_v26  ;;  %v8455_v26 = vld [vmem:[%s9450_s16 + $0x300] sm:$0xff]  }
 0x2c0   : > { %7707 = vmatpush3.bf16.xpose.msra.mxu1 %v8414_v32  ;;  %7688 = vmatprep.subr.bf16.mxu0 %v9060_v29  ;;  %v1654_v32 = vpack.c.bf16 %v1502_v30, %v1502_v30 }
 0x2c1   : > { %7708 = vmatprep.subr.bf16.mxu1 %v9060_v29 }
 0x2c7   : > { %7689 = vmatpush3.bf16.xpose.msra.mxu0 %v8415_v34  ;;  %v1655_v34 = vpack.c.bf16 %v1503_v31, %v1503_v31  ;;  %v8459_v31 = vld [vmem:[%s9450_s16 + $0x310] sm:$0xff]  }
 0x2c8   : > { %7709 = vmatpush3.bf16.xpose.msra.mxu1 %v8416_v35  ;;  %7690 = vmatprep.subr.bf16.mxu0 %v9060_v29  ;;  %v8439_v35 = vld [vmem:[%s9450_s16 + $0x280] sm:$0xff]  }
 0x2c9   : > { %7710 = vmatprep.subr.bf16.mxu1 %v9060_v29 }
 0x2cf   : > { %7691 = vmatpush3.bf16.xpose.msra.mxu0 %v8417_v38  ;;  %v8444_v38 = vld [vmem:[%s9450_s16 + $0x2d0] sm:$0xff]  }
 0x2d0   : > { %7711 = vmatpush3.bf16.xpose.msra.mxu1 %v8418_v39  ;;  %7716 = vmatprep.subr.bf16.mxu0 %v9060_v29 }
 0x2d1   : > { %7736 = vmatprep.subr.bf16.mxu1 %v9060_v29 }
 0x2d6   : > { %7693 = vmatmul.mubr.bf16.vlgmr.msra.gmra.mrb[12].mxu0 %v1652_v63  ;;  %v8445_v63 = vld [vmem:[%s9450_s16 + $0x298] sm:$0xff]  }
 0x2d7   : > { %7713 = vmatmul.mubr.bf16.vlgmr.msra.gmra.mrb[12].mxu1 %v1653_v0  ;;  %7717 = vmatpush3.bf16.xpose.msra.mxu0 %v8419_v1 }
 0x2d8   : > { %7737 = vmatpush3.bf16.xpose.msra.mxu1 %v8420_v4  ;;  %7718 = vmatprep.subr.bf16.mxu0 %v9060_v29 }
 0x2d9   : > { %7738 = vmatprep.subr.bf16.mxu1 %v9060_v29  ;;  %7732 = vmatprep.mubr.msk.bf16.mxu0 %vm9061_vm3, %v9060_v29 }
 0x2da   : > { %7752 = vmatprep.mubr.msk.bf16.mxu1 %vm9061_vm3, %v9060_v29 }
 0x2df   : > { %7719 = vmatpush3.bf16.xpose.msra.mxu0 %v8421_v57 }
 0x2e0   : > { %7739 = vmatpush3.bf16.xpose.msra.mxu1 %v8422_v58  ;;  %7720 = vmatprep.subr.bf16.mxu0 %v9060_v29  ;;  %v8446_v58 = vld [vmem:[%s9450_s16 + $0x2d8] sm:$0xff]  }
 0x2e1   : > { %7740 = vmatprep.subr.bf16.mxu1 %v9060_v29 }
 0x2e7   : > { %7721 = vmatpush3.bf16.xpose.msra.mxu0 %v8423_v5 }
 0x2e8   : > { %7741 = vmatpush3.bf16.xpose.msra.mxu1 %v8424_v6  ;;  %7722 = vmatprep.subr.bf16.mxu0 %v9060_v29 }
 0x2e9   : > { %v9885_v7 = vpop.f32.mrb[0].mxu0  ;;  %7742 = vmatprep.subr.bf16.mxu1 %v9060_v29 }
 0x2ea   : > { %v9888_v8 = vpop.f32.mrb[0].mxu1  ;;  %v7574_v9 = vpop.f32.mrb[1].mxu0 }
 0x2eb   : > { %v7594_v10 = vpop.f32.mrb[1].mxu1  ;;  %v2139_v11 = vpop.f32.mrb[2].mxu0 }
 0x2ec   : > { %v2227_v13 = vpop.f32.mrb[2].mxu1  ;;  %v7575_v14 = vpop.f32.mrb[3].mxu0 }
 0x2ed   : > { %v7595_v16 = vpop.f32.mrb[3].mxu1  ;;  %v8448_v13 = vld [vmem:[%s9450_s16 + $0x2e0] sm:$0xff]   ;;  %v8449_v14 = vld [vmem:[%s9450_s16 + $0x2a8] sm:$0xff]  }
 0x2ee   : > { %v8451_v16 = vld [vmem:[%s9450_s16 + $0x2b0] sm:$0xff]  }
 0x2ef   : > { %7723 = vmatpush3.bf16.xpose.msra.mxu0 %v8425_v12  ;;  %v8447_v12 = vld [vmem:[%s9450_s16 + $0x2a0] sm:$0xff]  }
 0x2f0   : > { %7743 = vmatpush3.bf16.xpose.msra.mxu1 %v8426_v15  ;;  %7724 = vmatprep.subr.bf16.mxu0 %v9060_v29  ;;  %v8450_v15 = vld [vmem:[%s9450_s16 + $0x2e8] sm:$0xff]  }
 0x2f1   : > { %7744 = vmatprep.subr.bf16.mxu1 %v9060_v29 }
 0x2f7   : > { %7725 = vmatpush3.bf16.xpose.msra.mxu0 %v8427_v17  ;;  %v8452_v17 = vld [vmem:[%s9450_s16 + $0x2f0] sm:$0xff]  }
 0x2f8   : > { %7745 = vmatpush3.bf16.xpose.msra.mxu1 %v8428_v18  ;;  %7726 = vmatprep.subr.bf16.mxu0 %v9060_v29  ;;  %v1375_v18 = vcombine.high %v9814_v42, %v9818_v47 }
 0x2f9   : > { %7746 = vmatprep.subr.bf16.mxu1 %v9060_v29 }
 0x2fa   : > { %v9983_v24 = vrot.slane %v1375_v18, %v9634_v54  ;;  %v8476_v18 = vld [vmem:[%s9450_s16 + $0x3c0] sm:$0xff]  }
 0x2ff   : > { %7727 = vmatpush3.bf16.xpose.msra.mxu0 %v8429_v19  ;;  %v1391_v19 = vcombine.high %v9816_v43, %v9820_v48 }
 0x300   : > { %7747 = vmatpush3.bf16.xpose.msra.mxu1 %v8430_v20  ;;  %7728 = vmatprep.subr.bf16.mxu0 %v9060_v29  ;;  %v1407_v20 = vcombine.high %v9822_v49, %v9826_v51  ;;  %v1656_v49 = vpack.c.bf16 %v9867_v2, %v9867_v2  ;;  %v8457_v2 = vld [vmem:[%s9450_s16 + $0x308] sm:$0xff]  }
 0x301   : > { %7748 = vmatprep.subr.bf16.mxu1 %v9060_v29  ;;  %v9986_v25 = vrot.slane %v1391_v19, %v9634_v54  ;;  %v8477_v19 = vld [vmem:[%s9450_s16 + $0x388] sm:$0xff]  }
 0x302   : > { %v9989_v42 = vrot.slane %v1407_v20, %v9634_v54  ;;  %v8478_v20 = vld [vmem:[%s9450_s16 + $0x3c8] sm:$0xff]  }
 0x303   : > { %v1455_v47 = vcombine.high %v9983_v24, %v9986_v25 }
 0x307   : > { %7729 = vmatpush3.bf16.xpose.msra.mxu0 %v8431_v21  ;;  %v1423_v21 = vcombine.high %v9824_v50, %v9828_v52  ;;  %v1469_v50 = vrot.slane %v1455_v47, %v9643_v62  ;;  %v1657_v52 = vpack.c.bf16 %v9869_v3, %v9869_v3  ;;  %v8458_v3 = vld [vmem:[%s9450_s16 + $0x348] sm:$0xff]  }
 0x308   : > { %7749 = vmatpush3.bf16.xpose.msra.mxu1 %v8432_v22  ;;  %7730 = vmatprep.subr.bf16.mxu0 %v9060_v29  ;;  %v8453_v22 = vld [vmem:[%s9450_s16 + $0x2b8] sm:$0xff]  }
 0x309   : > { %7750 = vmatprep.subr.bf16.mxu1 %v9060_v29  ;;  %v9992_v43 = vrot.slane %v1423_v21, %v9634_v54  ;;  %v8479_v21 = vld [vmem:[%s9450_s16 + $0x390] sm:$0xff]  }
 0x30b   : > { %v1487_v48 = vcombine.high %v9989_v42, %v9992_v43 }
 0x30d   : > { %v1501_v51 = vrot.slane %v1487_v48, %v9643_v62 }
 0x30f   : > { %7731 = vmatpush3.bf16.xpose.msra.mxu0 %v8433_v27  ;;  %v8456_v27 = vld [vmem:[%s9450_s16 + $0x340] sm:$0xff]   ;;  %v10010_v30 = vcombine.high %v1469_v50, %v1501_v51 }
 0x310   : > { %7751 = vmatpush3.bf16.xpose.msra.mxu1 %v8434_v28  ;;  %7756 = vmatprep.subr.bf16.mxu0 %v9060_v29  ;;  %v10008_v28 = vcombine.low %v1469_v50, %v1501_v51  ;;  %v8481_v51 = vld [vmem:[%s9450_s16 + $0x398] sm:$0xff]  }
 0x311   : > { %7776 = vmatprep.subr.bf16.mxu1 %v9060_v29 }
 0x316   : > { %7733 = vmatmul.mubr.bf16.vlgmr.msra.gmra.mrb[16].mxu0 %v1654_v32  ;;  %v8460_v32 = vld [vmem:[%s9450_s16 + $0x350] sm:$0xff]  }
 0x317   : > { %7753 = vmatmul.mubr.bf16.vlgmr.msra.gmra.mrb[16].mxu1 %v1655_v34  ;;  %7757 = vmatpush3.bf16.xpose.msra.mxu0 %v8439_v35 }
 0x318   : > { %7777 = vmatpush3.bf16.xpose.msra.mxu1 %v8440_v53  ;;  %7758 = vmatprep.subr.bf16.mxu0 %v9060_v29 }
 0x319   : > { %7778 = vmatprep.subr.bf16.mxu1 %v9060_v29  ;;  %7772 = vmatprep.mubr.msk.bf16.mxu0 %vm9061_vm3, %v9060_v29 }
 0x31a   : > { %7792 = vmatprep.mubr.msk.bf16.mxu1 %vm9061_vm3, %v9060_v29 }
 0x31f   : > { %7759 = vmatpush3.bf16.xpose.msra.mxu0 %v8441_v55 }
 0x320   : > { %7779 = vmatpush3.bf16.xpose.msra.mxu1 %v8442_v36  ;;  %7760 = vmatprep.subr.bf16.mxu0 %v9060_v29 }
 0x321   : > { %7780 = vmatprep.subr.bf16.mxu1 %v9060_v29 }
 0x327   : > { %7761 = vmatpush3.bf16.xpose.msra.mxu0 %v8443_v37  ;;  %v8461_v37 = vld [vmem:[%s9450_s16 + $0x318] sm:$0xff]  }
 0x328   : > { %7781 = vmatpush3.bf16.xpose.msra.mxu1 %v8444_v38  ;;  %7762 = vmatprep.subr.bf16.mxu0 %v9060_v29 }
 0x329   : > { %v2312_v39 = vpop.f32.mrb[4].mxu0  ;;  %7782 = vmatprep.subr.bf16.mxu1 %v9060_v29 }
 0x32a   : > { %v4166_v40 = vcombine.low %v9885_v7, %v2312_v39  ;;  %v4167_v41 = vcombine.high %v9885_v7, %v2312_v39  ;;  %v2400_v45 = vpop.f32.mrb[4].mxu1  ;;  %v7614_v46 = vpop.f32.mrb[5].mxu0 }
 0x32b   : > { %v4182_v56 = vcombine.low %v9888_v8, %v2400_v45  ;;  %v4183_v59 = vcombine.high %v9888_v8, %v2400_v45  ;;  %v7634_v60 = vpop.f32.mrb[5].mxu1  ;;  %v2315_v61 = vpop.f32.mrb[6].mxu0  ;;  %v8463_v45 = vld [vmem:[%s9450_s16 + $0x320] sm:$0xff]  }
 0x32c   : > { %v9938_v0 = vrot.slane %v4166_v40, %v9634_v54  ;;  %v9941_v1 = vrot.slane %v4167_v41, %v9634_v54  ;;  %v2403_v4 = vpop.f32.mrb[6].mxu1  ;;  %v7615_v57 = vpop.f32.mrb[7].mxu0  ;;  %v8462_v40 = vld [vmem:[%s9450_s16 + $0x358] sm:$0xff]   ;;  %v8464_v46 = vld [vmem:[%s9450_s16 + $0x360] sm:$0xff]   ;;  %v8467_v60 = vld [vmem:[%s9450_s16 + $0x330] sm:$0xff]  }
 0x32d   : > { %v9945_v5 = vrot.slane %v4182_v56, %v9634_v54  ;;  %v9948_v6 = vrot.slane %v4183_v59, %v9634_v54  ;;  %v7635_v7 = vpop.f32.mrb[7].mxu1  ;;  %v8465_v56 = vld [vmem:[%s9450_s16 + $0x328] sm:$0xff]   ;;  %v8468_v61 = vld [vmem:[%s9450_s16 + $0x370] sm:$0xff]   ;;  %v1486_v4 = vcombine.low %v9989_v42, %v9992_v43 }
 0x32e   : > { %v8466_v59 = vld [vmem:[%s9450_s16 + $0x368] sm:$0xff]   ;;  %v8469_v7 = vld [vmem:[%s9450_s16 + $0x338] sm:$0xff]  }
 0x32f   : > { %v4230_v8 = vcombine.low %v9938_v0, %v9945_v5  ;;  %v4231_v9 = vcombine.high %v9938_v0, %v9945_v5  ;;  %v4246_v10 = vcombine.low %v9941_v1, %v9948_v6  ;;  %v4247_v11 = vcombine.high %v9941_v1, %v9948_v6  ;;  %7763 = vmatpush3.bf16.xpose.msra.mxu0 %v8445_v63  ;;  %v4575_v0 = vld [vmem:[%s9485_s4 + $0x8] sm:$0xff] }
 0x330   : > { %7783 = vmatpush3.bf16.xpose.msra.mxu1 %v8446_v58  ;;  %7764 = vmatprep.subr.bf16.mxu0 %v9060_v29  ;;  %v1454_v63 = vcombine.low %v9983_v24, %v9986_v25  ;;  %v1494_v58 = vrot.slane %v1486_v4, %v9643_v62  ;;  %v8486_v4 = vld [vmem:[%s9450_s16 + $0x3e8] sm:$0xff]  }
 0x331   : > { %7784 = vmatprep.subr.bf16.mxu1 %v9060_v29  ;;  %v10113_v5 = vrot.slane %v4246_v10, %v9643_v62  ;;  %4584 = vperm.xlu0 %8345, %v4575_v0  }
 0x332   : > { %v1462_v57 = vrot.slane %v1454_v63, %v9643_v62  ;;  %v8485_v63 = vld [vmem:[%s9450_s16 + $0x3a8] sm:$0xff]  }
 0x337   : > { %7765 = vmatpush3.bf16.xpose.msra.mxu0 %v8447_v12  ;;  %v8470_v12 = vld [vmem:[%s9450_s16 + $0x378] sm:$0xff]  }
 0x338   : > { %7785 = vmatpush3.bf16.xpose.msra.mxu1 %v8448_v13  ;;  %7766 = vmatprep.subr.bf16.mxu0 %v9060_v29  ;;  %v1506_v13 = vcombine.low %v1462_v57, %v1494_v58 }
 0x339   : > { %7786 = vmatprep.subr.bf16.mxu1 %v9060_v29 }
 0x33f   : > { %7767 = vmatpush3.bf16.xpose.msra.mxu0 %v8449_v14  ;;  %v1507_v14 = vcombine.high %v1462_v57, %v1494_v58  ;;  %v8487_v57 = vld [vmem:[%s9450_s16 + $0x3b0] sm:$0xff]  }
 0x340   : > { %7787 = vmatpush3.bf16.xpose.msra.mxu1 %v8450_v15  ;;  %7768 = vmatprep.subr.bf16.mxu0 %v9060_v29  ;;  %v1658_v15 = vpack.c.bf16 %v1506_v13, %v1506_v13  ;;  %v8488_v58 = vld [vmem:[%s9450_s16 + $0x3f0] sm:$0xff]   ;;  %v10151_v13 = vld [vmem:[#allocation2 + $0x40] sm:$0xff] }
 0x341   : > { %7788 = vmatprep.subr.bf16.mxu1 %v9060_v29 }
 0x347   : > { %7769 = vmatpush3.bf16.xpose.msra.mxu0 %v8451_v16  ;;  %v1659_v16 = vpack.c.bf16 %v1507_v14, %v1507_v14  ;;  %v10153_v14 = vld [vmem:[#allocation2 + $0x58] sm:$0xff] }
 0x348   : > { %7789 = vmatpush3.bf16.xpose.msra.mxu1 %v8452_v17  ;;  %7770 = vmatprep.subr.bf16.mxu0 %v9060_v29  ;;  %v8475_v17 = vld [vmem:[%s9450_s16 + $0x380] sm:$0xff]  }
 0x349   : > { %7790 = vmatprep.subr.bf16.mxu1 %v9060_v29 }
 0x34f   : > { %7771 = vmatpush3.bf16.xpose.msra.mxu0 %v8453_v22  ;;  %v8480_v22 = vld [vmem:[%s9450_s16 + $0x3d0] sm:$0xff]  }
 0x350   : > { %7791 = vmatpush3.bf16.xpose.msra.mxu1 %v8454_v23  ;;  %7796 = vmatprep.subr.bf16.mxu0 %v9060_v29 }
 0x351   : > { %7816 = vmatprep.subr.bf16.mxu1 %v9060_v29 }
 0x356   : > { %7773 = vmatmul.mubr.bf16.vlgmr.msra.gmra.mrb[20].mxu0 %v1656_v49 }
 0x357   : > { %7793 = vmatmul.mubr.bf16.vlgmr.msra.gmra.mrb[20].mxu1 %v1657_v52  ;;  %7797 = vmatpush3.bf16.xpose.msra.mxu0 %v8455_v26 }
 0x358   : > { %7817 = vmatpush3.bf16.xpose.msra.mxu1 %v8456_v27  ;;  %7798 = vmatprep.subr.bf16.mxu0 %v9060_v29 }
 0x359   : > { %7818 = vmatprep.subr.bf16.mxu1 %v9060_v29  ;;  %7812 = vmatprep.mubr.msk.bf16.mxu0 %vm9061_vm3, %v9060_v29 }
 0x35a   : > { %7832 = vmatprep.mubr.msk.bf16.mxu1 %vm9061_vm3, %v9060_v29 }
 0x35f   : > { %7799 = vmatpush3.bf16.xpose.msra.mxu0 %v8457_v2 }
 0x360   : > { %7819 = vmatpush3.bf16.xpose.msra.mxu1 %v8458_v3  ;;  %7800 = vmatprep.subr.bf16.mxu0 %v9060_v29  ;;  %v8482_v3 = vld [vmem:[%s9450_s16 + $0x3d8] sm:$0xff]  }
 0x361   : > { %7820 = vmatprep.subr.bf16.mxu1 %v9060_v29 }
 0x367   : > { %7801 = vmatpush3.bf16.xpose.msra.mxu0 %v8459_v31 }
 0x368   : > { %7821 = vmatpush3.bf16.xpose.msra.mxu1 %v8460_v32  ;;  %7802 = vmatprep.subr.bf16.mxu0 %v9060_v29 }
 0x369   : > { %v10025_v34 = vpop.f32.mrb[8].mxu0  ;;  %7822 = vmatprep.subr.bf16.mxu1 %v9060_v29 }
 0x36a   : > { %v10028_v35 = vpop.f32.mrb[8].mxu1  ;;  %v7654_v53 = vpop.f32.mrb[9].mxu0 }
 0x36b   : > { %v7674_v55 = vpop.f32.mrb[9].mxu1  ;;  %v2491_v36 = vpop.f32.mrb[10].mxu0 }
 0x36c   : > { %v2579_v38 = vpop.f32.mrb[10].mxu1  ;;  %v7655_v39 = vpop.f32.mrb[11].mxu0 }
 0x36d   : > { %v7675_v41 = vpop.f32.mrb[11].mxu1  ;;  %v10092_v38 = vrot.slane %v4231_v9, %v9643_v62  ;;  %v10119_v9 = vrot.slane %v4247_v11, %v9643_v62 }
 0x36f   : > { %7803 = vmatpush3.bf16.xpose.msra.mxu0 %v8461_v37  ;;  %v10086_v37 = vrot.slane %v4230_v8, %v9643_v62 }
 0x370   : > { %7823 = vmatpush3.bf16.xpose.msra.mxu1 %v8462_v40  ;;  %7804 = vmatprep.subr.bf16.mxu0 %v9060_v29 }
 0x371   : > { %7824 = vmatprep.subr.bf16.mxu1 %v9060_v29 }
 0x377   : > { %7805 = vmatpush3.bf16.xpose.msra.mxu0 %v8463_v45 }
 0x378   : > { %7825 = vmatpush3.bf16.xpose.msra.mxu1 %v8464_v46  ;;  %7806 = vmatprep.subr.bf16.mxu0 %v9060_v29 }
 0x379   : > { %7826 = vmatprep.subr.bf16.mxu1 %v9060_v29 }
 0x37f   : > { %7807 = vmatpush3.bf16.xpose.msra.mxu0 %v8465_v56 }
 0x380   : > { %7827 = vmatpush3.bf16.xpose.msra.mxu1 %v8466_v59  ;;  %7808 = vmatprep.subr.bf16.mxu0 %v9060_v29  ;;  %v8483_v59 = vld [vmem:[%s9450_s16 + $0x3a0] sm:$0xff]  }
 0x381   : > { %7828 = vmatprep.subr.bf16.mxu1 %v9060_v29 }
 0x387   : > { %7809 = vmatpush3.bf16.xpose.msra.mxu0 %v8467_v60 }
 0x388   : > { %7829 = vmatpush3.bf16.xpose.msra.mxu1 %v8468_v61  ;;  %7810 = vmatprep.subr.bf16.mxu0 %v9060_v29  ;;  %v8484_v61 = vld [vmem:[%s9450_s16 + $0x3e0] sm:$0xff]  }
 0x389   : > { %7830 = vmatprep.subr.bf16.mxu1 %v9060_v29 }
 0x38f   : > { %7811 = vmatpush3.bf16.xpose.msra.mxu0 %v8469_v7  ;;  %v10147_v7 = vld [vmem:[#allocation2 + $0x10] sm:$0xff] }
 0x390   : > { %7831 = vmatpush3.bf16.xpose.msra.mxu1 %v8470_v12  ;;  %7836 = vmatprep.subr.bf16.mxu0 %v9060_v29  ;;  %v10149_v12 = vld [vmem:[#allocation2 + $0x28] sm:$0xff] }
 0x391   : > { %7856 = vmatprep.subr.bf16.mxu1 %v9060_v29 }
 0x396   : > { %7813 = vmatmul.mubr.bf16.vlgmr.msra.gmra.mrb[24].mxu0 %v1658_v15  ;;  %v10155_v15 = vld [vmem:[#allocation2 + $0x70] sm:$0xff] }
 0x397   : > { %7833 = vmatmul.mubr.bf16.vlgmr.msra.gmra.mrb[24].mxu1 %v1659_v16  ;;  %7837 = vmatpush3.bf16.xpose.msra.mxu0 %v8475_v17  ;;  %v10157_v16 = vld [vmem:[#allocation2 + $0x88] sm:$0xff]  ;;  %v10159_v17 = vld [vmem:[#allocation2 + $0xa0] sm:$0xff] }
 0x398   : > { %7857 = vmatpush3.bf16.xpose.msra.mxu1 %v8476_v18  ;;  %7838 = vmatprep.subr.bf16.mxu0 %v9060_v29  ;;  %v10161_v18 = vld [vmem:[#allocation2 + $0xb8] sm:$0xff] }
 0x399   : > { %7858 = vmatprep.subr.bf16.mxu1 %v9060_v29  ;;  %7852 = vmatprep.mubr.msk.bf16.mxu0 %vm9061_vm3, %v9060_v29 }
 0x39a   : > { %7872 = vmatprep.mubr.msk.bf16.mxu1 %vm9061_vm3, %v9060_v29 }
 0x39f   : > { %7839 = vmatpush3.bf16.xpose.msra.mxu0 %v8477_v19  ;;  %v1510_v19 = vcombine.low %v10147_v7, %v10151_v13 }
 0x3a0   : > { %7859 = vmatpush3.bf16.xpose.msra.mxu1 %v8478_v20  ;;  %7840 = vmatprep.subr.bf16.mxu0 %v9060_v29  ;;  %v1526_v20 = vcombine.low %v10149_v12, %v10153_v14 }
 0x3a1   : > { %7860 = vmatprep.subr.bf16.mxu1 %v9060_v29 }
 0x3a7   : > { %7841 = vmatpush3.bf16.xpose.msra.mxu0 %v8479_v21  ;;  %v1542_v21 = vcombine.low %v10155_v15, %v10159_v17 }
 0x3a8   : > { %7861 = vmatpush3.bf16.xpose.msra.mxu1 %v8480_v22  ;;  %7842 = vmatprep.subr.bf16.mxu0 %v9060_v29  ;;  %v1558_v22 = vcombine.low %v10157_v16, %v10161_v18 }
 0x3a9   : > { %v2664_v23 = vpop.f32.mrb[12].mxu0  ;;  %7862 = vmatprep.subr.bf16.mxu1 %v9060_v29 }
 0x3aa   : > { %v4198_v24 = vcombine.low %v10025_v34, %v2664_v23  ;;  %v4199_v25 = vcombine.high %v10025_v34, %v2664_v23  ;;  %v2752_v42 = vpop.f32.mrb[12].mxu1  ;;  %v7694_v43 = vpop.f32.mrb[13].mxu0  ;;  %v8489_v23 = vld [vmem:[%s9450_s16 + $0x3b8] sm:$0xff]  }
 0x3ab   : > { %v4214_v47 = vcombine.low %v10028_v35, %v2752_v42  ;;  %v4215_v48 = vcombine.high %v10028_v35, %v2752_v42  ;;  %v7714_v49 = vpop.f32.mrb[13].mxu1  ;;  %v2667_v50 = vpop.f32.mrb[14].mxu0  ;;  %v10179_v42 = vrot.slane %v1526_v20, %v9634_v54  ;;  %v10182_v43 = vrot.slane %v1542_v21, %v9634_v54  ;;  %v8501_v20 = vld [vmem:[%s9450_s16 + $0x428] sm:$0xff]  }
 0x3ac   : > { %v4206_v52 = vrot.slane %v4198_v24, %v9634_v54  ;;  %v4213_v26 = vrot.slane %v4199_v25, %v9634_v54  ;;  %v2755_v27 = vpop.f32.mrb[14].mxu1  ;;  %v7695_v2 = vpop.f32.mrb[15].mxu0  ;;  %v8490_v24 = vld [vmem:[%s9450_s16 + $0x3f8] sm:$0xff]   ;;  %v10176_v25 = vrot.slane %v1510_v19, %v9634_v54  ;;  %v1660_v50 = vpack.c.bf16 %v10008_v28, %v10008_v28  ;;  %v8493_v28 = vld [vmem:[%s9450_s16 + $0x408] sm:$0xff]   ;;  %v8500_v19 = vld [vmem:[%s9450_s16 + $0x460] sm:$0xff]  }
 0x3ad   : > { %v4222_v31 = vrot.slane %v4214_v47, %v9634_v54  ;;  %v4229_v32 = vrot.slane %v4215_v48, %v9634_v54  ;;  %v7715_v34 = vpop.f32.mrb[15].mxu1  ;;  %v10185_v47 = vrot.slane %v1558_v22, %v9634_v54  ;;  %v8491_v27 = vld [vmem:[%s9450_s16 + $0x400] sm:$0xff]   ;;  %v8502_v21 = vld [vmem:[%s9450_s16 + $0x468] sm:$0xff]   ;;  %v8503_v22 = vld [vmem:[%s9450_s16 + $0x430] sm:$0xff]  }
 0x3ae   : > { %v1575_v48 = vcombine.high %v10176_v25, %v10179_v42  ;;  %v8492_v2 = vld [vmem:[%s9450_s16 + $0x440] sm:$0xff]   ;;  %v8496_v34 = vld [vmem:[%s9450_s16 + $0x450] sm:$0xff]  }
 0x3af   : > { %v4262_v53 = vcombine.low %v4206_v52, %v4222_v31  ;;  %v4263_v55 = vcombine.high %v4206_v52, %v4222_v31  ;;  %v4278_v36 = vcombine.low %v4213_v26, %v4229_v32  ;;  %v4279_v35 = vcombine.high %v4213_v26, %v4229_v32  ;;  %7843 = vmatpush3.bf16.xpose.msra.mxu0 %v8481_v51  ;;  %v8495_v32 = vld [vmem:[%s9450_s16 + $0x410] sm:$0xff]  }
 0x3b0   : > { %7863 = vmatpush3.bf16.xpose.msra.mxu1 %v8482_v3  ;;  %7844 = vmatprep.subr.bf16.mxu0 %v9060_v29  ;;  %v1607_v49 = vcombine.high %v10182_v43, %v10185_v47  ;;  %v1589_v51 = vrot.slane %v1575_v48, %v9643_v62  ;;  %v1661_v26 = vpack.c.bf16 %v10010_v30, %v10010_v30  ;;  %v8494_v30 = vld [vmem:[%s9450_s16 + $0x448] sm:$0xff]  }
 0x3b1   : > { %v10096_v39 = vrot.slane %v4262_v53, %v9643_v62  ;;  %v10099_v40 = vrot.slane %v4263_v55, %v9643_v62  ;;  %v10102_v41 = vrot.slane %v4278_v36, %v9643_v62  ;;  %v10105_v8 = vrot.slane %v4279_v35, %v9643_v62  ;;  %7864 = vmatprep.subr.bf16.mxu1 %v9060_v29 }
 0x3b2   : > { %v1621_v52 = vrot.slane %v1607_v49, %v9643_v62  ;;  %v1606_v48 = vcombine.low %v10182_v43, %v10185_v47  ;;  %v8511_v47 = vld [vmem:[%s9450_s16 + $0x480] sm:$0xff]  }
 0x3b3   : > { %v4294_v45 = vcombine.low %v10086_v37, %v10096_v39  ;;  %v4295_v46 = vcombine.high %v10086_v37, %v10096_v39  ;;  %v4296_v56 = vcombine.low %v10092_v38, %v10099_v40  ;;  %v4297_v10 = vcombine.high %v10092_v38, %v10099_v40  ;;  %v8733_v39 = vld [vmem:[#allocation2 + $0x90] sm:$0xff]  ;;  %v8734_v40 = vld [vmem:[#allocation2 + $0xa8] sm:$0xff] }
 0x3b4   : > { %v4298_v1 = vcombine.low %v10113_v5, %v10102_v41  ;;  %v4299_v6 = vcombine.high %v10113_v5, %v10102_v41  ;;  %v4300_v11 = vcombine.low %v10119_v9, %v10105_v8  ;;  %v4301_v60 = vcombine.high %v10119_v9, %v10105_v8  ;;  %v8550_v5 = vld [vmem:[%s9450_s16 + $0x5c8] sm:$0xff]  }
 0x3b5   : > { %v10201_v3 = vcombine.low %v1589_v51, %v1621_v52  ;;  %v10203_v31 = vcombine.high %v1589_v51, %v1621_v52  ;;  %v8505_v51 = vld [vmem:[%s9450_s16 + $0x438] sm:$0xff]  }
 0x3b6   : > { %v8506_v52 = vld [vmem:[%s9450_s16 + $0x478] sm:$0xff]  }
 0x3b7   : > { %7845 = vmatpush3.bf16.xpose.msra.mxu0 %v8483_v59  ;;  %v8497_v59 = vld [vmem:[%s9450_s16 + $0x418] sm:$0xff]  }
 0x3b8   : > { %7865 = vmatpush3.bf16.xpose.msra.mxu1 %v8484_v61  ;;  %7846 = vmatprep.subr.bf16.mxu0 %v9060_v29 }
 0x3b9   : > { %7866 = vmatprep.subr.bf16.mxu1 %v9060_v29 }
 0x3bf   : > { %7847 = vmatpush3.bf16.xpose.msra.mxu0 %v8485_v63 }
 0x3c0   : > { %7867 = vmatpush3.bf16.xpose.msra.mxu1 %v8486_v4  ;;  %7848 = vmatprep.subr.bf16.mxu0 %v9060_v29  ;;  %v8498_v4 = vld [vmem:[%s9450_s16 + $0x458] sm:$0xff]  }
 0x3c1   : > { %7868 = vmatprep.subr.bf16.mxu1 %v9060_v29 }
 0x3c7   : > { %7849 = vmatpush3.bf16.xpose.msra.mxu0 %v8487_v57 }
 0x3c8   : > { %7869 = vmatpush3.bf16.xpose.msra.mxu1 %v8488_v58  ;;  %7850 = vmatprep.subr.bf16.mxu0 %v9060_v29  ;;  %v8499_v58 = vld [vmem:[%s9450_s16 + $0x420] sm:$0xff]  }
 0x3c9   : > { %7870 = vmatprep.subr.bf16.mxu1 %v9060_v29 }
 0x3cf   : > { %7851 = vmatpush3.bf16.xpose.msra.mxu0 %v8489_v23  ;;  %v8504_v23 = vld [vmem:[%s9450_s16 + $0x470] sm:$0xff]  }
 0x3d0   : > { %7871 = vmatpush3.bf16.xpose.msra.mxu1 %v8490_v24  ;;  %7876 = vmatprep.subr.bf16.mxu0 %v9060_v29  ;;  %v1574_v24 = vcombine.low %v10176_v25, %v10179_v42 }
 0x3d1   : > { %7896 = vmatprep.subr.bf16.mxu1 %v9060_v29 }
 0x3d2   : > { %v1582_v49 = vrot.slane %v1574_v24, %v9643_v62 }
 0x3d6   : > { %7853 = vmatmul.mubr.bf16.vlgmr.msra.gmra.mrb[28].mxu0 %v1660_v50  ;;  %v1614_v50 = vrot.slane %v1606_v48, %v9643_v62 }
 0x3d7   : > { %7873 = vmatmul.mubr.bf16.vlgmr.msra.gmra.mrb[28].mxu1 %v1661_v26  ;;  %7877 = vmatpush3.bf16.xpose.msra.mxu0 %v8491_v27  ;;  %v8512_v27 = vld [vmem:[%s9450_s16 + $0x4c0] sm:$0xff]  }
 0x3d8   : > { %7897 = vmatpush3.bf16.xpose.msra.mxu1 %v8492_v2  ;;  %7878 = vmatprep.subr.bf16.mxu0 %v9060_v29  ;;  %v1638_v26 = vcombine.low %v1582_v49, %v1614_v50  ;;  %v1639_v25 = vcombine.high %v1582_v49, %v1614_v50  ;;  %v8513_v2 = vld [vmem:[%s9450_s16 + $0x488] sm:$0xff]  }
 0x3d9   : > { %7898 = vmatprep.subr.bf16.mxu1 %v9060_v29  ;;  %7892 = vmatprep.mubr.msk.bf16.mxu0 %vm9061_vm3, %v9060_v29 }
 0x3da   : > { %7912 = vmatprep.mubr.msk.bf16.mxu1 %vm9061_vm3, %v9060_v29  ;;  %v1662_v42 = vpack.c.bf16 %v1638_v26, %v1638_v26  ;;  %v1663_v43 = vpack.c.bf16 %v1639_v25, %v1639_v25  ;;  %v8520_v26 = vld [vmem:[%s9450_s16 + $0x4e0] sm:$0xff]   ;;  %v8521_v25 = vld [vmem:[%s9450_s16 + $0x4a8] sm:$0xff]  }
 0x3df   : > { %7879 = vmatpush3.bf16.xpose.msra.mxu0 %v8493_v28  ;;  %v8514_v28 = vld [vmem:[%s9450_s16 + $0x4c8] sm:$0xff]  }
 0x3e0   : > { %7899 = vmatpush3.bf16.xpose.msra.mxu1 %v8494_v30  ;;  %7880 = vmatprep.subr.bf16.mxu0 %v9060_v29  ;;  %v8515_v30 = vld [vmem:[%s9450_s16 + $0x490] sm:$0xff]  }
 0x3e1   : > { %7900 = vmatprep.subr.bf16.mxu1 %v9060_v29 }
 0x3e7   : > { %7881 = vmatpush3.bf16.xpose.msra.mxu0 %v8495_v32  ;;  %v8516_v32 = vld [vmem:[%s9450_s16 + $0x4d0] sm:$0xff]  }
 0x3e8   : > { %7901 = vmatpush3.bf16.xpose.msra.mxu1 %v8496_v34  ;;  %7882 = vmatprep.subr.bf16.mxu0 %v9060_v29 }
 0x3e9   : > { %v10218_v53 = vpop.f32.mrb[16].mxu0  ;;  %7902 = vmatprep.subr.bf16.mxu1 %v9060_v29 }
 0x3ea   : > { %v10221_v55 = vpop.f32.mrb[16].mxu1  ;;  %v7734_v36 = vpop.f32.mrb[17].mxu0 }
 0x3eb   : > { %v7754_v35 = vpop.f32.mrb[17].mxu1  ;;  %v2843_v0 = vpop.f32.mrb[18].mxu0 }
 0x3ec   : > { %v2931_v61 = vpop.f32.mrb[18].mxu1  ;;  %v7735_v63 = vpop.f32.mrb[19].mxu0 }
 0x3ed   : > { %v7755_v57 = vpop.f32.mrb[19].mxu1 }
 0x3ef   : > { %7883 = vmatpush3.bf16.xpose.msra.mxu0 %v8497_v59 }
 0x3f0   : > { %7903 = vmatpush3.bf16.xpose.msra.mxu1 %v8498_v4  ;;  %7884 = vmatprep.subr.bf16.mxu0 %v9060_v29 }
 0x3f1   : > { %7904 = vmatprep.subr.bf16.mxu1 %v9060_v29 }
 0x3f7   : > { %7885 = vmatpush3.bf16.xpose.msra.mxu0 %v8499_v58  ;;  %v8517_v58 = vld [vmem:[%s9450_s16 + $0x498] sm:$0xff]  }
 0x3f8   : > { %7905 = vmatpush3.bf16.xpose.msra.mxu1 %v8500_v19  ;;  %7886 = vmatprep.subr.bf16.mxu0 %v9060_v29 }
 0x3f9   : > { %7906 = vmatprep.subr.bf16.mxu1 %v9060_v29 }
 0x3ff   : > { %7887 = vmatpush3.bf16.xpose.msra.mxu0 %v8501_v20 }
 0x400   : > { %7907 = vmatpush3.bf16.xpose.msra.mxu1 %v8502_v21  ;;  %7888 = vmatprep.subr.bf16.mxu0 %v9060_v29 }
 0x401   : > { %7908 = vmatprep.subr.bf16.mxu1 %v9060_v29 }
 0x407   : > { %7889 = vmatpush3.bf16.xpose.msra.mxu0 %v8503_v22 }
 0x408   : > { %7909 = vmatpush3.bf16.xpose.msra.mxu1 %v8504_v23  ;;  %7890 = vmatprep.subr.bf16.mxu0 %v9060_v29 }
 0x409   : > { %7910 = vmatprep.subr.bf16.mxu1 %v9060_v29 }
 0x40f   : > { %7891 = vmatpush3.bf16.xpose.msra.mxu0 %v8505_v51 }
 0x410   : > { %7911 = vmatpush3.bf16.xpose.msra.mxu1 %v8506_v52  ;;  %7916 = vmatprep.subr.bf16.mxu0 %v9060_v29  ;;  %v8519_v52 = vld [vmem:[%s9450_s16 + $0x4a0] sm:$0xff]  }
 0x411   : > { %7936 = vmatprep.subr.bf16.mxu1 %v9060_v29 }
 0x416   : > { %7893 = vmatmul.mubr.bf16.vlgmr.msra.gmra.mrb[32].mxu0 %v1662_v42  ;;  %v8522_v42 = vld [vmem:[%s9450_s16 + $0x4e8] sm:$0xff]  }
 0x417   : > { %7913 = vmatmul.mubr.bf16.vlgmr.msra.gmra.mrb[32].mxu1 %v1663_v43  ;;  %7917 = vmatpush3.bf16.xpose.msra.mxu0 %v8511_v47  ;;  %v8523_v43 = vld [vmem:[%s9450_s16 + $0x4b0] sm:$0xff]  }
 0x418   : > { %7937 = vmatpush3.bf16.xpose.msra.mxu1 %v8512_v27  ;;  %7918 = vmatprep.subr.bf16.mxu0 %v9060_v29  ;;  %v8524_v47 = vld [vmem:[%s9450_s16 + $0x4f0] sm:$0xff]   ;;  %v1511_v27 = vcombine.high %v10147_v7, %v10151_v13 }
 0x419   : > { %7938 = vmatprep.subr.bf16.mxu1 %v9060_v29  ;;  %7932 = vmatprep.mubr.msk.bf16.mxu0 %vm9061_vm3, %v9060_v29 }
 0x41a   : > { %7952 = vmatprep.mubr.msk.bf16.mxu1 %vm9061_vm3, %v9060_v29 }
 0x41f   : > { %7919 = vmatpush3.bf16.xpose.msra.mxu0 %v8513_v2  ;;  %v1527_v2 = vcombine.high %v10149_v12, %v10153_v14 }
 0x420   : > { %7939 = vmatpush3.bf16.xpose.msra.mxu1 %v8514_v28  ;;  %7920 = vmatprep.subr.bf16.mxu0 %v9060_v29  ;;  %v1543_v28 = vcombine.high %v10155_v15, %v10159_v17  ;;  %v1664_v15 = vpack.c.bf16 %v10201_v3, %v10201_v3  ;;  %v8529_v3 = vld [vmem:[%s9450_s16 + $0x508] sm:$0xff]  }
 0x421   : > { %7940 = vmatprep.subr.bf16.mxu1 %v9060_v29 }
 0x422   : > { %v10322_v7 = vrot.slane %v1543_v28, %v9634_v54  ;;  %v5742_v28 = vld [vmem:[%s9495_s3] sm:$0xff] }
 0x427   : > { %7921 = vmatpush3.bf16.xpose.msra.mxu0 %v8515_v30  ;;  %v1559_v30 = vcombine.high %v10157_v16, %v10161_v18  ;;  %v1665_v18 = vpack.c.bf16 %v10203_v31, %v10203_v31  ;;  %v8530_v31 = vld [vmem:[%s9450_s16 + $0x548] sm:$0xff]  }
 0x428   : > { %7941 = vmatpush3.bf16.xpose.msra.mxu1 %v8516_v32  ;;  %7922 = vmatprep.subr.bf16.mxu0 %v9060_v29  ;;  %v8525_v32 = vld [vmem:[%s9450_s16 + $0x4b8] sm:$0xff]  }
 0x429   : > { %v3016_v34 = vpop.f32.mrb[20].mxu0  ;;  %7942 = vmatprep.subr.bf16.mxu1 %v9060_v29  ;;  %v10325_v12 = vrot.slane %v1559_v30, %v9634_v54  ;;  %v8535_v30 = vld [vmem:[%s9450_s16 + $0x520] sm:$0xff]  }
 0x42a   : > { %v4302_v36 = vcombine.low %v10218_v53, %v3016_v34  ;;  %v4303_v35 = vcombine.high %v10218_v53, %v3016_v34  ;;  %v3104_v0 = vpop.f32.mrb[20].mxu1  ;;  %v7774_v59 = vpop.f32.mrb[21].mxu0  ;;  %v8518_v53 = vld [vmem:[%s9450_s16 + $0x4d8] sm:$0xff]  }
 0x42b   : > { %v4318_v61 = vcombine.low %v10221_v55, %v3104_v0  ;;  %v4319_v63 = vcombine.high %v10221_v55, %v3104_v0  ;;  %v7794_v4 = vpop.f32.mrb[21].mxu1  ;;  %v3019_v57 = vpop.f32.mrb[22].mxu0  ;;  %v8526_v34 = vld [vmem:[%s9450_s16 + $0x4f8] sm:$0xff]   ;;  %v1623_v14 = vcombine.high %v10322_v7, %v10325_v12  ;;  %v8527_v0 = vld [vmem:[%s9450_s16 + $0x500] sm:$0xff]  }
 0x42c   : > { %v10271_v19 = vrot.slane %v4302_v36, %v9634_v54  ;;  %v10274_v20 = vrot.slane %v4303_v35, %v9634_v54  ;;  %v3107_v21 = vpop.f32.mrb[22].mxu1  ;;  %v7775_v22 = vpop.f32.mrb[23].mxu0  ;;  %v10316_v36 = vrot.slane %v1511_v27, %v9634_v54  ;;  %v10319_v35 = vrot.slane %v1527_v2, %v9634_v54  ;;  %v8528_v59 = vld [vmem:[%s9450_s16 + $0x540] sm:$0xff]   ;;  %v8531_v4 = vld [vmem:[%s9450_s16 + $0x510] sm:$0xff]  }
 0x42d   : > { %v10278_v23 = vrot.slane %v4318_v61, %v9634_v54  ;;  %v10281_v24 = vrot.slane %v4319_v63, %v9634_v54  ;;  %v7795_v55 = vpop.f32.mrb[23].mxu1  ;;  %v1637_v17 = vrot.slane %v1623_v14, %v9643_v62  ;;  %v8532_v57 = vld [vmem:[%s9450_s16 + $0x550] sm:$0xff]   ;;  %v5700_v2 = vld [vmem:[%s9490_s13] sm:$0xff]  ;;  %v6233_v14 = vld [vmem:[%s9500_s21 + $0x8] sm:$0xff] }
 0x42e   : > { %v1591_v13 = vcombine.high %v10316_v36, %v10319_v35  ;;  %v4576_v27 = vld [vmem:[%s9485_s4 + $0x10] sm:$0xff] }
 0x42f   : > { %v4366_v48 = vcombine.low %v10271_v19, %v10278_v23  ;;  %v4367_v49 = vcombine.high %v10271_v19, %v10278_v23  ;;  %v4382_v50 = vcombine.low %v10274_v20, %v10281_v24  ;;  %v4383_v51 = vcombine.high %v10274_v20, %v10281_v24  ;;  %7923 = vmatpush3.bf16.xpose.msra.mxu0 %v8517_v58  ;;  %v8737_v19 = vld [vmem:[#allocation2 + $0x38] sm:$0xff] }
 0x430   : > { %7943 = vmatpush3.bf16.xpose.msra.mxu1 %v8518_v53  ;;  %7924 = vmatprep.subr.bf16.mxu0 %v9060_v29  ;;  %v1605_v16 = vrot.slane %v1591_v13, %v9643_v62  ;;  %v8536_v13 = vld [vmem:[%s9450_s16 + $0x560] sm:$0xff]  }
 0x431   : > { %7944 = vmatprep.subr.bf16.mxu1 %v9060_v29  ;;  %4589 = vperm.xlu1 %8346, %v4576_v27   ;;  %v8731_v27 = vld [vmem:[#allocation2 + $0x60] sm:$0xff] }
 0x432   : > { %v10341_v61 = vcombine.low %v1605_v16, %v1637_v17  ;;  %v10343_v63 = vcombine.high %v1605_v16, %v1637_v17  ;;  %v8537_v16 = vld [vmem:[%s9450_s16 + $0x528] sm:$0xff]   ;;  %v6274_v17 = vld [vmem:[%s9505_s23] sm:$0xff] }
 0x435   : > { %5747 = vperm.xlu1 %8346, %v5742_v28  }
 0x437   : > { %7925 = vmatpush3.bf16.xpose.msra.mxu0 %v8519_v52  ;;  %v8533_v52 = vld [vmem:[%s9450_s16 + $0x518] sm:$0xff]  }
 0x438   : > { %7945 = vmatpush3.bf16.xpose.msra.mxu1 %v8520_v26  ;;  %7926 = vmatprep.subr.bf16.mxu0 %v9060_v29 }
 0x439   : > { %7946 = vmatprep.subr.bf16.mxu1 %v9060_v29 }
 0x43f   : > { %7927 = vmatpush3.bf16.xpose.msra.mxu0 %v8521_v25 }
 0x440   : > { %7947 = vmatpush3.bf16.xpose.msra.mxu1 %v8522_v42  ;;  %7928 = vmatprep.subr.bf16.mxu0 %v9060_v29  ;;  %v8534_v42 = vld [vmem:[%s9450_s16 + $0x558] sm:$0xff]  }
 0x441   : > { %7948 = vmatprep.subr.bf16.mxu1 %v9060_v29 }
 0x447   : > { %7929 = vmatpush3.bf16.xpose.msra.mxu0 %v8523_v43 }
 0x448   : > { %7949 = vmatpush3.bf16.xpose.msra.mxu1 %v8524_v47  ;;  %7930 = vmatprep.subr.bf16.mxu0 %v9060_v29  ;;  %v5743_v47 = vld [vmem:[%s9495_s3 + $0x8] sm:$0xff] }
 0x449   : > { %7950 = vmatprep.subr.bf16.mxu1 %v9060_v29  ;;  %5752 = vperm.xlu0 %8345, %v5743_v47  }
 0x44d   : > { %5705 = vperm.xlu0 %8345, %v5700_v2  }
 0x44f   : > { %7931 = vmatpush3.bf16.xpose.msra.mxu0 %v8525_v32  ;;  %v5702_v32 = vld [vmem:[%s9490_s13 + $0x10] sm:$0xff] }
 0x450   : > { %7951 = vmatpush3.bf16.xpose.msra.mxu1 %v8526_v34  ;;  %7956 = vmatprep.subr.bf16.mxu0 %v9060_v29  ;;  %v5744_v34 = vld [vmem:[%s9495_s3 + $0x10] sm:$0xff] }
 0x451   : > { %7976 = vmatprep.subr.bf16.mxu1 %v9060_v29  ;;  %5715 = vperm.xlu0 %8345, %v5702_v32  }
 0x452   : > { %5757 = vperm.xlu1 %8346, %v5744_v34   ;;  %v8547_v34 = vld [vmem:[%s9450_s16 + $0x580] sm:$0xff]  }
 0x455   : > { %6242 = vperm.xlu0 %8345, %v6233_v14   ;;  %v8548_v14 = vld [vmem:[%s9450_s16 + $0x5c0] sm:$0xff]  }
 0x456   : > { %7933 = vmatmul.mubr.bf16.vlgmr.msra.gmra.mrb[36].mxu0 %v1664_v15  ;;  %v5701_v15 = vld [vmem:[%s9490_s13 + $0x8] sm:$0xff] }
 0x457   : > { %7953 = vmatmul.mubr.bf16.vlgmr.msra.gmra.mrb[36].mxu1 %v1665_v18  ;;  %7957 = vmatpush3.bf16.xpose.msra.mxu0 %v8527_v0  ;;  %v8538_v18 = vld [vmem:[%s9450_s16 + $0x568] sm:$0xff]   ;;  %v8539_v0 = vld [vmem:[%s9450_s16 + $0x530] sm:$0xff]  }
 0x458   : > { %7977 = vmatpush3.bf16.xpose.msra.mxu1 %v8528_v59  ;;  %7958 = vmatprep.subr.bf16.mxu0 %v9060_v29  ;;  %v8540_v59 = vld [vmem:[%s9450_s16 + $0x570] sm:$0xff]  }
 0x459   : > { %7978 = vmatprep.subr.bf16.mxu1 %v9060_v29  ;;  %7972 = vmatprep.mubr.msk.bf16.mxu0 %vm9061_vm3, %v9060_v29 }
 0x45a   : > { %7992 = vmatprep.mubr.msk.bf16.mxu1 %vm9061_vm3, %v9060_v29  ;;  %5710 = vperm.xlu1 %8346, %v5701_v15   ;;  %v8732_v15 = vld [vmem:[#allocation2 + $0x78] sm:$0xff] }
 0x45b   : > { %6279 = vperm.xlu0 %8345, %v6274_v17  }
 0x45f   : > { %7959 = vmatpush3.bf16.xpose.msra.mxu0 %v8529_v3  ;;  %v1590_v3 = vcombine.low %v10316_v36, %v10319_v35  ;;  %v8728_v35 = vld [vmem:[#allocation2 + $0x18] sm:$0xff] }
 0x460   : > { %7979 = vmatpush3.bf16.xpose.msra.mxu1 %v8530_v31  ;;  %7960 = vmatprep.subr.bf16.mxu0 %v9060_v29  ;;  %v1622_v31 = vcombine.low %v10322_v7, %v10325_v12  ;;  %v8729_v12 = vld [vmem:[#allocation2 + $0x30] sm:$0xff] }
 0x461   : > { %7980 = vmatprep.subr.bf16.mxu1 %v9060_v29 }
 0x467   : > { %7961 = vmatpush3.bf16.xpose.msra.mxu0 %v8531_v4  ;;  %v1598_v4 = vrot.slane %v1590_v3, %v9643_v62  ;;  %v8549_v3 = vld [vmem:[%s9450_s16 + $0x588] sm:$0xff]  }
 0x468   : > { %7981 = vmatpush3.bf16.xpose.msra.mxu1 %v8532_v57  ;;  %7962 = vmatprep.subr.bf16.mxu0 %v9060_v29  ;;  %v1630_v57 = vrot.slane %v1622_v31, %v9643_v62 }
 0x469   : > { %v10358_v58 = vpop.f32.mrb[24].mxu0  ;;  %7982 = vmatprep.subr.bf16.mxu1 %v9060_v29 }
 0x46a   : > { %v10361_v21 = vpop.f32.mrb[24].mxu1  ;;  %v7814_v22 = vpop.f32.mrb[25].mxu0  ;;  %v1643_v36 = vcombine.high %v1598_v4, %v1630_v57 }
 0x46b   : > { %v7834_v53 = vpop.f32.mrb[25].mxu1  ;;  %v3195_v55 = vpop.f32.mrb[26].mxu0  ;;  %v8541_v22 = vld [vmem:[%s9450_s16 + $0x538] sm:$0xff]  }
 0x46c   : > { %v3283_v26 = vpop.f32.mrb[26].mxu1  ;;  %v7815_v25 = vpop.f32.mrb[27].mxu0  ;;  %v8542_v55 = vld [vmem:[%s9450_s16 + $0x578] sm:$0xff]   ;;  %v1667_v32 = vpack.c.bf16 %v1643_v36, %v1643_v36 }
 0x46d   : > { %v7835_v43 = vpop.f32.mrb[27].mxu1  ;;  %v4580_v53 = vpop.permute.xlu0 %4579  ;;  %v8727_v26 = vld [vmem:[#allocation2] sm:$0xff] }
 0x46e   : > { %v4592_v25 = vmul.f32 %v8727_v26, %v4580_v53  ;;  %v4595_v7 = vmul.f32 %v8728_v35, %v4580_v53  ;;  %v8730_v43 = vld [vmem:[#allocation2 + $0x48] sm:$0xff]  ;;  %v4604_v2 = vmul.f32 %v8731_v27, %v4580_v53  ;;  %v8551_v35 = vld [vmem:[%s9450_s16 + $0x590] sm:$0xff]  }
 0x46f   : > { %7963 = vmatpush3.bf16.xpose.msra.mxu0 %v8533_v52  ;;  %v1642_v52 = vcombine.low %v1598_v4, %v1630_v57  ;;  %v4601_v47 = vmul.f32 %v8730_v43, %v4580_v53 }
 0x470   : > { %7983 = vmatpush3.bf16.xpose.msra.mxu1 %v8534_v42  ;;  %7964 = vmatprep.subr.bf16.mxu0 %v9060_v29  ;;  %v4598_v42 = vmul.f32 %v8729_v12, %v4580_v53  ;;  %v8552_v12 = vld [vmem:[%s9450_s16 + $0x5d0] sm:$0xff]  }
 0x471   : > { %7984 = vmatprep.subr.bf16.mxu1 %v9060_v29  ;;  %v1666_v28 = vpack.c.bf16 %v1642_v52, %v1642_v52 }
 0x472   : > { %v10413_v17 = vadd.f32 %v4598_v42, %v4296_v56  ;;  %v4613_v56 = vmul.f32 %v8734_v40, %v4580_v53 }
 0x474   : > { %v10453_v4 = vadd.f32 %v4613_v56, %v4301_v60 }
 0x476   : > { %v4685_v26 = vmul.f32 0.044715, %v10453_v4 }
 0x477   : > { %7965 = vmatpush3.bf16.xpose.msra.mxu0 %v8535_v30  ;;  %v10401_v30 = vadd.f32 %v4592_v25, %v4294_v45  ;;  %v10418_v45 = vadd.f32 %v4601_v47, %v4297_v10 }
 0x478   : > { %7985 = vmatpush3.bf16.xpose.msra.mxu1 %v8536_v13  ;;  %7966 = vmatprep.subr.bf16.mxu0 %v9060_v29  ;;  %v10407_v13 = vadd.f32 %v4595_v7, %v4295_v46  ;;  %v4610_v46 = vmul.f32 %v8733_v39, %v4580_v53 }
 0x479   : > { %7986 = vmatprep.subr.bf16.mxu1 %v9060_v29  ;;  %v4664_v37 = vmul.f32 0.044715, %v10401_v30 }
 0x47a   : > { %v4667_v38 = vmul.f32 0.044715, %v10407_v13  ;;  %v10446_v41 = vadd.f32 %v4610_v46, %v4300_v11 }
 0x47b   : > { %v4688_v31 = vmul.f32 %v4664_v37, %v10401_v30  ;;  %v10482_v37 = vpop.permute.xlu0 %4584 }
 0x47c   : > { %v4682_v9 = vmul.f32 0.044715, %v10446_v41  ;;  %v4599_v23 = vmul.f32 %v8737_v19, %v10482_v37 }
 0x47d   : > { %v4712_v11 = vmul.f32 %v4688_v31, %v10401_v30 }
 0x47e   : > { %v4706_v43 = vmul.f32 %v4682_v9, %v10446_v41 }
 0x47f   : > { %7967 = vmatpush3.bf16.xpose.msra.mxu0 %v8537_v16  ;;  %v4607_v16 = vmul.f32 %v8732_v15, %v4580_v53  ;;  %v4736_v7 = vadd.f32 %v4712_v11, %v10401_v30 }
 0x480   : > { %7987 = vmatpush3.bf16.xpose.msra.mxu1 %v8538_v18  ;;  %7968 = vmatprep.subr.bf16.mxu0 %v9060_v29  ;;  %v10423_v18 = vadd.f32 %v4604_v2, %v4298_v1  ;;  %v4670_v1 = vmul.f32 0.044715, %v10413_v17  ;;  %v4709_v2 = vmul.f32 %v4685_v26, %v10453_v4  ;;  %v4730_v15 = vmul.f32 %v4706_v43, %v10446_v41  ;;  %v8735_v43 = vld [vmem:[#allocation2 + $0x8] sm:$0xff] }
 0x481   : > { %7988 = vmatprep.subr.bf16.mxu1 %v9060_v29  ;;  %v10431_v10 = vadd.f32 %v4607_v16, %v4299_v6  ;;  %v4691_v6 = vmul.f32 %v4667_v38, %v10407_v13 }
 0x482   : > { %v4694_v57 = vmul.f32 %v4670_v1, %v10413_v17  ;;  %v4733_v38 = vmul.f32 %v4709_v2, %v10453_v4 }
 0x483   : > { %v4715_v8 = vmul.f32 %v4691_v6, %v10407_v13 }
 0x484   : > { %v4718_v60 = vmul.f32 %v4694_v57, %v10413_v17 }
 0x485   : > { %v4739_v42 = vadd.f32 %v4715_v8, %v10407_v13 }
 0x486   : > { %v4742_v47 = vadd.f32 %v4718_v60, %v10413_v17  ;;  %v8554_v60 = vld [vmem:[%s9450_s16 + $0x5d8] sm:$0xff]  }
 0x487   : > { %7969 = vmatpush3.bf16.xpose.msra.mxu0 %v8539_v0  ;;  %v4673_v0 = vmul.f32 0.044715, %v10418_v45 }
 0x488   : > { %7989 = vmatpush3.bf16.xpose.msra.mxu1 %v8540_v59  ;;  %7970 = vmatprep.subr.bf16.mxu0 %v9060_v29  ;;  %v4676_v59 = vmul.f32 0.044715, %v10423_v18  ;;  %v4766_v39 = vmul.f32 0.7978846, %v4742_v47  ;;  %v4593_v47 = vmul.f32 %v8735_v43, %v10482_v37 }
 0x489   : > { %7990 = vmatprep.subr.bf16.mxu1 %v9060_v29  ;;  %v4697_v53 = vmul.f32 %v4673_v0, %v10418_v45 }
 0x48b   : > { %v4721_v25 = vmul.f32 %v4697_v53, %v10418_v45  ;;  %v6232_v53 = vld [vmem:[%s9500_s21] sm:$0xff] }
 0x48c   : > { %6237 = vperm.xlu1 %8346, %v6232_v53  }
 0x48f   : > { %7971 = vmatpush3.bf16.xpose.msra.mxu0 %v8541_v22  ;;  %v4679_v22 = vmul.f32 0.044715, %v10431_v10 }
 0x490   : > { %7991 = vmatpush3.bf16.xpose.msra.mxu1 %v8542_v55  ;;  %7996 = vmatprep.subr.bf16.mxu0 %v9060_v29  ;;  %v4700_v55 = vmul.f32 %v4676_v59, %v10423_v18 }
 0x491   : > { %8016 = vmatprep.subr.bf16.mxu1 %v9060_v29  ;;  %v4703_v52 = vmul.f32 %v4679_v22, %v10431_v10  ;;  %v8553_v22 = vld [vmem:[%s9450_s16 + $0x598] sm:$0xff]  }
 0x492   : > { %v4724_v36 = vmul.f32 %v4700_v55, %v10423_v18  ;;  %v6276_v55 = vld [vmem:[%s9505_s23 + $0x10] sm:$0xff] }
 0x493   : > { %v4727_v27 = vmul.f32 %v4703_v52, %v10431_v10  ;;  %6289 = vperm.xlu0 %8345, %v6276_v55   ;;  %v4754_v52 = vadd.f32 %v4730_v15, %v10446_v41  ;;  %v8555_v55 = vld [vmem:[%s9450_s16 + $0x5a0] sm:$0xff]  }
 0x495   : > { %v4751_v46 = vadd.f32 %v4727_v27, %v10431_v10 }
 0x496   : > { %7973 = vmatmul.mubr.bf16.vlgmr.msra.gmra.mrb[40].mxu0 %v1666_v28  ;;  %v4745_v28 = vadd.f32 %v4721_v25, %v10418_v45 }
 0x497   : > { %7993 = vmatmul.mubr.bf16.vlgmr.msra.gmra.mrb[40].mxu1 %v1667_v32  ;;  %7997 = vmatpush3.bf16.xpose.msra.mxu0 %v8547_v34  ;;  %v4748_v32 = vadd.f32 %v4724_v36, %v10423_v18  ;;  %v4760_v34 = vmul.f32 0.7978846, %v4736_v7  ;;  %v10503_v36 = vmul.f32 0.7978846, %v4751_v46  ;;  %v4374_v7 = vrot.slane %v4366_v48, %v9643_v62  ;;  %v8736_v48 = vld [vmem:[#allocation2 + $0x20] sm:$0xff] }
 0x498   : > { %8017 = vmatpush3.bf16.xpose.msra.mxu1 %v8548_v14  ;;  %7998 = vmatprep.subr.bf16.mxu0 %v9060_v29  ;;  %v4763_v14 = vmul.f32 0.7978846, %v4739_v42  ;;  %v10488_v59 = vmul.f32 0.7978846, %v4745_v28  ;;  %v4390_v42 = vrot.slane %v4382_v50, %v9643_v62 }
 0x499   : > { %8018 = vmatprep.subr.bf16.mxu1 %v9060_v29  ;;  %8012 = vmatprep.mubr.msk.bf16.mxu0 %vm9061_vm3, %v9060_v29  ;;  %8567 = vtanh.f32 %v4760_v34  ;;  %v6234_v34 = vld [vmem:[%s9500_s21 + $0x10] sm:$0xff] }
 0x49a   : > { %8032 = vmatprep.mubr.msk.bf16.mxu1 %vm9061_vm3, %v9060_v29  ;;  %8569 = vtanh.f32 %v4763_v14  ;;  %v4596_v14 = vmul.f32 %v8736_v48, %v10482_v37  ;;  %6247 = vperm.xlu1 %8346, %v6234_v34  }
 0x49b   : > { %8571 = vtanh.f32 %v4766_v39 }
 0x49c   : > { %8573 = vtanh.f32 %v10488_v59 }
 0x49f   : > { %7999 = vmatpush3.bf16.xpose.msra.mxu0 %v8549_v3  ;;  %v10490_v3 = vmul.f32 0.7978846, %v4748_v32 }
 0x4a0   : > { %8019 = vmatpush3.bf16.xpose.msra.mxu1 %v8550_v5  ;;  %8000 = vmatprep.subr.bf16.mxu0 %v9060_v29 }
 0x4a1   : > { %8020 = vmatprep.subr.bf16.mxu1 %v9060_v29  ;;  %8575 = vtanh.f32 %v10490_v3 }
 0x4a2   : > { %8577 = vtanh.f32 %v10503_v36 }
 0x4a7   : > { %8001 = vmatpush3.bf16.xpose.msra.mxu0 %v8551_v35  ;;  %v10506_v35 = vadd.f32 %v4733_v38, %v10453_v4 }
 0x4a8   : > { %8021 = vmatpush3.bf16.xpose.msra.mxu1 %v8552_v12  ;;  %8002 = vmatprep.subr.bf16.mxu0 %v9060_v29  ;;  %v4381_v12 = vrot.slane %v4367_v49, %v9643_v62  ;;  %v8738_v49 = vld [vmem:[#allocation2 + $0x50] sm:$0xff] }
 0x4a9   : > { %v3368_v16 = vpop.f32.mrb[28].mxu0  ;;  %8022 = vmatprep.subr.bf16.mxu1 %v9060_v29  ;;  %v4602_v15 = vmul.f32 %v8738_v49, %v10482_v37  ;;  %v4781_v48 = vmul.f32 0.7978846, %v10506_v35 }
 0x4aa   : > { %v4334_v40 = vcombine.low %v10358_v58, %v3368_v16  ;;  %v4335_v56 = vcombine.high %v10358_v58, %v3368_v16  ;;  %v3456_v1 = vpop.f32.mrb[28].mxu1  ;;  %v7854_v0 = vpop.f32.mrb[29].mxu0 }
 0x4ab   : > { %v4350_v31 = vcombine.low %v10361_v21, %v3456_v1  ;;  %v4351_v5 = vcombine.high %v10361_v21, %v3456_v1  ;;  %v7874_v6 = vpop.f32.mrb[29].mxu1  ;;  %v3371_v57 = vpop.f32.mrb[30].mxu0  ;;  %v8740_v1 = vld [vmem:[#allocation2 + $0x80] sm:$0xff] }
 0x4ac   : > { %v4342_v11 = vrot.slane %v4334_v40, %v9634_v54  ;;  %v4349_v58 = vrot.slane %v4335_v56, %v9634_v54  ;;  %v3459_v8 = vpop.f32.mrb[30].mxu1  ;;  %v7855_v9 = vpop.f32.mrb[31].mxu0  ;;  %v4397_v40 = vrot.slane %v4383_v51, %v9643_v62  ;;  %v8739_v56 = vld [vmem:[#allocation2 + $0x68] sm:$0xff]  ;;  %v4608_v0 = vmul.f32 %v8740_v1, %v10482_v37 }
 0x4ad   : > { %v4358_v21 = vrot.slane %v4350_v31, %v9634_v54  ;;  %v4365_v26 = vrot.slane %v4351_v5, %v9634_v54  ;;  %v7875_v25 = vpop.f32.mrb[31].mxu1  ;;  %v4605_v39 = vmul.f32 %v8739_v56, %v10482_v37  ;;  %v8741_v31 = vld [vmem:[#allocation2 + $0x98] sm:$0xff]  ;;  %v8556_v8 = vld [vmem:[%s9450_s16 + $0x5e0] sm:$0xff]   ;;  %v10541_v9 = vpop.eup %8567 }
 0x4ae   : > { %v4611_v5 = vmul.f32 %v8741_v31, %v10482_v37 }
 0x4af   : > { %v4398_v27 = vcombine.low %v4342_v11, %v4358_v21  ;;  %v4399_v2 = vcombine.high %v4342_v11, %v4358_v21  ;;  %v4414_v28 = vcombine.low %v4349_v58, %v4365_v26  ;;  %v4415_v32 = vcombine.high %v4349_v58, %v4365_v26  ;;  %8003 = vmatpush3.bf16.xpose.msra.mxu0 %v8553_v22  ;;  %v6275_v11 = vld [vmem:[%s9505_s23 + $0x8] sm:$0xff] }
 0x4b0   : > { %8023 = vmatpush3.bf16.xpose.msra.mxu1 %v8554_v60  ;;  %8004 = vmatprep.subr.bf16.mxu0 %v9060_v29 }
 0x4b1   : > { %v4406_v50 = vrot.slane %v4398_v27, %v9643_v62  ;;  %v4413_v16 = vrot.slane %v4399_v2, %v9643_v62  ;;  %v4422_v46 = vrot.slane %v4414_v28, %v9643_v62  ;;  %v4429_v38 = vrot.slane %v4415_v32, %v9643_v62  ;;  %8024 = vmatprep.subr.bf16.mxu1 %v9060_v29  ;;  %v8742_v27 = vld [vmem:[#allocation2 + $0xb0] sm:$0xff] }
 0x4b2   : > { %6284 = vperm.xlu1 %8346, %v6275_v11  }
 0x4b3   : > { %v4430_v6 = vcombine.low %v4374_v7, %v4406_v50  ;;  %v4431_v57 = vcombine.high %v4374_v7, %v4406_v50  ;;  %v4432_v22 = vcombine.low %v4381_v12, %v4413_v16  ;;  %v4433_v53 = vcombine.high %v4381_v12, %v4413_v16  ;;  %v10551_v7 = vpop.eup %8569 }
 0x4b4   : > { %v4434_v58 = vcombine.low %v4390_v42, %v4422_v46  ;;  %v4435_v20 = vcombine.high %v4390_v42, %v4422_v46  ;;  %v4436_v24 = vcombine.low %v4397_v40, %v4429_v38  ;;  %v4437_v51 = vcombine.high %v4397_v40, %v4429_v38  ;;  %v8558_v38 = vld [vmem:[%s9450_s16 + $0x5e8] sm:$0xff]  }
 0x4b5   : > { %v10543_v60 = vadd.f32 %v4593_v47, %v4430_v6  ;;  %v10545_v21 = vadd.f32 %v4596_v14, %v4431_v57  ;;  %v10547_v26 = vadd.f32 %v4599_v23, %v4432_v22  ;;  %v10549_v25 = vadd.f32 %v4602_v15, %v4433_v53  ;;  %v8572_v14 = vpop.eup %8571  ;;  %v8557_v15 = vld [vmem:[%s9450_s16 + $0x5a8] sm:$0xff]  }
 0x4b6   : > { %v10553_v12 = vadd.f32 %v4605_v39, %v4434_v58  ;;  %v10555_v43 = vadd.f32 %v4608_v0, %v4435_v20  ;;  %v4778_v42 = vmul.f32 0.7978846, %v4754_v52  ;;  %v4614_v47 = vmul.f32 %v8742_v27, %v10482_v37  ;;  %v8574_v20 = vpop.eup %8573 }
 0x4b7   : > { %8005 = vmatpush3.bf16.xpose.msra.mxu0 %v8555_v55  ;;  %v4665_v2 = vmul.f32 0.044715, %v10543_v60  ;;  %v4668_v28 = vmul.f32 0.044715, %v10545_v21  ;;  %v10562_v32 = vadd.f32 %v4611_v5, %v4436_v24  ;;  %v4671_v34 = vmul.f32 0.044715, %v10547_v26  ;;  %v8576_v27 = vpop.eup %8575 }
 0x4b8   : > { %8025 = vmatpush3.bf16.xpose.msra.mxu1 %v8556_v8  ;;  %8006 = vmatprep.subr.bf16.mxu0 %v9060_v29  ;;  %v4674_v59 = vmul.f32 0.044715, %v10549_v25  ;;  %v4677_v3 = vmul.f32 0.044715, %v10553_v12  ;;  %v4680_v49 = vmul.f32 0.044715, %v10555_v43  ;;  %8579 = vtanh.f32 %v4778_v42 }
 0x4b9   : > { %8026 = vmatprep.subr.bf16.mxu1 %v9060_v29  ;;  %v4689_v37 = vmul.f32 %v4665_v2, %v10543_v60  ;;  %v4692_v52 = vmul.f32 %v4668_v28, %v10545_v21  ;;  %v4695_v19 = vmul.f32 %v4671_v34, %v10547_v26  ;;  %v10576_v36 = vadd.f32 %v4614_v47, %v4437_v51  ;;  %v8578_v28 = vpop.eup %8577 }
 0x4ba   : > { %v4698_v23 = vmul.f32 %v4674_v59, %v10549_v25  ;;  %v4701_v46 = vmul.f32 %v4677_v3, %v10553_v12  ;;  %v4704_v56 = vmul.f32 %v4680_v49, %v10555_v43  ;;  %v4683_v39 = vmul.f32 0.044715, %v10562_v32 }
 0x4bb   : > { %v4713_v50 = vmul.f32 %v4689_v37, %v10543_v60  ;;  %v4716_v16 = vmul.f32 %v4692_v52, %v10545_v21  ;;  %v4719_v35 = vmul.f32 %v4695_v19, %v10547_v26  ;;  %8581 = vtanh.f32 %v4781_v48  ;;  %v8559_v37 = vld [vmem:[%s9450_s16 + $0x5b0] sm:$0xff]  }
 0x4bc   : > { %v4722_v40 = vmul.f32 %v4698_v23, %v10549_v25  ;;  %v4725_v31 = vmul.f32 %v4701_v46, %v10553_v12  ;;  %v4728_v57 = vmul.f32 %v4704_v56, %v10555_v43  ;;  %v4707_v22 = vmul.f32 %v4683_v39, %v10562_v32  ;;  %v8560_v48 = vld [vmem:[%s9450_s16 + $0x5f0] sm:$0xff]  }
 0x4bd   : > { %v4737_v1 = vadd.f32 %v4713_v50, %v10543_v60  ;;  %v4740_v0 = vadd.f32 %v4716_v16, %v10545_v21  ;;  %v4743_v5 = vadd.f32 %v4719_v35, %v10547_v26  ;;  %v4686_v58 = vmul.f32 0.044715, %v10576_v36 }
 0x4be   : > { %v4746_v6 = vadd.f32 %v4722_v40, %v10549_v25  ;;  %v4749_v11 = vadd.f32 %v4725_v31, %v10553_v12  ;;  %v4752_v8 = vadd.f32 %v4728_v57, %v10555_v43  ;;  %v4731_v42 = vmul.f32 %v4707_v22, %v10562_v32  ;;  %v8561_v31 = vld [vmem:[%s9450_s16 + $0x5b8] sm:$0xff]  }
 0x4bf   : > { %8007 = vmatpush3.bf16.xpose.msra.mxu0 %v8557_v15  ;;  %v4761_v53 = vmul.f32 0.7978846, %v4737_v1  ;;  %v4764_v55 = vmul.f32 0.7978846, %v4740_v0  ;;  %v4767_v24 = vmul.f32 0.7978846, %v4743_v5  ;;  %v4710_v2 = vmul.f32 %v4686_v58, %v10576_v36 }
 0x4c0   : > { %8027 = vmatpush3.bf16.xpose.msra.mxu1 %v8558_v38  ;;  %8008 = vmatprep.subr.bf16.mxu0 %v9060_v29  ;;  %v4770_v51 = vmul.f32 0.7978846, %v4746_v6  ;;  %v4773_v47 = vmul.f32 0.7978846, %v4749_v11  ;;  %v4776_v34 = vmul.f32 0.7978846, %v4752_v8  ;;  %v4755_v59 = vadd.f32 %v4731_v42, %v10562_v32 }
 0x4c1   : > { %8028 = vmatprep.subr.bf16.mxu1 %v9060_v29  ;;  %8583 = vtanh.f32 %v4761_v53  ;;  %v4734_v52 = vmul.f32 %v4710_v2, %v10576_v36  ;;  %v4808_v49 = vadd.f32 1.0, %v10541_v9  ;;  %v4811_v50 = vadd.f32 1.0, %v10551_v7  ;;  %v8562_v22 = vld [vmem:[%s9450_s16 + $0x5f8] sm:$0xff]  }
 0x4c2   : > { %8585 = vtanh.f32 %v4764_v55  ;;  %v8580_v3 = vpop.eup %8579  ;;  %v4779_v19 = vmul.f32 0.7978846, %v4755_v59  ;;  %v4814_v16 = vadd.f32 1.0, %v8572_v14  ;;  %v4640_v38 = vmul.f32 0.5, %v10401_v30 }
 0x4c3   : > { %8587 = vtanh.f32 %v4767_v24  ;;  %v4758_v23 = vadd.f32 %v4734_v52, %v10576_v36  ;;  %v4817_v35 = vadd.f32 1.0, %v8574_v20  ;;  %v4820_v40 = vadd.f32 1.0, %v8576_v27 }
 0x4c4   : > { %8589 = vtanh.f32 %v4770_v51  ;;  %v4643_v9 = vmul.f32 0.5, %v10407_v13  ;;  %v4646_v56 = vmul.f32 0.5, %v10413_v17  ;;  %v4823_v39 = vadd.f32 1.0, %v8578_v28 }
 0x4c5   : > { %8591 = vtanh.f32 %v4773_v47  ;;  %v8582_v15 = vpop.eup %8581  ;;  %v4782_v46 = vmul.f32 0.7978846, %v4758_v23  ;;  %v4649_v7 = vmul.f32 0.5, %v10418_v45  ;;  %v4652_v14 = vmul.f32 0.5, %v10423_v18 }
 0x4c6   : > { %8593 = vtanh.f32 %v4776_v34  ;;  %v4655_v1 = vmul.f32 0.5, %v10431_v10  ;;  %v4658_v0 = vmul.f32 0.5, %v10446_v41  ;;  %v4832_v5 = vmul.f32 %v4808_v49, %v4640_v38 }
 0x4c7   : > { %8009 = vmatpush3.bf16.xpose.msra.mxu0 %v8559_v37  ;;  %8595 = vtanh.f32 %v4779_v19  ;;  %v4835_v6 = vmul.f32 %v4811_v50, %v4643_v9  ;;  %v4661_v57 = vmul.f32 0.5, %v10453_v4  ;;  %v4641_v17 = vmul.f32 0.5, %v10543_v60 }
 0x4c8   : > { %8029 = vmatpush3.bf16.xpose.msra.mxu1 %v8560_v48  ;;  %8010 = vmatprep.subr.bf16.mxu0 %v9060_v29  ;;  %8597 = vtanh.f32 %v4782_v46  ;;  %v4841_v55 = vmul.f32 %v4817_v35, %v4649_v7  ;;  %v4844_v45 = vmul.f32 %v4820_v40, %v4652_v14  ;;  %v4644_v18 = vmul.f32 0.5, %v10545_v21 }
 0x4c9   : > { %8030 = vmatprep.subr.bf16.mxu1 %v9060_v29  ;;  %v4838_v29 = vmul.f32 %v4814_v16, %v4646_v56  ;;  %v4847_v58 = vmul.f32 %v4823_v39, %v4655_v1  ;;  %v4826_v41 = vadd.f32 1.0, %v8580_v3  ;;  %v4647_v51 = vmul.f32 0.5, %v10547_v26 }
 0x4ca   : > { %v4829_v42 = vadd.f32 1.0, %v8582_v15  ;;  %v1668_v60 = vpack.c.bf16 %v10341_v61, %v10341_v61  ;;  %v4650_v47 = vmul.f32 0.5, %v10549_v25  ;;  %v4653_v59 = vmul.f32 0.5, %v10553_v12 }
 0x4cb   : > { %v8584_v30 = vpop.eup %8583  ;;  %v4656_v48 = vmul.f32 0.5, %v10555_v43  ;;  %v4659_v23 = vmul.f32 0.5, %v10562_v32  ;;  %v1669_v12 = vpack.c.bf16 %v10343_v63, %v10343_v63  ;;  %v4850_v46 = vmul.f32 %v4826_v41, %v4658_v0 }
 0x4cc   : > { %v8586_v13 = vpop.eup %8585  ;;  %v4809_v53 = vadd.f32 1.0, %v8584_v30  ;;  %v4662_v35 = vmul.f32 0.5, %v10576_v36  ;;  %v4853_v56 = vmul.f32 %v4829_v42, %v4661_v57 }
 0x4cd   : > { %v8588_v11 = vpop.eup %8587  ;;  %v4812_v10 = vadd.f32 1.0, %v8586_v13 }
 0x4ce   : > { %v8590_v20 = vpop.eup %8589  ;;  %v4833_v24 = vmul.f32 %v4809_v53, %v4641_v17  ;;  %v4815_v8 = vadd.f32 1.0, %v8588_v11 }
 0x4cf   : > { %v8592_v4 = vpop.eup %8591  ;;  %8011 = vmatpush3.bf16.xpose.msra.mxu0 %v8561_v31  ;;  %v4836_v27 = vmul.f32 %v4812_v10, %v4644_v18  ;;  %v4818_v2 = vadd.f32 1.0, %v8590_v20 }
 0x4d0   : > { %v8594_v28 = vpop.eup %8593  ;;  %8031 = vmatpush3.bf16.xpose.msra.mxu1 %v8562_v22  ;;  %v10626_v21 = vpack.c.bf16 %v4833_v24, %v4832_v5  ;;  %v4839_v34 = vmul.f32 %v4815_v8, %v4647_v51  ;;  %v4821_v37 = vadd.f32 1.0, %v8592_v4 }
 0x4d1   : > { %v8596_v26 = vpop.eup %8595  ;;  %v10629_v52 = vpack.c.bf16 %v4836_v27, %v4835_v6  ;;  %v4842_v3 = vmul.f32 %v4818_v2, %v4650_v47  ;;  %v4824_v19 = vadd.f32 1.0, %v8594_v28  ;;  %v10657_v27 = vld [vmem:[%s9457_s17] sm:$0xff]  }
 0x4d2   : > { %8036 = vmatprep.subr.bf16.mxu0 %v10626_v21  ;;  %v10633_v61 = vpack.c.bf16 %v4839_v34, %v4838_v29  ;;  %v4845_v25 = vmul.f32 %v4821_v37, %v4653_v59  ;;  %v4827_v49 = vadd.f32 1.0, %v8596_v26  ;;  %v8598_v15 = vpop.eup %8597 }
 0x4d3   : > { %8044 = vmatprep.subr.bf16.mxu1 %v10629_v52  ;;  %v10639_v50 = vpack.c.bf16 %v4842_v3, %v4841_v55  ;;  %v4848_v16 = vmul.f32 %v4824_v19, %v4656_v48  ;;  %v4830_v40 = vadd.f32 1.0, %v8598_v15 }
 0x4d4   : > { %v10641_v43 = vpack.c.bf16 %v4845_v25, %v4844_v45  ;;  %v4851_v38 = vmul.f32 %v4827_v49, %v4659_v23 }
 0x4d5   : > { %v10644_v9 = vpack.c.bf16 %v4848_v16, %v4847_v58  ;;  %v4854_v39 = vmul.f32 %v4830_v40, %v4662_v35 }
 0x4d6   : > { %8013 = vmatmul.mubr.bf16.vlgmr.msra.gmra.mrb[44].mxu0 %v1668_v60  ;;  %v10646_v32 = vpack.c.bf16 %v4851_v38, %v4850_v46 }
 0x4d7   : > { %8033 = vmatmul.mubr.bf16.vlgmr.msra.gmra.mrb[44].mxu1 %v1669_v12  ;;  %8037 = vmatpush3.bf16.msra.mxu0 %v10626_v21  ;;  %v10650_v63 = vpack.c.bf16 %v4854_v39, %v4853_v56 }
 0x4d8   : > { %8045 = vmatpush3.bf16.msra.mxu1 %v10629_v52  ;;  %8040 = vmatprep.mubr.msk.bf16.mxu0 %vm4886_vm4, %v10657_v27 }
 0x4d9   : > { %8048 = vmatprep.mubr.msk.bf16.mxu1 %vm4886_vm4, %v10657_v27 }
 0x4e9   : > { %v3544_v7 = vpop.f32.mrb[32].mxu0 }
 0x4ea   : > { %v3632_v14 = vpop.f32.mrb[32].mxu1  ;;  %v7894_v1 = vpop.f32.mrb[33].mxu0 }
 0x4eb   : > { %v7914_v0 = vpop.f32.mrb[33].mxu1  ;;  %v3547_v36 = vpop.f32.mrb[34].mxu0 }
 0x4ec   : > { %v3635_v30 = vpop.f32.mrb[34].mxu1  ;;  %v7895_v31 = vpop.f32.mrb[35].mxu0 }
 0x4ed   : > { %v7915_v5 = vpop.f32.mrb[35].mxu1  ;;  %v4590_v36 = vpop.permute.xlu1 %4589 }
 0x529   : > { %v3720_v6 = vpop.f32.mrb[36].mxu0 }
 0x52a   : > { %v4438_v29 = vcombine.low %v3544_v7, %v3720_v6  ;;  %v4439_v13 = vcombine.high %v3544_v7, %v3720_v6  ;;  %v3808_v57 = vpop.f32.mrb[36].mxu1  ;;  %v7934_v22 = vpop.f32.mrb[37].mxu0 }
 0x52b   : > { %v4454_v17 = vcombine.low %v3632_v14, %v3808_v57  ;;  %v4455_v53 = vcombine.high %v3632_v14, %v3808_v57  ;;  %v7954_v55 = vpop.f32.mrb[37].mxu1  ;;  %v3723_v45 = vpop.f32.mrb[38].mxu0  ;;  %v10673_v57 = vld [vmem:[#allocation2 + $0x28] sm:$0xff]  ;;  %v10676_v22 = vld [vmem:[#allocation2 + $0x40] sm:$0xff] }
 0x52c   : > { %v4446_v11 = vrot.slane %v4438_v29, %v9634_v54  ;;  %v4453_v18 = vrot.slane %v4439_v13, %v9634_v54  ;;  %v3811_v10 = vpop.f32.mrb[38].mxu1  ;;  %v7935_v58 = vpop.f32.mrb[39].mxu0  ;;  %v10670_v29 = vld [vmem:[#allocation2 + $0x10] sm:$0xff] }
 0x52d   : > { %v4462_v41 = vrot.slane %v4454_v17, %v9634_v54  ;;  %v4469_v20 = vrot.slane %v4455_v53, %v9634_v54  ;;  %v7955_v24 = vpop.f32.mrb[39].mxu1  ;;  %v4594_v13 = vmul.f32 %v10670_v29, %v4590_v36  ;;  %v4600_v17 = vmul.f32 %v10676_v22, %v4590_v36  ;;  %v10679_v53 = vld [vmem:[#allocation2 + $0x58] sm:$0xff] }
 0x52e   : > { %v4603_v55 = vmul.f32 %v10679_v53, %v4590_v36  ;;  %v8748_v24 = vld [vmem:[#allocation2 + $0x88] sm:$0xff] }
 0x52f   : > { %v4502_v51 = vcombine.low %v4446_v11, %v4462_v41  ;;  %v4503_v8 = vcombine.high %v4446_v11, %v4462_v41  ;;  %v4518_v42 = vcombine.low %v4453_v18, %v4469_v20  ;;  %v4519_v4 = vcombine.high %v4453_v18, %v4469_v20  ;;  %v8747_v41 = vld [vmem:[#allocation2 + $0x70] sm:$0xff] }
 0x530   : > { %v4606_v20 = vmul.f32 %v8747_v41, %v4590_v36 }
 0x531   : > { %v4510_v14 = vrot.slane %v4502_v51, %v9643_v62  ;;  %v4517_v1 = vrot.slane %v4503_v8, %v9643_v62  ;;  %v4526_v0 = vrot.slane %v4518_v42, %v9643_v62  ;;  %v4533_v58 = vrot.slane %v4519_v4, %v9643_v62  ;;  %v8749_v8 = vld [vmem:[#allocation2 + $0xa0] sm:$0xff] }
 0x532   : > { %v4609_v51 = vmul.f32 %v8748_v24, %v4590_v36  ;;  %v4612_v42 = vmul.f32 %v8749_v8, %v4590_v36 }
 0x569   : > { %v3896_v60 = vpop.f32.mrb[40].mxu0 }
 0x56a   : > { %v3984_v47 = vpop.f32.mrb[40].mxu1  ;;  %v7974_v2 = vpop.f32.mrb[41].mxu0 }
 0x56b   : > { %v7994_v28 = vpop.f32.mrb[41].mxu1  ;;  %v3899_v34 = vpop.f32.mrb[42].mxu0 }
 0x56c   : > { %v3987_v59 = vpop.f32.mrb[42].mxu1  ;;  %v7975_v37 = vpop.f32.mrb[43].mxu0 }
 0x56d   : > { %v7995_v26 = vpop.f32.mrb[43].mxu1 }
 0x5a9   : > { %v4072_v3 = vpop.f32.mrb[44].mxu0 }
 0x5aa   : > { %v4470_v48 = vcombine.low %v3896_v60, %v4072_v3  ;;  %v4471_v19 = vcombine.high %v3896_v60, %v4072_v3  ;;  %v4160_v25 = vpop.f32.mrb[44].mxu1  ;;  %v8014_v23 = vpop.f32.mrb[45].mxu0 }
 0x5ab   : > { %v4486_v49 = vcombine.low %v3984_v47, %v4160_v25  ;;  %v4487_v15 = vcombine.high %v3984_v47, %v4160_v25  ;;  %v8034_v12 = vpop.f32.mrb[45].mxu1  ;;  %v4075_v16 = vpop.f32.mrb[46].mxu0  ;;  %v8750_v23 = vld [vmem:[#allocation2 + $0xb8] sm:$0xff] }
 0x5ac   : > { %v4478_v46 = vrot.slane %v4470_v48, %v9634_v54  ;;  %v4485_v38 = vrot.slane %v4471_v19, %v9634_v54  ;;  %v4163_v35 = vpop.f32.mrb[46].mxu1  ;;  %v8015_v40 = vpop.f32.mrb[47].mxu0 }
 0x5ad   : > { %v4494_v56 = vrot.slane %v4486_v49, %v9634_v54  ;;  %v4501_v39 = vrot.slane %v4487_v15, %v9634_v54  ;;  %v8035_v7 = vpop.f32.mrb[47].mxu1  ;;  %v4597_v54 = vmul.f32 %v10673_v57, %v4590_v36  ;;  %v4615_v49 = vmul.f32 %v8750_v23, %v4590_v36 }
 0x5af   : > { %v4534_v30 = vcombine.low %v4478_v46, %v4494_v56  ;;  %v4535_v31 = vcombine.high %v4478_v46, %v4494_v56  ;;  %v4550_v5 = vcombine.low %v4485_v38, %v4501_v39  ;;  %v4551_v6 = vcombine.high %v4485_v38, %v4501_v39 }
 0x5b1   : > { %v4542_v45 = vrot.slane %v4534_v30, %v9643_v62  ;;  %v4549_v11 = vrot.slane %v4535_v31, %v9643_v62  ;;  %v4558_v18 = vrot.slane %v4550_v5, %v9643_v62  ;;  %v4565_v10 = vrot.slane %v4551_v6, %v9643_v62 }
 0x5b3   : > { %v4566_v60 = vcombine.low %v4510_v14, %v4542_v45  ;;  %v4567_v47 = vcombine.high %v4510_v14, %v4542_v45  ;;  %v4568_v2 = vcombine.low %v4517_v1, %v4549_v11  ;;  %v4569_v28 = vcombine.high %v4517_v1, %v4549_v11 }
 0x5b4   : > { %v4570_v34 = vcombine.low %v4526_v0, %v4558_v18  ;;  %v4571_v59 = vcombine.high %v4526_v0, %v4558_v18  ;;  %v4572_v37 = vcombine.low %v4533_v58, %v4565_v10  ;;  %v4573_v26 = vcombine.high %v4533_v58, %v4565_v10 }
 0x5b5   : > { %v4618_v3 = vadd.f32 %v4594_v13, %v4566_v60  ;;  %v4621_v48 = vadd.f32 %v4597_v54, %v4567_v47  ;;  %v10687_v19 = vadd.f32 %v4600_v17, %v4568_v2  ;;  %v10689_v25 = vadd.f32 %v4603_v55, %v4569_v28 }
 0x5b6   : > { %v10691_v62 = vadd.f32 %v4606_v20, %v4570_v34  ;;  %v10693_v4 = vadd.f32 %v4609_v51, %v4571_v59  ;;  %v10697_v38 = vadd.f32 %v4612_v42, %v4572_v37  ;;  %v10703_v1 = vadd.f32 %v4615_v49, %v4573_v26 }
 0x5b7   : > { %v4666_v15 = vmul.f32 0.044715, %v4618_v3  ;;  %v4669_v12 = vmul.f32 0.044715, %v4621_v48  ;;  %v4672_v16 = vmul.f32 0.044715, %v10687_v19 }
 0x5b8   : > { %v4675_v46 = vmul.f32 0.044715, %v10689_v25  ;;  %v4678_v56 = vmul.f32 0.044715, %v10691_v62  ;;  %v4681_v14 = vmul.f32 0.044715, %v10693_v4 }
 0x5b9   : > { %v4690_v35 = vmul.f32 %v4666_v15, %v4618_v3  ;;  %v4693_v40 = vmul.f32 %v4669_v12, %v4621_v48  ;;  %v4696_v39 = vmul.f32 %v4672_v16, %v10687_v19  ;;  %v4684_v55 = vmul.f32 0.044715, %v10697_v38 }
 0x5ba   : > { %v4699_v7 = vmul.f32 %v4675_v46, %v10689_v25  ;;  %v4702_v30 = vmul.f32 %v4678_v56, %v10691_v62  ;;  %v4705_v6 = vmul.f32 %v4681_v14, %v10693_v4  ;;  %v4687_v41 = vmul.f32 0.044715, %v10703_v1 }
 0x5bb   : > { %v4714_v0 = vmul.f32 %v4690_v35, %v4618_v3  ;;  %v4717_v36 = vmul.f32 %v4693_v40, %v4621_v48  ;;  %v4720_v31 = vmul.f32 %v4696_v39, %v10687_v19  ;;  %v4708_v8 = vmul.f32 %v4684_v55, %v10697_v38 }
 0x5bc   : > { %v4723_v5 = vmul.f32 %v4699_v7, %v10689_v25  ;;  %v4726_v17 = vmul.f32 %v4702_v30, %v10691_v62  ;;  %v4729_v18 = vmul.f32 %v4705_v6, %v10693_v4  ;;  %v4711_v60 = vmul.f32 %v4687_v41, %v10703_v1 }
 0x5bd   : > { %v4738_v13 = vadd.f32 %v4714_v0, %v4618_v3  ;;  %v4741_v54 = vadd.f32 %v4717_v36, %v4621_v48  ;;  %v4744_v45 = vadd.f32 %v4720_v31, %v10687_v19  ;;  %v4732_v2 = vmul.f32 %v4708_v8, %v10697_v38 }
 0x5be   : > { %v4747_v11 = vadd.f32 %v4723_v5, %v10689_v25  ;;  %v4750_v51 = vadd.f32 %v4726_v17, %v10691_v62  ;;  %v4753_v42 = vadd.f32 %v4729_v18, %v10693_v4  ;;  %v4735_v34 = vmul.f32 %v4711_v60, %v10703_v1  ;;  %v10736_v5 = vld [vmem:[%s9457_s17 + $0x8] ss:$0 sps:$4 sm:$0xff]  }
 0x5bf   : > { %v4762_v10 = vmul.f32 0.7978846, %v4738_v13  ;;  %v4765_v58 = vmul.f32 0.7978846, %v4741_v54  ;;  %v4768_v20 = vmul.f32 0.7978846, %v4744_v45  ;;  %v4756_v59 = vadd.f32 %v4732_v2, %v10697_v38 }
 0x5c0   : > { %v4771_v24 = vmul.f32 0.7978846, %v4747_v11  ;;  %v4774_v47 = vmul.f32 0.7978846, %v4750_v51  ;;  %v4777_v28 = vmul.f32 0.7978846, %v4753_v42  ;;  %v4759_v37 = vadd.f32 %v4735_v34, %v10703_v1 }
 0x5c1   : > { %8599 = vtanh.f32 %v4762_v10  ;;  %v4642_v49 = vmul.f32 0.5, %v4618_v3  ;;  %v4645_v16 = vmul.f32 0.5, %v4621_v48  ;;  %v4780_v35 = vmul.f32 0.7978846, %v4756_v59 }
 0x5c2   : > { %8601 = vtanh.f32 %v4765_v58  ;;  %v4783_v7 = vmul.f32 0.7978846, %v4759_v37  ;;  %v4648_v30 = vmul.f32 0.5, %v10687_v19  ;;  %v4651_v3 = vmul.f32 0.5, %v10689_v25 }
 0x5c3   : > { %8603 = vtanh.f32 %v4768_v20  ;;  %v4654_v18 = vmul.f32 0.5, %v10691_v62  ;;  %v4657_v10 = vmul.f32 0.5, %v10693_v4  ;;  %v4663_v2 = vmul.f32 0.5, %v10703_v1 }
 0x5c4   : > { %8605 = vtanh.f32 %v4771_v24 }
 0x5c5   : > { %8607 = vtanh.f32 %v4774_v47  ;;  %v4660_v47 = vmul.f32 0.5, %v10697_v38 }
 0x5c6   : > { %8609 = vtanh.f32 %v4777_v28 }
 0x5c7   : > { %8611 = vtanh.f32 %v4780_v35 }
 0x5c8   : > { %8613 = vtanh.f32 %v4783_v7 }
 0x5cb   : > { %v8600_v26 = vpop.eup %8599 }
 0x5cc   : > { %v8602_v23 = vpop.eup %8601  ;;  %v4810_v15 = vadd.f32 1.0, %v8600_v26 }
 0x5cd   : > { %v8604_v12 = vpop.eup %8603  ;;  %v4813_v46 = vadd.f32 1.0, %v8602_v23 }
 0x5ce   : > { %v8606_v40 = vpop.eup %8605  ;;  %v4834_v56 = vmul.f32 %v4810_v15, %v4642_v49  ;;  %v4816_v39 = vadd.f32 1.0, %v8604_v12  ;;  %v8565_v49 = vld [vmem:[%s9463_s22] sm:$0xff]  }
 0x5cf   : > { %v4837_v14 = vmul.f32 %v4813_v46, %v4645_v16  ;;  %v4819_v0 = vadd.f32 1.0, %v8606_v40  ;;  %v8608_v13 = vpop.eup %8607 }
 0x5d0   : > { %v10723_v36 = vpack.c.bf16 %v4834_v56, %v4834_v56  ;;  %v4840_v6 = vmul.f32 %v4816_v39, %v4648_v30  ;;  %v8610_v54 = vpop.eup %8609  ;;  %v4822_v55 = vadd.f32 1.0, %v8608_v13 }
 0x5d1   : > { %v10726_v31 = vpack.c.bf16 %v4837_v14, %v4837_v14  ;;  %v4843_v25 = vmul.f32 %v4819_v0, %v4651_v3  ;;  %v4825_v11 = vadd.f32 1.0, %v8610_v54  ;;  %v8612_v20 = vpop.eup %8611 }
 0x5d2   : > { %8172 = vmatprep.subr.msk.bf16.mxu0 %vm4893_vm5, %v10723_v36  ;;  %v10733_v48 = vsel %vm4893_vm5, %v10723_v36, 0  ;;  %v10750_v17 = vpack.c.bf16 %v4840_v6, %v4840_v6  ;;  %v4846_v41 = vmul.f32 %v4822_v55, %v4654_v18  ;;  %v8614_v51 = vpop.eup %8613  ;;  %v4828_v8 = vadd.f32 1.0, %v8612_v20 }
 0x5d3   : > { %8173 = vmatprep.subr.msk.bf16.mxu1 %vm4893_vm5, %v10726_v31  ;;  %8039 = vmatpush3.bf16.msra.mxu0 %v10733_v48  ;;  %v10743_v19 = vsel %vm4893_vm5, %v10726_v31, 0  ;;  %v10755_v45 = vpack.c.bf16 %v4843_v25, %v4843_v25  ;;  %v4849_v24 = vmul.f32 %v4825_v11, %v4657_v10  ;;  %v4831_v60 = vadd.f32 1.0, %v8614_v51  ;;  %v10926_v11 = vpop.permute.xlu0 %5752 }
 0x5d4   : > { %8047 = vmatpush3.bf16.msra.mxu1 %v10743_v19  ;;  %8052 = vmatprep.subr.bf16.mxu0 %v10633_v61  ;;  %v10768_v58 = vsel %vm4893_vm5, %v10750_v17, 0  ;;  %v10782_v4 = vpack.c.bf16 %v4846_v41, %v4846_v41  ;;  %v4852_v34 = vmul.f32 %v4828_v8, %v4660_v47 }
 0x5d5   : > { %8060 = vmatprep.subr.bf16.mxu1 %v10639_v50  ;;  %v10775_v62 = vsel %vm4893_vm5, %v10755_v45, 0  ;;  %v10787_v42 = vpack.c.bf16 %v4849_v24, %v4849_v24  ;;  %v4855_v38 = vmul.f32 %v4831_v60, %v4663_v2 }
 0x5d6   : > { %8041 = vmatmul.mubr.msk.bf16.vlgmr.msra.gmra.mrb[48].mxu0 %vm4886_vm4, %v10736_v5  ;;  %v5099_v28 = vsel %vm4893_vm5, %v10782_v4, 0  ;;  %v4869_v1 = vpack.c.bf16 %v4852_v34, %v4852_v34 }
 0x5d7   : > { %8049 = vmatmul.mubr.msk.bf16.vlgmr.msra.gmra.mrb[48].mxu1 %vm4886_vm4, %v10736_v5  ;;  %8053 = vmatpush3.bf16.msra.mxu0 %v10633_v61  ;;  %v5150_v59 = vsel %vm4893_vm5, %v10787_v42, 0  ;;  %v4871_v37 = vpack.c.bf16 %v4855_v38, %v4855_v38 }
 0x5d8   : > { %8061 = vmatpush3.bf16.msra.mxu1 %v10639_v50  ;;  %8174 = vmatprep.subr.msk.bf16.mxu0 %vm4893_vm5, %v10750_v17  ;;  %v5201_v26 = vsel %vm4893_vm5, %v4869_v1, 0 }
 0x5d9   : > { %8175 = vmatprep.subr.msk.bf16.mxu1 %vm4893_vm5, %v10755_v45  ;;  %8056 = vmatprep.mubr.msk.bf16.mxu0 %vm4886_vm4, %v10657_v27  ;;  %v5252_v23 = vsel %vm4893_vm5, %v4871_v37, 0 }
 0x5da   : > { %8064 = vmatprep.mubr.msk.bf16.mxu1 %vm4886_vm4, %v10657_v27 }
 0x5db   : > { %8055 = vmatpush3.bf16.msra.mxu0 %v10768_v58 }
 0x5dc   : > { %8063 = vmatpush3.bf16.msra.mxu1 %v10775_v62  ;;  %8068 = vmatprep.subr.bf16.mxu0 %v10641_v43 }
 0x5dd   : > { %8076 = vmatprep.subr.bf16.mxu1 %v10644_v9 }
 0x5de   : > { %8057 = vmatmul.mubr.msk.bf16.vlgmr.msra.gmra.mrb[52].mxu0 %vm4886_vm4, %v10736_v5 }
 0x5df   : > { %8065 = vmatmul.mubr.msk.bf16.vlgmr.msra.gmra.mrb[52].mxu1 %vm4886_vm4, %v10736_v5  ;;  %8069 = vmatpush3.bf16.msra.mxu0 %v10641_v43 }
 0x5e0   : > { %8077 = vmatpush3.bf16.msra.mxu1 %v10644_v9  ;;  %8176 = vmatprep.subr.msk.bf16.mxu0 %vm4893_vm5, %v10782_v4 }
 0x5e1   : > { %8177 = vmatprep.subr.msk.bf16.mxu1 %vm4893_vm5, %v10787_v42  ;;  %8072 = vmatprep.mubr.msk.bf16.mxu0 %vm4886_vm4, %v10657_v27 }
 0x5e2   : > { %8080 = vmatprep.mubr.msk.bf16.mxu1 %vm4886_vm4, %v10657_v27 }
 0x5e3   : > { %8071 = vmatpush3.bf16.msra.mxu0 %v5099_v28 }
 0x5e4   : > { %8079 = vmatpush3.bf16.msra.mxu1 %v5150_v59  ;;  %8084 = vmatprep.subr.bf16.mxu0 %v10646_v32 }
 0x5e5   : > { %8092 = vmatprep.subr.bf16.mxu1 %v10650_v63 }
 0x5e6   : > { %8073 = vmatmul.mubr.msk.bf16.vlgmr.msra.gmra.mrb[56].mxu0 %vm4886_vm4, %v10736_v5 }
 0x5e7   : > { %8081 = vmatmul.mubr.msk.bf16.vlgmr.msra.gmra.mrb[56].mxu1 %vm4886_vm4, %v10736_v5  ;;  %8085 = vmatpush3.bf16.msra.mxu0 %v10646_v32 }
 0x5e8   : > { %8093 = vmatpush3.bf16.msra.mxu1 %v10650_v63  ;;  %8178 = vmatprep.subr.msk.bf16.mxu0 %vm4893_vm5, %v4869_v1 }
 0x5e9   : > { %8179 = vmatprep.subr.msk.bf16.mxu1 %vm4893_vm5, %v4871_v37  ;;  %8088 = vmatprep.mubr.msk.bf16.mxu0 %vm4886_vm4, %v10657_v27 }
 0x5ea   : > { %8096 = vmatprep.mubr.msk.bf16.mxu1 %vm4886_vm4, %v10657_v27  ;;  %v8566_v27 = vld [vmem:[%s9463_s22 + $0x8] ss:$0 sps:$4 sm:$0xff]  }
 0x5eb   : > { %8087 = vmatpush3.bf16.msra.mxu0 %v5201_v26 }
 0x5ec   : > { %8095 = vmatpush3.bf16.msra.mxu1 %v5252_v23  ;;  %8100 = vmatprep.subr.bf16.mxu0 %v10626_v21 }
 0x5ed   : > { %8108 = vmatprep.subr.bf16.mxu1 %v10629_v52 }
 0x5ee   : > { %8089 = vmatmul.mubr.msk.bf16.vlgmr.msra.gmra.mrb[60].mxu0 %vm4886_vm4, %v10736_v5 }
 0x5ef   : > { %8097 = vmatmul.mubr.msk.bf16.vlgmr.msra.gmra.mrb[60].mxu1 %vm4886_vm4, %v10736_v5  ;;  %8101 = vmatpush3.bf16.msra.mxu0 %v10626_v21  ;;  %v10912_v5 = vpop.permute.xlu1 %5747 }
 0x5f0   : > { %8109 = vmatpush3.bf16.msra.mxu1 %v10629_v52  ;;  %8180 = vmatprep.subr.msk.bf16.mxu0 %vm4893_vm5, %v10723_v36 }
 0x5f1   : > { %8181 = vmatprep.subr.msk.bf16.mxu1 %vm4893_vm5, %v10726_v31  ;;  %8104 = vmatprep.mubr.msk.bf16.mxu0 %vm4886_vm4, %v8565_v49 }
 0x5f2   : > { %8112 = vmatprep.mubr.msk.bf16.mxu1 %vm4886_vm4, %v8565_v49 }
 0x5f3   : > { %8103 = vmatpush3.bf16.msra.mxu0 %v10733_v48  ;;  %v10928_v18 = vpop.permute.xlu1 %5757 }
 0x5f4   : > { %8111 = vmatpush3.bf16.msra.mxu1 %v10743_v19  ;;  %8116 = vmatprep.subr.bf16.mxu0 %v10633_v61 }
 0x5f5   : > { %8124 = vmatprep.subr.bf16.mxu1 %v10639_v50 }
 0x5f6   : > { %8105 = vmatmul.mubr.msk.bf16.vlgmr.msra.gmra.mrb[64].mxu0 %vm4886_vm4, %v8566_v27 }
 0x5f7   : > { %8113 = vmatmul.mubr.msk.bf16.vlgmr.msra.gmra.mrb[64].mxu1 %vm4886_vm4, %v8566_v27  ;;  %8117 = vmatpush3.bf16.msra.mxu0 %v10633_v61 }
 0x5f8   : > { %8125 = vmatpush3.bf16.msra.mxu1 %v10639_v50  ;;  %8182 = vmatprep.subr.msk.bf16.mxu0 %vm4893_vm5, %v10750_v17 }
 0x5f9   : > { %8183 = vmatprep.subr.msk.bf16.mxu1 %vm4893_vm5, %v10755_v45  ;;  %8120 = vmatprep.mubr.msk.bf16.mxu0 %vm4886_vm4, %v8565_v49 }
 0x5fa   : > { %8128 = vmatprep.mubr.msk.bf16.mxu1 %vm4886_vm4, %v8565_v49 }
 0x5fb   : > { %8119 = vmatpush3.bf16.msra.mxu0 %v10768_v58 }
 0x5fc   : > { %8127 = vmatpush3.bf16.msra.mxu1 %v10775_v62  ;;  %8132 = vmatprep.subr.bf16.mxu0 %v10641_v43 }
 0x5fd   : > { %8140 = vmatprep.subr.bf16.mxu1 %v10644_v9 }
 0x5fe   : > { %8121 = vmatmul.mubr.msk.bf16.vlgmr.msra.gmra.mrb[68].mxu0 %vm4886_vm4, %v8566_v27 }
 0x5ff   : > { %8129 = vmatmul.mubr.msk.bf16.vlgmr.msra.gmra.mrb[68].mxu1 %vm4886_vm4, %v8566_v27  ;;  %8133 = vmatpush3.bf16.msra.mxu0 %v10641_v43 }
 0x600   : > { %8141 = vmatpush3.bf16.msra.mxu1 %v10644_v9  ;;  %8184 = vmatprep.subr.msk.bf16.mxu0 %vm4893_vm5, %v10782_v4 }
 0x601   : > { %8185 = vmatprep.subr.msk.bf16.mxu1 %vm4893_vm5, %v10787_v42  ;;  %8136 = vmatprep.mubr.msk.bf16.mxu0 %vm4886_vm4, %v8565_v49 }
 0x602   : > { %8144 = vmatprep.mubr.msk.bf16.mxu1 %vm4886_vm4, %v8565_v49 }
 0x603   : > { %8135 = vmatpush3.bf16.msra.mxu0 %v5099_v28 }
 0x604   : > { %8143 = vmatpush3.bf16.msra.mxu1 %v5150_v59  ;;  %8148 = vmatprep.subr.bf16.mxu0 %v10646_v32 }
 0x605   : > { %8156 = vmatprep.subr.bf16.mxu1 %v10650_v63 }
 0x606   : > { %8137 = vmatmul.mubr.msk.bf16.vlgmr.msra.gmra.mrb[72].mxu0 %vm4886_vm4, %v8566_v27 }
 0x607   : > { %8145 = vmatmul.mubr.msk.bf16.vlgmr.msra.gmra.mrb[72].mxu1 %vm4886_vm4, %v8566_v27  ;;  %8149 = vmatpush3.bf16.msra.mxu0 %v10646_v32 }
 0x608   : > { %8157 = vmatpush3.bf16.msra.mxu1 %v10650_v63  ;;  %8186 = vmatprep.subr.msk.bf16.mxu0 %vm4893_vm5, %v4869_v1 }
 0x609   : > { %8187 = vmatprep.subr.msk.bf16.mxu1 %vm4893_vm5, %v4871_v37  ;;  %8152 = vmatprep.mubr.msk.bf16.mxu0 %vm4886_vm4, %v8565_v49 }
 0x60a   : > { %8160 = vmatprep.mubr.msk.bf16.mxu1 %vm4886_vm4, %v8565_v49 }
 0x60b   : > { %8151 = vmatpush3.bf16.msra.mxu0 %v5201_v26 }
 0x60c   : > { %8159 = vmatpush3.bf16.msra.mxu1 %v5252_v23  ;;  %v10936_v23 = vpop.permute.xlu0 %5705 }
 0x60e   : > { %8153 = vmatmul.mubr.msk.bf16.vlgmr.msra.gmra.mrb[76].mxu0 %vm4886_vm4, %v8566_v27 }
 0x60f   : > { %8161 = vmatmul.mubr.msk.bf16.vlgmr.msra.gmra.mrb[76].mxu1 %vm4886_vm4, %v8566_v27 }
 0x6a9   : > { %v10876_v21 = vpop.f32.mrb[48].mxu0 }
 0x6aa   : > { %v10878_v52 = vpop.f32.mrb[48].mxu1  ;;  %v10880_v61 = vpop.f32.mrb[49].mxu0 }
 0x6ab   : > { %v10882_v50 = vpop.f32.mrb[49].mxu1  ;;  %v8043_v43 = vpop.f32.mrb[50].mxu0 }
 0x6ac   : > { %v8051_v9 = vpop.f32.mrb[50].mxu1  ;;  %v10884_v32 = vpop.f32.mrb[51].mxu0 }
 0x6ad   : > { %v10886_v63 = vpop.f32.mrb[51].mxu1 }
 0x6b1   : > { %v10888_v15 = vpop.f32.mrb[52].mxu0 }
 0x6b2   : > { %v10890_v12 = vpop.f32.mrb[52].mxu1  ;;  %v10892_v16 = vpop.f32.mrb[53].mxu0 }
 0x6b3   : > { %v10894_v46 = vpop.f32.mrb[53].mxu1  ;;  %v8059_v35 = vpop.f32.mrb[54].mxu0 }
 0x6b4   : > { %v8067_v40 = vpop.f32.mrb[54].mxu1  ;;  %v10896_v56 = vpop.f32.mrb[55].mxu0 }
 0x6b5   : > { %v10898_v39 = vpop.f32.mrb[55].mxu1 }
 0x6b9   : > { %v10900_v7 = vpop.f32.mrb[56].mxu0 }
 0x6ba   : > { %v10902_v14 = vpop.f32.mrb[56].mxu1  ;;  %v10904_v0 = vpop.f32.mrb[57].mxu0 }
 0x6bb   : > { %v10906_v36 = vpop.f32.mrb[57].mxu1  ;;  %v8075_v30 = vpop.f32.mrb[58].mxu0 }
 0x6bc   : > { %v8083_v31 = vpop.f32.mrb[58].mxu1  ;;  %v10908_v3 = vpop.f32.mrb[59].mxu0 }
 0x6bd   : > { %v10910_v48 = vpop.f32.mrb[59].mxu1 }
 0x6c1   : > { %v10914_v6 = vpop.f32.mrb[60].mxu0 }
 0x6c2   : > { %v10916_v13 = vpop.f32.mrb[60].mxu1  ;;  %v10918_v19 = vpop.f32.mrb[61].mxu0 }
 0x6c3   : > { %v10920_v25 = vpop.f32.mrb[61].mxu1  ;;  %v8091_v54 = vpop.f32.mrb[62].mxu0 }
 0x6c4   : > { %v8099_v17 = vpop.f32.mrb[62].mxu1  ;;  %v10922_v55 = vpop.f32.mrb[63].mxu0 }
 0x6c5   : > { %v10924_v45 = vpop.f32.mrb[63].mxu1 }
 0x6c9   : > { %v8106_v10 = vpop.f32.mrb[64].mxu0 }
 0x6ca   : > { %v5762_v58 = vadd.f32 %v8106_v10, %v10928_v18  ;;  %v8114_v41 = vpop.f32.mrb[64].mxu1  ;;  %v5350_v20 = vpop.f32.mrb[65].mxu0 }
 0x6cb   : > { %v5765_v62 = vadd.f32 %v8114_v41, %v10928_v18  ;;  %v5760_v24 = vadd.f32 %v10912_v5, %v5350_v20  ;;  %v5398_v51 = vpop.f32.mrb[65].mxu1  ;;  %v8107_v4 = vpop.f32.mrb[66].mxu0 }
 0x6cc   : > { %v7170_v8 = vmul.f32 -1.442695, %v5762_v58  ;;  %v5763_v42 = vadd.f32 %v10912_v5, %v5398_v51  ;;  %v8115_v60 = vpop.f32.mrb[66].mxu1  ;;  %v5353_v47 = vpop.f32.mrb[67].mxu0 }
 0x6cd   : > { %v7173_v2 = vmul.f32 -1.442695, %v5765_v62  ;;  %v7168_v28 = vmul.f32 -1.442695, %v5760_v24  ;;  %v5761_v34 = vadd.f32 %v10926_v11, %v5353_v47  ;;  %v5401_v59 = vpop.f32.mrb[67].mxu1  ;;  %v10943_v60 = vpop.permute.xlu0 %5715 }
 0x6ce   : > { %8615 = vpow2.f32 %v7170_v8  ;;  %v7171_v38 = vmul.f32 -1.442695, %v5763_v42  ;;  %v5764_v1 = vadd.f32 %v10926_v11, %v5401_v59 }
 0x6cf   : > { %8617 = vpow2.f32 %v7173_v2  ;;  %v7169_v37 = vmul.f32 -1.442695, %v5761_v34 }
 0x6d0   : > { %8619 = vpow2.f32 %v7168_v28  ;;  %v7172_v26 = vmul.f32 -1.442695, %v5764_v1 }
 0x6d1   : > { %8621 = vpow2.f32 %v7171_v38  ;;  %v8122_v49 = vpop.f32.mrb[68].mxu0 }
 0x6d2   : > { %8623 = vpow2.f32 %v7169_v37  ;;  %v5768_v27 = vadd.f32 %v8122_v49, %v10928_v18  ;;  %v8130_v43 = vpop.f32.mrb[68].mxu1  ;;  %v5446_v9 = vpop.f32.mrb[69].mxu0  ;;  %v10949_v49 = vadd.f32 %v10876_v21, %v10943_v60 }
 0x6d3   : > { %8625 = vpow2.f32 %v7172_v26  ;;  %v5771_v35 = vadd.f32 %v8130_v43, %v10928_v18  ;;  %v5766_v40 = vadd.f32 %v10912_v5, %v5446_v9  ;;  %v5494_v30 = vpop.f32.mrb[69].mxu1  ;;  %v8123_v31 = vpop.f32.mrb[70].mxu0 }
 0x6d4   : > { %v7176_v54 = vmul.f32 -1.442695, %v5768_v27  ;;  %v5769_v17 = vadd.f32 %v10912_v5, %v5494_v30  ;;  %v8131_v10 = vpop.f32.mrb[70].mxu1  ;;  %v5449_v58 = vpop.f32.mrb[71].mxu0  ;;  %v10957_v30 = vadd.f32 %v10936_v23, %v10880_v61 }
 0x6d5   : > { %v7179_v41 = vmul.f32 -1.442695, %v5771_v35  ;;  %v7174_v20 = vmul.f32 -1.442695, %v5766_v40  ;;  %v5767_v62 = vadd.f32 %v10926_v11, %v5449_v58  ;;  %v5497_v24 = vpop.f32.mrb[71].mxu1  ;;  %v10953_v40 = vadd.f32 %v10878_v52, %v10943_v60  ;;  %v10959_v21 = vpop.permute.xlu1 %5710 }
 0x6d6   : > { %8627 = vpow2.f32 %v7176_v54  ;;  %v7177_v51 = vmul.f32 -1.442695, %v5769_v17  ;;  %v5770_v2 = vadd.f32 %v10926_v11, %v5497_v24  ;;  %v10963_v58 = vadd.f32 %v10936_v23, %v10882_v50 }
 0x6d7   : > { %8629 = vpow2.f32 %v7179_v41  ;;  %v7175_v4 = vmul.f32 -1.442695, %v5767_v62  ;;  %v10967_v62 = vadd.f32 %v10959_v21, %v10884_v32  ;;  %v10984_v32 = vadd.f32 %v10936_v23, %v10892_v16 }
 0x6d8   : > { %v8616_v8 = vpop.eup %8615  ;;  %8631 = vpow2.f32 %v7174_v20  ;;  %v7178_v20 = vmul.f32 -1.442695, %v5770_v2 }
 0x6d9   : > { %v8618_v42 = vpop.eup %8617  ;;  %v5858_v47 = vadd.f32 1.0, %v8616_v8  ;;  %8633 = vpow2.f32 %v7177_v51  ;;  %v8138_v28 = vpop.f32.mrb[72].mxu0  ;;  %v10971_v51 = vadd.f32 %v10959_v21, %v10886_v63 }
 0x6da   : > { %v8620_v34 = vpop.eup %8619  ;;  %v5861_v59 = vadd.f32 1.0, %v8618_v42  ;;  %8635 = vpow2.f32 %v7175_v4  ;;  %v5774_v38 = vadd.f32 %v8138_v28, %v10928_v18  ;;  %v8146_v1 = vpop.f32.mrb[72].mxu1  ;;  %v10975_v4 = vadd.f32 %v10888_v15, %v10943_v60 }
 0x6db   : > { %v5542_v37 = vpop.f32.mrb[73].mxu0  ;;  %v8622_v26 = vpop.eup %8621  ;;  %8637 = vrcp.f32 %v5858_v47  ;;  %v5856_v27 = vadd.f32 1.0, %v8620_v34  ;;  %v5777_v50 = vadd.f32 %v8146_v1, %v10928_v18  ;;  %v10980_v42 = vadd.f32 %v10890_v12, %v10943_v60 }
 0x6dc   : > { %v5590_v43 = vpop.f32.mrb[73].mxu1  ;;  %v8139_v9 = vpop.f32.mrb[74].mxu0  ;;  %8639 = vrcp.f32 %v5861_v59  ;;  %v5859_v31 = vadd.f32 1.0, %v8622_v26  ;;  %v7182_v24 = vmul.f32 -1.442695, %v5774_v38  ;;  %v5772_v63 = vadd.f32 %v10912_v5, %v5542_v37 }
 0x6dd   : > { %v8624_v35 = vpop.eup %8623  ;;  %v8147_v54 = vpop.f32.mrb[74].mxu1  ;;  %8641 = vrcp.f32 %v5856_v27  ;;  %v10989_v15 = vadd.f32 %v10936_v23, %v10894_v46  ;;  %v5775_v28 = vadd.f32 %v10912_v5, %v5590_v43  ;;  %v10994_v12 = vadd.f32 %v10959_v21, %v10896_v56 }
 0x6de   : > { %v5545_v17 = vpop.f32.mrb[75].mxu0  ;;  %v8626_v10 = vpop.eup %8625  ;;  %v5857_v41 = vadd.f32 1.0, %v8624_v35  ;;  %8643 = vrcp.f32 %v5859_v31  ;;  %v10999_v46 = vadd.f32 %v10959_v21, %v10898_v39  ;;  %v7185_v43 = vmul.f32 -1.442695, %v5777_v50 }
 0x6df   : > { %v5593_v52 = vpop.f32.mrb[75].mxu1  ;;  %v5860_v61 = vadd.f32 1.0, %v8626_v10  ;;  %v5773_v38 = vadd.f32 %v10926_v11, %v5545_v17  ;;  %v7180_v54 = vmul.f32 -1.442695, %v5772_v63 }
 0x6e0   : > { %8645 = vrcp.f32 %v5857_v41  ;;  %v8628_v8 = vpop.eup %8627  ;;  %v5776_v10 = vadd.f32 %v10926_v11, %v5593_v52 }
 0x6e1   : > { %8647 = vrcp.f32 %v5860_v61  ;;  %v8630_v47 = vpop.eup %8629  ;;  %v5864_v2 = vadd.f32 1.0, %v8628_v8  ;;  %v8154_v34 = vpop.f32.mrb[76].mxu0 }
 0x6e2   : > { %8649 = vpow2.f32 %v7178_v20  ;;  %v8632_v59 = vpop.eup %8631  ;;  %v5867_v16 = vadd.f32 1.0, %v8630_v47  ;;  %v8162_v1 = vpop.f32.mrb[76].mxu1  ;;  %v5780_v39 = vadd.f32 %v8154_v34, %v10928_v18  ;;  %v11014_v34 = vadd.f32 %v10900_v7, %v10943_v60 }
 0x6e3   : > { %8651 = vpow2.f32 %v7182_v24  ;;  %v5638_v37 = vpop.f32.mrb[77].mxu0  ;;  %v8634_v26 = vpop.eup %8633  ;;  %v5862_v27 = vadd.f32 1.0, %v8632_v59  ;;  %v7183_v24 = vmul.f32 -1.442695, %v5775_v28  ;;  %v5783_v63 = vadd.f32 %v8162_v1, %v10928_v18 }
 0x6e4   : > { %8653 = vrcp.f32 %v5864_v2  ;;  %v5686_v9 = vpop.f32.mrb[77].mxu1  ;;  %v8155_v35 = vpop.f32.mrb[78].mxu0  ;;  %v5865_v56 = vadd.f32 1.0, %v8634_v26  ;;  %v7181_v2 = vmul.f32 -1.442695, %v5773_v38  ;;  %v11019_v18 = vadd.f32 %v10902_v14, %v10943_v60 }
 0x6e5   : > { %v8636_v31 = vpop.eup %8635  ;;  %8655 = vrcp.f32 %v5867_v16  ;;  %v8163_v41 = vpop.f32.mrb[78].mxu1  ;;  %v5778_v16 = vadd.f32 %v10912_v5, %v5638_v37  ;;  %v5781_v26 = vadd.f32 %v10912_v5, %v5686_v9  ;;  %v7188_v1 = vmul.f32 -1.442695, %v5780_v39 }
 0x6e6   : > { %v11002_v17 = vpop.f32.mrb[79].mxu0  ;;  %v8638_v20 = vpop.eup %8637  ;;  %8657 = vrcp.f32 %v5862_v27  ;;  %v5863_v61 = vadd.f32 1.0, %v8636_v31  ;;  %v11024_v5 = vadd.f32 %v10936_v23, %v10904_v0 }
 0x6e7   : > { %v11005_v8 = vpop.f32.mrb[79].mxu1  ;;  %v8640_v50 = vpop.eup %8639  ;;  %v5930_v47 = vmul.f32 %v8638_v20, %v10949_v49  ;;  %8659 = vrcp.f32 %v5865_v56  ;;  %v7184_v49 = vmul.f32 -1.442695, %v5776_v10  ;;  %v7186_v35 = vmul.f32 -1.442695, %v5778_v16  ;;  %v8751_v56 = vld [vmem:[#allocation2] sm:$0xff] }
 0x6e8   : > { %v8642_v59 = vpop.eup %8641  ;;  %v5933_v52 = vmul.f32 %v8640_v50, %v10953_v40  ;;  %8661 = vrcp.f32 %v5863_v61  ;;  %v7189_v14 = vmul.f32 -1.442695, %v5781_v26  ;;  %v8753_v20 = vld [vmem:[#allocation2 + $0x18] sm:$0xff]  ;;  %v8754_v61 = vld [vmem:[#allocation2 + $0x20] sm:$0xff] }
 0x6e9   : > { %v8644_v28 = vpop.eup %8643  ;;  %v5928_v27 = vmul.f32 %v8642_v59, %v10957_v30  ;;  %8663 = vpow2.f32 %v7185_v43  ;;  %v7191_v30 = vmul.f32 -1.442695, %v5783_v63  ;;  %v11037_v50 = vadd.f32 %v10670_v29, %v5930_v47 }
 0x6ea   : > { %v8646_v38 = vpop.eup %8645  ;;  %v5931_v40 = vmul.f32 %v8644_v28, %v10963_v58  ;;  %8665 = vpow2.f32 %v7180_v54  ;;  %v8752_v54 = vld [vmem:[#allocation2 + $0x8] sm:$0xff]  ;;  %v11043_v16 = vadd.f32 %v10673_v57, %v5933_v52  ;;  %v11052_v29 = vadd.f32 %v10936_v23, %v10906_v36 }
 0x6eb   : > { %v8648_v37 = vpop.eup %8647  ;;  %v5929_v7 = vmul.f32 %v8646_v38, %v10967_v62  ;;  %8667 = vpow2.f32 %v7183_v24  ;;  %v11028_v58 = vadd.f32 %v8751_v56, %v5928_v27  ;;  %v11058_v57 = vadd.f32 %v10959_v21, %v10908_v3 }
 0x6ec   : > { %v8650_v43 = vpop.eup %8649  ;;  %v5932_v9 = vmul.f32 %v8648_v37, %v10971_v51  ;;  %8669 = vpow2.f32 %v7181_v2  ;;  %v11032_v62 = vadd.f32 %v8753_v20, %v5931_v40  ;;  %v11064_v36 = vadd.f32 %v10959_v21, %v10910_v48  ;;  %v8756_v48 = vld [vmem:[#allocation2 + $0x38] sm:$0xff] }
 0x6ed   : > { %v8652_v31 = vpop.eup %8651  ;;  %v11030_v10 = vadd.f32 %v8752_v54, %v5929_v7  ;;  %v5866_v41 = vadd.f32 1.0, %v8650_v43  ;;  %8671 = vpow2.f32 %v7184_v49  ;;  %v5779_v3 = vadd.f32 %v10926_v11, %v11002_v17 }
 0x6ee   : > { %v8654_v0 = vpop.eup %8653  ;;  %v11034_v24 = vadd.f32 %v8754_v61, %v5932_v9  ;;  %v5870_v51 = vadd.f32 1.0, %v8652_v31  ;;  %8673 = vpow2.f32 %v7188_v1  ;;  %v8755_v9 = vld [vmem:[#allocation2 + $0x30] sm:$0xff]  ;;  %v11082_v61 = vadd.f32 %v10914_v6, %v10943_v60 }
 0x6ef   : > { %v8656_v39 = vpop.eup %8655  ;;  %v5976_v2 = vadd.f32 %v11030_v10, %v11028_v58  ;;  %v5936_v63 = vmul.f32 %v8654_v0, %v10975_v4  ;;  %8675 = vrcp.f32 %v5866_v41 }
 0x6f0   : > { %v8658_v59 = vpop.eup %8657  ;;  %v5984_v26 = vadd.f32 %v11034_v24, %v11032_v62  ;;  %v11048_v28 = vmul.f32 %v8656_v39, %v10980_v42  ;;  %8677 = vrcp.f32 %v5870_v51 }
 0x6f1   : > { %v8660_v27 = vpop.eup %8659  ;;  %v5977_v47 = vadd.f32 %v5976_v2, %v11037_v50  ;;  %v5934_v4 = vmul.f32 %v8658_v59, %v10984_v32  ;;  %8679 = vpow2.f32 %v7191_v30  ;;  %v5782_v30 = vadd.f32 %v10926_v11, %v11005_v8 }
 0x6f2   : > { %v8662_v49 = vpop.eup %8661  ;;  %v5985_v52 = vadd.f32 %v5984_v26, %v11043_v16  ;;  %v5937_v42 = vmul.f32 %v8660_v27, %v10989_v15  ;;  %8681 = vpow2.f32 %v7186_v35  ;;  %v11076_v54 = vadd.f32 %v10676_v22, %v5936_v63 }
 0x6f3   : > { %v8664_v38 = vpop.eup %8663  ;;  %v5978_v40 = vrot.slane %v5977_v47, 4  ;;  %v5935_v1 = vmul.f32 %v8662_v49, %v10994_v12  ;;  %8683 = vpow2.f32 %v7189_v14  ;;  %v11071_v35 = vadd.f32 %v8755_v9, %v5934_v4 }
 0x6f4   : > { %v8666_v32 = vpop.eup %8665  ;;  %v5986_v37 = vrot.slane %v5985_v52, 4  ;;  %v5873_v7 = vadd.f32 1.0, %v8664_v38  ;;  %v7187_v4 = vmul.f32 -1.442695, %v5779_v3  ;;  %v7190_v49 = vmul.f32 -1.442695, %v5782_v30 }
 0x6f5   : > { %v8668_v15 = vpop.eup %8667  ;;  %v5979_v43 = vadd.f32 %v5978_v40, %v5977_v47  ;;  %v11073_v31 = vadd.f32 %v8756_v48, %v5935_v1  ;;  %v5868_v56 = vadd.f32 1.0, %v8666_v32  ;;  %v8757_v40 = vld [vmem:[#allocation2 + $0x48] sm:$0xff] }
 0x6f6   : > { %v8670_v12 = vpop.eup %8669  ;;  %v5987_v14 = vadd.f32 %v5986_v37, %v5985_v52  ;;  %8685 = vrcp.f32 %v5873_v7  ;;  %v5871_v41 = vadd.f32 1.0, %v8668_v15  ;;  %v11086_v6 = vadd.f32 %v8757_v40, %v5937_v42  ;;  %v8758_v15 = vld [vmem:[#allocation2 + $0x50] sm:$0xff] }
 0x6f7   : > { %v8672_v17 = vpop.eup %8671  ;;  %v5980_v0 = vrot.slane %v5979_v43, 2  ;;  %v5992_v11 = vadd.f32 %v11073_v31, %v11071_v35  ;;  %8687 = vrcp.f32 %v5868_v56  ;;  %v5869_v8 = vadd.f32 1.0, %v8670_v12 }
 0x6f8   : > { %v8674_v20 = vpop.eup %8673  ;;  %v5988_v51 = vrot.slane %v5987_v14, 2  ;;  %8689 = vrcp.f32 %v5871_v41  ;;  %v5872_v39 = vadd.f32 1.0, %v8672_v17  ;;  %v5741_v12 = vadd.f32 %v10916_v13, %v10943_v60 }
 0x6f9   : > { %v8676_v2 = vpop.eup %8675  ;;  %v5981_v22 = vadd.f32 %v5980_v0, %v5979_v43  ;;  %v5993_v63 = vadd.f32 %v5992_v11, %v11076_v54  ;;  %8691 = vrcp.f32 %v5869_v8  ;;  %v5876_v59 = vadd.f32 1.0, %v8674_v20 }
 0x6fa   : > { %v8678_v26 = vpop.eup %8677  ;;  %v5989_v27 = vadd.f32 %v5988_v51, %v5987_v14  ;;  %v5938_v47 = vmul.f32 %v8676_v2, %v10999_v46  ;;  %8693 = vrcp.f32 %v5872_v39  ;;  %v11093_v46 = vadd.f32 %v10679_v53, %v11048_v28 }
 0x6fb   : > { %v8680_v52 = vpop.eup %8679  ;;  %v5982_v38 = vrot.slane %v5981_v22, 1  ;;  %v5994_v1 = vrot.slane %v5993_v63, 4  ;;  %v5942_v32 = vmul.f32 %v8678_v26, %v11014_v34  ;;  %8695 = vrcp.f32 %v5876_v59 }
 0x6fc   : > { %v8682_v37 = vpop.eup %8681  ;;  %v5990_v7 = vrot.slane %v5989_v27, 1  ;;  %v11089_v43 = vadd.f32 %v8758_v15, %v5938_v47  ;;  %v5879_v9 = vadd.f32 1.0, %v8680_v52  ;;  %v11101_v0 = vadd.f32 %v10936_v23, %v10918_v19 }
 0x6fd   : > { %v8684_v48 = vpop.eup %8683  ;;  %v5983_v56 = vadd.f32 %v5982_v38, %v5981_v22  ;;  %v5995_v3 = vadd.f32 %v5994_v1, %v5993_v63  ;;  %v5874_v34 = vadd.f32 1.0, %v8682_v37 }
 0x6fe   : > { %v5991_v42 = vadd.f32 %v5990_v7, %v5989_v27  ;;  %v6000_v30 = vadd.f32 %v11089_v43, %v11086_v6  ;;  %8697 = vrcp.f32 %v5879_v9  ;;  %v5877_v41 = vadd.f32 1.0, %v8684_v48  ;;  %v8759_v7 = vld [vmem:[#allocation2 + $0x70] sm:$0xff] }
 0x6ff   : > { %v6040_v14 = vmul.f32 0.05, %v5983_v56  ;;  %8699 = vpow2.f32 %v7187_v4  ;;  %v5996_v60 = vrot.slane %v5995_v3, 2  ;;  %v11142_v15 = vadd.f32 %v8759_v7, %v5942_v32 }
 0x700   : > { %v8686_v17 = vpop.eup %8685  ;;  %v6041_v53 = vmul.f32 0.05, %v5991_v42  ;;  %v6001_v28 = vadd.f32 %v6000_v30, %v11093_v46  ;;  %8701 = vpow2.f32 %v7190_v49  ;;  %v8761_v42 = vld [vmem:[#allocation2 + $0x68] sm:$0xff] }
 0x701   : > { %v8688_v11 = vpop.eup %8687  ;;  %v11105_v8 = vsub.f32 %v11028_v58, %v6040_v14  ;;  %v11108_v20 = vsub.f32 %v11030_v10, %v6040_v14  ;;  %v11111_v13 = vsub.f32 %v11037_v50, %v6040_v14  ;;  %8703 = vrcp.f32 %v5874_v34 }
 0x702   : > { %v8690_v51 = vpop.eup %8689  ;;  %v11114_v39 = vsub.f32 %v11032_v62, %v6041_v53  ;;  %v11117_v19 = vsub.f32 %v11034_v24, %v6041_v53  ;;  %v11120_v2 = vsub.f32 %v11043_v16, %v6041_v53  ;;  %v11124_v10 = vadd.f32 %v10936_v23, %v10920_v25 }
 0x703   : > { %v8692_v58 = vpop.eup %8691  ;;  %v6072_v50 = vmul.f32 %v11105_v8, %v11105_v8  ;;  %v6073_v22 = vmul.f32 %v11108_v20, %v11108_v20  ;;  %8705 = vrcp.f32 %v5877_v41  ;;  %v6074_v62 = vmul.f32 %v11111_v13, %v11111_v13 }
 0x704   : > { %v6075_v24 = vmul.f32 %v11114_v39, %v11114_v39  ;;  %v6076_v16 = vmul.f32 %v11117_v19, %v11117_v19  ;;  %v6077_v25 = vmul.f32 %v11120_v2, %v11120_v2  ;;  %v5997_v63 = vadd.f32 %v5996_v60, %v5995_v3  ;;  %v8694_v27 = vpop.eup %8693  ;;  %v8760_v3 = vld [vmem:[#allocation2 + $0x60] sm:$0xff] }
 0x705   : > { %v6096_v23 = vadd.f32 %v6073_v22, %v6072_v50  ;;  %v6002_v59 = vrot.slane %v6001_v28, 4  ;;  %v5945_v26 = vmul.f32 %v8686_v17, %v11019_v18  ;;  %v5940_v4 = vmul.f32 %v8688_v11, %v11024_v5  ;;  %v8696_v38 = vpop.eup %8695 }
 0x706   : > { %v6104_v47 = vadd.f32 %v6076_v16, %v6075_v24  ;;  %v5943_v49 = vmul.f32 %v8690_v51, %v11052_v29  ;;  %v5941_v52 = vmul.f32 %v8692_v58, %v11058_v57  ;;  %v5998_v1 = vrot.slane %v5997_v63, 1  ;;  %v8762_v16 = vld [vmem:[#allocation2 + $0x80] sm:$0xff] }
 0x707   : > { %v6097_v40 = vadd.f32 %v6096_v23, %v6074_v62  ;;  %v6003_v37 = vadd.f32 %v6002_v59, %v6001_v28  ;;  %v6160_v48 = vmul.f32 %v6040_v14, %v6040_v14  ;;  %v11144_v18 = vadd.f32 %v8760_v3, %v5940_v4 }
 0x708   : > { %v8698_v9 = vpop.eup %8697  ;;  %v6105_v56 = vadd.f32 %v6104_v47, %v6077_v25  ;;  %v11146_v30 = vadd.f32 %v8761_v42, %v5941_v52  ;;  %v5999_v34 = vadd.f32 %v5998_v1, %v5997_v63  ;;  %v5944_v41 = vmul.f32 %v8694_v27, %v11064_v36  ;;  %v8763_v47 = vld [vmem:[#allocation2 + $0x88] sm:$0xff]  ;;  %v8764_v1 = vld [vmem:[#allocation2 + $0x78] sm:$0xff] }
 0x709   : > { %v8700_v5 = vpop.eup %8699  ;;  %v6098_v29 = vrot.slane %v6097_v40, 4  ;;  %v6004_v57 = vrot.slane %v6003_v37, 2  ;;  %v11152_v14 = vmul.f32 %v8696_v38, %v11082_v61  ;;  %v11154_v11 = vmul.f32 %v8698_v9, %v5741_v12 }
 0x70a   : > { %v8702_v17 = vpop.eup %8701  ;;  %v6106_v28 = vrot.slane %v6105_v56, 4  ;;  %v6008_v32 = vadd.f32 %v11146_v30, %v11144_v18  ;;  %v6161_v51 = vmul.f32 %v6041_v53, %v6041_v53  ;;  %v11156_v58 = vmul.f32 0.05, %v5999_v34 }
 0x70b   : > { %v6099_v60 = vadd.f32 %v6098_v29, %v6097_v40  ;;  %v6005_v50 = vadd.f32 %v6004_v57, %v6003_v37  ;;  %v8704_v22 = vpop.eup %8703  ;;  %v6168_v62 = vmul.f32 4.0, %v6160_v48  ;;  %v11159_v25 = vadd.f32 %v8762_v16, %v5944_v41 }
 0x70c   : > { %v6107_v24 = vadd.f32 %v6106_v28, %v6105_v56  ;;  %v6009_v36 = vadd.f32 %v6008_v32, %v11142_v15  ;;  %v11163_v61 = vsub.f32 %v11071_v35, %v11156_v58  ;;  %v11167_v12 = vsub.f32 %v11073_v31, %v11156_v58 }
 0x70d   : > { %v8706_v23 = vpop.eup %8705  ;;  %v6100_v63 = vrot.slane %v6099_v60, 2  ;;  %v11171_v53 = vsub.f32 %v11076_v54, %v11156_v58  ;;  %v6006_v27 = vrot.slane %v6005_v50, 1  ;;  %v11173_v4 = vadd.f32 %v8763_v47, %v5945_v26 }
 0x70e   : > { %v6108_v59 = vrot.slane %v6107_v24, 2  ;;  %v6010_v52 = vrot.slane %v6009_v36, 4  ;;  %v6078_v40 = vmul.f32 %v11163_v61, %v11163_v61  ;;  %v6079_v35 = vmul.f32 %v11167_v12, %v11167_v12 }
 0x70f   : > { %v6101_v38 = vadd.f32 %v6100_v63, %v6099_v60  ;;  %v11179_v31 = vadd.f32 %v8764_v1, %v5943_v49  ;;  %v6080_v54 = vmul.f32 %v11171_v53, %v11171_v53  ;;  %v6007_v7 = vadd.f32 %v6006_v27, %v6005_v50 }
 0x710   : > { %v6109_v37 = vadd.f32 %v6108_v59, %v6107_v24  ;;  %v6011_v9 = vadd.f32 %v6010_v52, %v6009_v36  ;;  %v6112_v26 = vadd.f32 %v6079_v35, %v6078_v40  ;;  %v11186_v3 = vmul.f32 %v8704_v22, %v11101_v0 }
 0x711   : > { %v6102_v48 = vrot.slane %v6101_v38, 1  ;;  %v6016_v56 = vadd.f32 %v11159_v25, %v11179_v31  ;;  %v6043_v29 = vmul.f32 0.05, %v6007_v7  ;;  %v11189_v49 = vmul.f32 %v8706_v23, %v11124_v10 }
 0x712   : > { %v6110_v42 = vrot.slane %v6109_v37, 1  ;;  %v6012_v34 = vrot.slane %v6011_v9, 2  ;;  %v6169_v41 = vmul.f32 4.0, %v6161_v51  ;;  %v6113_v28 = vadd.f32 %v6112_v26, %v6080_v54  ;;  %v11211_v26 = vpop.permute.xlu0 %6242 }
 0x713   : > { %v6103_v57 = vadd.f32 %v6102_v48, %v6101_v38  ;;  %v6017_v32 = vadd.f32 %v6016_v56, %v11173_v4  ;;  %v11193_v50 = vsub.f32 %v11086_v6, %v6043_v29  ;;  %v11196_v24 = vsub.f32 %v11089_v43, %v6043_v29  ;;  %v11213_v56 = vpop.permute.xlu1 %6237 }
 0x714   : > { %v6111_v60 = vadd.f32 %v6110_v42, %v6109_v37  ;;  %v11199_v0 = vsub.f32 %v11093_v46, %v6043_v29  ;;  %v6114_v36 = vrot.slane %v6113_v28, 4  ;;  %v6013_v16 = vadd.f32 %v6012_v34, %v6011_v9 }
 0x715   : > { %v6176_v22 = vsub.f32 %v6103_v57, %v6168_v62  ;;  %v5875_v10 = vadd.f32 1.0, %v8700_v5  ;;  %v6081_v51 = vmul.f32 %v11193_v50, %v11193_v50  ;;  %v6082_v63 = vmul.f32 %v11196_v24, %v11196_v24 }
 0x716   : > { %v6177_v23 = vsub.f32 %v6111_v60, %v6169_v41  ;;  %v5878_v59 = vadd.f32 1.0, %v8702_v17  ;;  %v6115_v27 = vadd.f32 %v6114_v36, %v6113_v28  ;;  %v6014_v47 = vrot.slane %v6013_v16, 1 }
 0x717   : > { %v6184_v6 = vmul.f32 0.05, %v6176_v22  ;;  %v6083_v46 = vmul.f32 %v11199_v0, %v11199_v0  ;;  %v6120_v52 = vadd.f32 %v6082_v63, %v6081_v51  ;;  %v6018_v62 = vrot.slane %v6017_v32, 4 }
 0x718   : > { %v6185_v43 = vmul.f32 0.05, %v6177_v23  ;;  %v6116_v40 = vrot.slane %v6115_v27, 2  ;;  %v6015_v5 = vadd.f32 %v6014_v47, %v6013_v16  ;;  %8707 = vrcp.f32 %v5875_v10  ;;  %v11237_v47 = vpop.permute.xlu1 %6247 }
 0x719   : > { %v6192_v38 = vadd.f32 1e-05, %v6184_v6  ;;  %v6121_v1 = vadd.f32 %v6120_v52, %v6083_v46  ;;  %v6019_v37 = vadd.f32 %v6018_v62, %v6017_v32  ;;  %8709 = vrcp.f32 %v5878_v59  ;;  %v8765_v52 = vld [vmem:[#allocation2 + $0x90] sm:$0xff] }
 0x71a   : > { %v6193_v35 = vadd.f32 1e-05, %v6185_v43  ;;  %v6117_v54 = vadd.f32 %v6116_v40, %v6115_v27  ;;  %v6162_v17 = vmul.f32 %v11156_v58, %v11156_v58  ;;  %v11209_v7 = vmul.f32 0.05, %v6015_v5  ;;  %v11235_v27 = vpop.permute.xlu0 %6279 }
 0x71b   : > { %8711 = vrsqrt.f32 %v6192_v38  ;;  %v6122_v9 = vrot.slane %v6121_v1, 4  ;;  %v6020_v48 = vrot.slane %v6019_v37, 2  ;;  %v6163_v16 = vmul.f32 %v6043_v29, %v6043_v29 }
 0x71c   : > { %8713 = vrsqrt.f32 %v6193_v35  ;;  %v6118_v42 = vrot.slane %v6117_v54, 1  ;;  %v11217_v34 = vsub.f32 %v11144_v18, %v11209_v7  ;;  %v11221_v57 = vsub.f32 %v11146_v30, %v11209_v7 }
 0x71d   : > { %v11225_v58 = vsub.f32 %v11142_v15, %v11209_v7  ;;  %v6123_v41 = vadd.f32 %v6122_v9, %v6121_v1  ;;  %v6021_v28 = vadd.f32 %v6020_v48, %v6019_v37  ;;  %v6170_v60 = vmul.f32 4.0, %v6162_v17 }
 0x71e   : > { %v6119_v32 = vadd.f32 %v6118_v42, %v6117_v54  ;;  %v6084_v22 = vmul.f32 %v11217_v34, %v11217_v34  ;;  %v6085_v36 = vmul.f32 %v11221_v57, %v11221_v57  ;;  %v5737_v15 = vadd.f32 %v10959_v21, %v10922_v55  ;;  %v8766_v55 = vld [vmem:[#allocation2 + $0xa8] sm:$0xff] }
 0x71f   : > { %v6124_v18 = vrot.slane %v6123_v41, 2  ;;  %v6022_v10 = vrot.slane %v6021_v28, 1  ;;  %v6086_v30 = vmul.f32 %v11225_v58, %v11225_v58  ;;  %v5740_v43 = vadd.f32 %v10959_v21, %v10924_v45 }
 0x720   : > { %v6178_v23 = vsub.f32 %v6119_v32, %v6170_v60  ;;  %v6128_v51 = vadd.f32 %v6085_v36, %v6084_v22  ;;  %v11242_v62 = vadd.f32 %v8765_v52, %v11186_v3  ;;  %v6171_v5 = vmul.f32 4.0, %v6163_v16 }
 0x721   : > { %v6125_v63 = vadd.f32 %v6124_v18, %v6123_v41  ;;  %v6023_v59 = vadd.f32 %v6022_v10, %v6021_v28  ;;  %v11245_v35 = vadd.f32 %v8766_v55, %v11189_v49 }
 0x722   : > { %v8708_v6 = vpop.eup %8707  ;;  %v6186_v29 = vmul.f32 0.05, %v6178_v23  ;;  %v6129_v46 = vadd.f32 %v6128_v51, %v6086_v30 }
 0x723   : > { %v8710_v38 = vpop.eup %8709  ;;  %v6126_v40 = vrot.slane %v6125_v63, 1  ;;  %v5947_v1 = vmul.f32 %v8708_v6, %v5737_v15  ;;  %v11247_v9 = vmul.f32 0.05, %v6023_v59 }
 0x724   : > { %v6194_v54 = vadd.f32 1e-05, %v6186_v29  ;;  %v6130_v17 = vrot.slane %v6129_v46, 4  ;;  %v5950_v45 = vmul.f32 %v8710_v38, %v5740_v43  ;;  %v6164_v38 = vmul.f32 %v11209_v7, %v11209_v7 }
 0x725   : > { %v8712_v37 = vpop.eup %8711  ;;  %v6127_v41 = vadd.f32 %v6126_v40, %v6125_v63  ;;  %v11288_v43 = vsub.f32 %v11179_v31, %v11247_v9  ;;  %v11292_v29 = vsub.f32 %v11159_v25, %v11247_v9  ;;  %v8767_v31 = vld [vmem:[#allocation2 + $0x98] sm:$0xff] }
 0x726   : > { %v8714_v21 = vpop.eup %8713  ;;  %v6208_v48 = vmul.f32 %v8712_v37, %v11105_v8  ;;  %v6209_v3 = vmul.f32 %v8712_v37, %v11108_v20  ;;  %v6210_v42 = vmul.f32 %v8712_v37, %v11111_v13  ;;  %8715 = vrsqrt.f32 %v6194_v54  ;;  %v11258_v8 = vpop.permute.xlu0 %6289  ;;  %v8769_v37 = vld [vmem:[#allocation2 + $0xa0] sm:$0xff] }
 0x727   : > { %v6211_v28 = vmul.f32 %v8714_v21, %v11114_v39  ;;  %v6212_v49 = vmul.f32 %v8714_v21, %v11117_v19  ;;  %v6213_v32 = vmul.f32 %v8714_v21, %v11120_v2  ;;  %v6179_v18 = vsub.f32 %v6127_v41, %v6171_v5  ;;  %v11260_v20 = vpop.permute.xlu1 %6284  ;;  %v8768_v5 = vld [vmem:[#allocation2 + $0xb0] sm:$0xff]  ;;  %v8770_v21 = vld [vmem:[#allocation2 + $0xb8] sm:$0xff] }
 0x728   : > { %v6250_v60 = vmul.f32 %v11213_v56, %v6208_v48  ;;  %v6251_v22 = vmul.f32 %v11211_v26, %v6209_v3  ;;  %v6252_v36 = vmul.f32 %v11237_v47, %v6210_v42  ;;  %v6131_v16 = vadd.f32 %v6130_v17, %v6129_v46 }
 0x729   : > { %v6253_v13 = vmul.f32 %v11213_v56, %v6211_v28  ;;  %v6254_v39 = vmul.f32 %v11211_v26, %v6212_v49  ;;  %v6255_v19 = vmul.f32 %v11237_v47, %v6213_v32  ;;  %v6187_v30 = vmul.f32 0.05, %v6179_v18 }
 0x72a   : > { %v11266_v2 = vadd.f32 %v11235_v27, %v6250_v60  ;;  %v11269_v10 = vadd.f32 %v11260_v20, %v6251_v22  ;;  %v11272_v23 = vadd.f32 %v11258_v8, %v6252_v36  ;;  %v6132_v59 = vrot.slane %v6131_v16, 2 }
 0x72b   : > { %v11275_v51 = vadd.f32 %v11235_v27, %v6253_v13  ;;  %v11278_v15 = vadd.f32 %v11260_v20, %v6254_v39  ;;  %v11281_v63 = vadd.f32 %v11258_v8, %v6255_v19  ;;  %v6195_v6 = vadd.f32 1e-05, %v6187_v30 }
 0x72c   : > { %6316 = vst [vmem:[#allocation2] sm:$0xff] %v11266_v2  ;;  %6317 = vst [vmem:[#allocation2 + $0x8] sm:$0xff] %v11269_v10  ;;  %v11296_v46 = vsub.f32 %v11173_v4, %v11247_v9  ;;  %v6133_v52 = vadd.f32 %v6132_v59, %v6131_v16  ;;  %v11303_v40 = vadd.f32 %v8767_v31, %v5947_v1  ;;  %v6172_v28 = vmul.f32 4.0, %v6164_v38 }
 0x72d   : > { %6318 = vst [vmem:[#allocation2 + $0x10] sm:$0xff] %v11272_v23  ;;  %6319 = vst [vmem:[#allocation2 + $0x18] sm:$0xff] %v11275_v51  ;;  %v11305_v25 = vadd.f32 %v8768_v5, %v5950_v45  ;;  %8717 = vrsqrt.f32 %v6195_v6  ;;  %v6087_v4 = vmul.f32 %v11288_v43, %v11288_v43  ;;  %v6088_v55 = vmul.f32 %v11292_v29, %v11292_v29 }
 0x72e   : > { %6320 = vst [vmem:[#allocation2 + $0x20] sm:$0xff] %v11278_v15  ;;  %6321 = vst [vmem:[#allocation2 + $0x28] sm:$0xff] %v11281_v63  ;;  %v11312_v54 = vadd.f32 %v8769_v37, %v11152_v14  ;;  %v6134_v17 = vrot.slane %v6133_v52, 1  ;;  %v11315_v7 = vadd.f32 %v8770_v21, %v11154_v11  ;;  %v6024_v1 = vadd.f32 %v11303_v40, %v11242_v62 }
 0x72f   : > { %v6032_v45 = vadd.f32 %v11305_v25, %v11245_v35  ;;  %v6089_v48 = vmul.f32 %v11296_v46, %v11296_v46  ;;  %v6136_v3 = vadd.f32 %v6088_v55, %v6087_v4  ;;  %6350 = vadd.xlane.f32.xlu1 (!%p7192_p6), %v11275_v51  ;;  %6344 = vadd.xlane.f32.xlu0 (!%p7192_p6), %v11266_v2 }
 0x730   : > { %v8716_v42 = vpop.eup %8715  ;;  %v6135_v41 = vadd.f32 %v6134_v17, %v6133_v52  ;;  %v6025_v14 = vadd.f32 %v6024_v1, %v11312_v54 }
 0x731   : > { %v6033_v49 = vadd.f32 %v6032_v45, %v11315_v7  ;;  %v6214_v11 = vmul.f32 %v8716_v42, %v11163_v61  ;;  %v6215_v32 = vmul.f32 %v8716_v42, %v11167_v12  ;;  %v6216_v60 = vmul.f32 %v8716_v42, %v11171_v53 }
 0x732   : > { %v6137_v22 = vadd.f32 %v6136_v3, %v6089_v48  ;;  %v6180_v36 = vsub.f32 %v6135_v41, %v6172_v28  ;;  %v6026_v18 = vrot.slane %v6025_v14, 4  ;;  %v6165_v48 = vmul.f32 %v11247_v9, %v11247_v9 }
 0x733   : > { %v6034_v13 = vrot.slane %v6033_v49, 4  ;;  %v6256_v39 = vmul.f32 %v11213_v56, %v6214_v11  ;;  %v6257_v19 = vmul.f32 %v11211_v26, %v6215_v32  ;;  %v6258_v16 = vmul.f32 %v11237_v47, %v6216_v60  ;;  %6352 = vadd.xlane.f32.xlu1 (!%p7192_p6), %v11278_v15  ;;  %6346 = vadd.xlane.f32.xlu0 (!%p7192_p6), %v11269_v10 }
 0x734   : > { %v6138_v30 = vrot.slane %v6137_v22, 4  ;;  %v6188_v59 = vmul.f32 0.05, %v6180_v36  ;;  %v6027_v6 = vadd.f32 %v6026_v18, %v6025_v14  ;;  %v6173_v60 = vmul.f32 4.0, %v6165_v48 }
 0x735   : > { %v6035_v52 = vadd.f32 %v6034_v13, %v6033_v49  ;;  %v11332_v61 = vadd.f32 %v11235_v27, %v6256_v39  ;;  %v11335_v12 = vadd.f32 %v11260_v20, %v6257_v19  ;;  %v11338_v53 = vadd.f32 %v11258_v8, %v6258_v16 }
 0x736   : > { %v6139_v38 = vadd.f32 %v6138_v30, %v6137_v22  ;;  %v6196_v31 = vadd.f32 1e-05, %v6188_v59  ;;  %v6028_v5 = vrot.slane %v6027_v6, 2 }
 0x737   : > { %v6036_v4 = vrot.slane %v6035_v52, 2  ;;  %v8718_v55 = vpop.eup %8717  ;;  %6322 = vst [vmem:[#allocation2 + $0x30] sm:$0xff] %v11332_v61  ;;  %6323 = vst [vmem:[#allocation2 + $0x38] sm:$0xff] %v11335_v12  ;;  %6354 = vadd.xlane.f32.xlu1 (!%p7192_p6), %v11281_v63  ;;  %6348 = vadd.xlane.f32.xlu0 (!%p7192_p6), %v11272_v23 }
 0x738   : > { %6324 = vst [vmem:[#allocation2 + $0x40] sm:$0xff] %v11338_v53  ;;  %v6140_v37 = vrot.slane %v6139_v38, 2  ;;  %v6217_v17 = vmul.f32 %v8718_v55, %v11193_v50  ;;  %v6218_v21 = vmul.f32 %v8718_v55, %v11196_v24  ;;  %v6219_v1 = vmul.f32 %v8718_v55, %v11199_v0 }
 0x739   : > { %8719 = vrsqrt.f32 %v6196_v31  ;;  %v6029_v3 = vadd.f32 %v6028_v5, %v6027_v6  ;;  %v6037_v42 = vadd.f32 %v6036_v4, %v6035_v52 }
 0x73a   : > { %v6141_v45 = vadd.f32 %v6140_v37, %v6139_v38  ;;  %v6259_v41 = vmul.f32 %v11213_v56, %v6217_v17  ;;  %v6260_v28 = vmul.f32 %v11211_v26, %v6218_v21  ;;  %v6261_v14 = vmul.f32 %v11237_v47, %v6219_v1 }
 0x73b   : > { %v6030_v11 = vrot.slane %v6029_v3, 1  ;;  %v6038_v50 = vrot.slane %v6037_v42, 1  ;;  %6358 = vadd.xlane.f32.xlu1 (!%p7192_p6), %v11335_v12  ;;  %6356 = vadd.xlane.f32.xlu0 (!%p7192_p6), %v11332_v61 }
 0x73c   : > { %v6142_v49 = vrot.slane %v6141_v45, 1  ;;  %v11352_v24 = vadd.f32 %v11235_v27, %v6259_v41  ;;  %v11355_v0 = vadd.f32 %v11260_v20, %v6260_v28  ;;  %v11358_v32 = vadd.f32 %v11258_v8, %v6261_v14 }
 0x73d   : > { %v6031_v22 = vadd.f32 %v6030_v11, %v6029_v3  ;;  %v6039_v36 = vadd.f32 %v6038_v50, %v6037_v42 }
 0x73e   : > { %v6143_v9 = vadd.f32 %v6142_v49, %v6141_v45  ;;  %6325 = vst [vmem:[#allocation2 + $0x48] sm:$0xff] %v11352_v24  ;;  %6326 = vst [vmem:[#allocation2 + $0x50] sm:$0xff] %v11355_v0 }
 0x73f   : > { %6327 = vst [vmem:[#allocation2 + $0x58] sm:$0xff] %v11358_v32  ;;  %v6046_v13 = vmul.f32 0.05, %v6031_v22  ;;  %v6047_v39 = vmul.f32 0.05, %v6039_v36  ;;  %6362 = vadd.xlane.f32.xlu1 (!%p7192_p6), %v11352_v24  ;;  %6360 = vadd.xlane.f32.xlu0 (!%p7192_p6), %v11338_v53  ;;  %v6484_v53 = vand.u32 (!%p7192_p6), 127, %v1243_v33 }
 0x740   : > { %v6181_v18 = vsub.f32 %v6143_v9, %v6173_v60 }
 0x741   : > { %v11364_v16 = vsub.f32 %v11242_v62, %v6046_v13  ;;  %v11367_v30 = vsub.f32 %v11303_v40, %v6046_v13  ;;  %v11370_v59 = vsub.f32 %v11312_v54, %v6046_v13  ;;  %v11373_v52 = vsub.f32 %v11245_v35, %v6047_v39 }
 0x742   : > { %v6189_v19 = vmul.f32 0.05, %v6181_v18  ;;  %v11376_v38 = vsub.f32 %v11305_v25, %v6047_v39  ;;  %v11379_v31 = vsub.f32 %v11315_v7, %v6047_v39  ;;  %v6166_v9 = vmul.f32 %v6046_v13, %v6046_v13 }
 0x743   : > { %v8720_v6 = vpop.eup %8719  ;;  %v6090_v54 = vmul.f32 %v11364_v16, %v11364_v16  ;;  %v6091_v35 = vmul.f32 %v11367_v30, %v11367_v30  ;;  %6366 = vadd.xlane.f32.xlu1 (!%p7192_p6), %v11358_v32  ;;  %6364 = vadd.xlane.f32.xlu0 (!%p7192_p6), %v11355_v0  ;;  %v11457_v33 = vsub.s32 (!%p7192_p6), %v6484_v53, %v9617_v44 }
 0x744   : > { %v6220_v5 = vmul.f32 %v8720_v6, %v11217_v34  ;;  %v6221_v62 = vmul.f32 %v8720_v6, %v11221_v57  ;;  %v6222_v40 = vmul.f32 %v8720_v6, %v11225_v58  ;;  %v6197_v4 = vadd.f32 1e-05, %v6189_v19 }
 0x745   : > { %v6092_v34 = vmul.f32 %v11370_v59, %v11370_v59  ;;  %v6144_v57 = vadd.f32 %v6091_v35, %v6090_v54  ;;  %v6093_v58 = vmul.f32 %v11373_v52, %v11373_v52  ;;  %v6094_v37 = vmul.f32 %v11376_v38, %v11376_v38 }
 0x746   : > { %v6262_v55 = vmul.f32 %v11213_v56, %v6220_v5  ;;  %v6263_v25 = vmul.f32 %v11211_v26, %v6221_v62  ;;  %v6264_v7 = vmul.f32 %v11237_v47, %v6222_v40  ;;  %8721 = vrsqrt.f32 %v6197_v4 }
 0x747   : > { %v6145_v45 = vadd.f32 %v6144_v57, %v6092_v34  ;;  %v6095_v48 = vmul.f32 %v11379_v31, %v11379_v31  ;;  %v6152_v3 = vadd.f32 %v6094_v37, %v6093_v58  ;;  %v6174_v4 = vmul.f32 4.0, %v6166_v9 }
 0x748   : > { %v11398_v17 = vadd.f32 %v11235_v27, %v6262_v55  ;;  %v11401_v21 = vadd.f32 %v11260_v20, %v6263_v25  ;;  %v11404_v1 = vadd.f32 %v11258_v8, %v6264_v7  ;;  %v6167_v35 = vmul.f32 %v6047_v39, %v6047_v39 }
 0x749   : > { %v6146_v42 = vrot.slane %v6145_v45, 4  ;;  %v6153_v41 = vadd.f32 %v6152_v3, %v6095_v48 }
 0x74a   : > { %6328 = vst [vmem:[#allocation2 + $0x60] sm:$0xff] %v11398_v17  ;;  %6329 = vst [vmem:[#allocation2 + $0x68] sm:$0xff] %v11401_v21  ;;  %v6175_v34 = vmul.f32 4.0, %v6167_v35  ;;  %6370 = vadd.xlane.f32.xlu1 (!%p7192_p6), %v11401_v21  ;;  %6368 = vadd.xlane.f32.xlu0 (!%p7192_p6), %v11398_v17 }
 0x74b   : > { %6330 = vst [vmem:[#allocation2 + $0x70] sm:$0xff] %v11404_v1  ;;  %v6147_v28 = vadd.f32 %v6146_v42, %v6145_v45  ;;  %v6154_v14 = vrot.slane %v6153_v41, 4 }
 0x74d   : > { %v6148_v49 = vrot.slane %v6147_v28, 2  ;;  %v6155_v11 = vadd.f32 %v6154_v14, %v6153_v41 }
 0x74e   : > { %6372 = vadd.xlane.f32.xlu0 (!%p7192_p6), %v11404_v1 }
 0x74f   : > { %v6149_v18 = vadd.f32 %v6148_v49, %v6147_v28  ;;  %v6156_v19 = vrot.slane %v6155_v11, 2 }
 0x750   : > { %v8722_v50 = vpop.eup %8721 }
 0x751   : > { %v6223_v60 = vmul.f32 %v8722_v50, %v11288_v43  ;;  %v6224_v22 = vmul.f32 %v8722_v50, %v11292_v29  ;;  %v6225_v36 = vmul.f32 %v8722_v50, %v11296_v46  ;;  %v6150_v40 = vrot.slane %v6149_v18, 1 }
 0x752   : > { %v6157_v54 = vadd.f32 %v6156_v19, %v6155_v11 }
 0x753   : > { %v6265_v6 = vmul.f32 %v11213_v56, %v6223_v60  ;;  %v6266_v5 = vmul.f32 %v11211_v26, %v6224_v22  ;;  %v6267_v62 = vmul.f32 %v11237_v47, %v6225_v36  ;;  %v6151_v55 = vadd.f32 %v6150_v40, %v6149_v18 }
 0x754   : > { %v6158_v46 = vrot.slane %v6157_v54, 1 }
 0x755   : > { %v6307_v13 = vadd.f32 %v11235_v27, %v6265_v6  ;;  %v6308_v43 = vadd.f32 %v11260_v20, %v6266_v5  ;;  %v6309_v29 = vadd.f32 %v11258_v8, %v6267_v62  ;;  %v6182_v25 = vsub.f32 %v6151_v55, %v6174_v4 }
 0x756   : > { %v6159_v7 = vadd.f32 %v6158_v46, %v6157_v54  ;;  %v6489_v5 = vadd.s32 (!%p7192_p6), 4294967288, %v6484_v53  ;;  %v6496_v4 = vadd.s32 (!%p7192_p6), 4294967280, %v6484_v53 }
 0x757   : > { %6331 = vst [vmem:[#allocation2 + $0x78] sm:$0xff] %v6307_v13  ;;  %6332 = vst [vmem:[#allocation2 + $0x80] sm:$0xff] %v6308_v43  ;;  %v6190_v57 = vmul.f32 0.05, %v6182_v25  ;;  %6374 = vadd.xlane.f32.xlu1 (!%p7192_p6), %v6307_v13  ;;  %6376 = vadd.xlane.f32.xlu0 (!%p7192_p6), %v6308_v43 }
 0x758   : > { %6333 = vst [vmem:[#allocation2 + $0x88] sm:$0xff] %v6309_v29  ;;  %v6183_v58 = vsub.f32 %v6159_v7, %v6175_v34  ;;  %v11460_v46 = vsub.s32 (!%p7192_p6), %v6489_v5, %v9617_v44 }
 0x759   : > { %v6198_v37 = vadd.f32 1e-05, %v6190_v57 }
 0x75a   : > { %v6191_v45 = vmul.f32 0.05, %v6183_v58  ;;  %v11463_v58 = vsub.s32 (!%p7192_p6), %v6496_v4, %v9617_v44 }
 0x75b   : > { %8723 = vrsqrt.f32 %v6198_v37  ;;  %6378 = vadd.xlane.f32.xlu1 (!%p7192_p6), %v6309_v29 }
 0x75c   : > { %v6199_v39 = vadd.f32 1e-05, %v6191_v45 }
 0x75e   : > { %8725 = vrsqrt.f32 %v6199_v39 }
 0x765   : > { %v8724_v48 = vpop.eup %8723 }
 0x766   : > { %v6226_v3 = vmul.f32 %v8724_v48, %v11364_v16  ;;  %v6227_v42 = vmul.f32 %v8724_v48, %v11367_v30  ;;  %v6228_v41 = vmul.f32 %v8724_v48, %v11370_v59 }
 0x768   : > { %v8726_v28 = vpop.eup %8725  ;;  %v6268_v14 = vmul.f32 %v11213_v56, %v6226_v3  ;;  %v6269_v49 = vmul.f32 %v11211_v26, %v6227_v42  ;;  %v6270_v11 = vmul.f32 %v11237_v47, %v6228_v41 }
 0x769   : > { %v6229_v50 = vmul.f32 %v8726_v28, %v11373_v52  ;;  %v6230_v9 = vmul.f32 %v8726_v28, %v11376_v38  ;;  %v6231_v60 = vmul.f32 %v8726_v28, %v11379_v31 }
 0x76a   : > { %v6310_v22 = vadd.f32 %v11235_v27, %v6268_v14  ;;  %v6311_v16 = vadd.f32 %v11260_v20, %v6269_v49  ;;  %v6312_v30 = vadd.f32 %v11258_v8, %v6270_v11  ;;  %6343 = sbr.rel (%p7192_p6) target bundleno = 2278 (0x8e6), region = 100 }
 0x76b   : > { %v6271_v59 = vmul.f32 %v11213_v56, %v6229_v50  ;;  %v6272_v36 = vmul.f32 %v11211_v26, %v6230_v9  ;;  %v6273_v18 = vmul.f32 %v11237_v47, %v6231_v60  ;;  %v8771_v26 = vld [vmem:[#allocation9] sm:$0xff] (!%p7192_p6)   ;;  %v9065_v56 = vmov (!%p7192_p6), 0.0  }
 0x76c   : > { %6334 = vst [vmem:[#allocation2 + $0x90] sm:$0xff] %v6310_v22  ;;  %6335 = vst [vmem:[#allocation2 + $0x98] sm:$0xff] %v6311_v16  ;;  %6382 = vadd.xlane.f32.xlu1 (!%p7192_p6), %v6311_v16  ;;  %6380 = vadd.xlane.f32.xlu0 (!%p7192_p6), %v6310_v22 }
 0x76d   : > { %6336 = vst [vmem:[#allocation2 + $0xa0] sm:$0xff] %v6312_v30  ;;  %v6313_v52 = vadd.f32 %v11235_v27, %v6271_v59  ;;  %v6314_v38 = vadd.f32 %v11260_v20, %v6272_v36  ;;  %v6315_v31 = vadd.f32 %v11258_v8, %v6273_v18  ;;  %8164 = vmatprep.subr.bf16.mxu0 (!%p7192_p6), %v9065_v56  ;;  %v8772_v27 = vld [vmem:[#allocation9 + $0x8] ss:$0 sps:$4 sm:$0xff] (!%p7192_p6)  }
 0x76e   : > { %8165 = vmatpush3.bf16.msra.mxu0 (!%p7192_p6), %v8771_v26  ;;  %8168 = vmatprep.mubr.msk.bf16.mxu0 (!%p7192_p6), %vm9066_vm6, %v9065_v56  ;;  %v6629_v47 = vsel (!%p7192_p6), %vm4893_vm5, %v8772_v27, 0 }
 0x76f   : > { %6337 = vst [vmem:[#allocation2 + $0xa8] sm:$0xff] %v6313_v52  ;;  %6338 = vst [vmem:[#allocation2 + $0xb0] sm:$0xff] %v6314_v38  ;;  %8166 = vmatprep.subr.bf16.mxu0 (!%p7192_p6), %v9065_v56 }
 0x770   : > { %6339 = vst [vmem:[#allocation2 + $0xb8] sm:$0xff] %v6315_v31  ;;  %6384 = vadd.xlane.f32.xlu0 (!%p7192_p6), %v6312_v30  ;;  %6386 = vadd.xlane.f32.xlu1 (!%p7192_p6), %v6313_v52 }
 0x772   : > { %8167 = vmatpush3.bf16.msra.mxu0 %v6629_v47 }
 0x774   : > { %6388 = vadd.xlane.f32.xlu0 %v6314_v38  ;;  %6390 = vadd.xlane.f32.xlu1 %v6315_v31 }
 0x7bc   : > { %v6351_v8 = vpop.xlane.xlu1 %6350  ;;  %v6345_v20 = vpop.xlane.xlu0 %6344 }
 0x7bd   : > { %v6396_v21 = vmul.f32 0.0078125, %v6351_v8  ;;  %v6393_v1 = vmul.f32 0.0078125, %v6345_v20 }
 0x7c0   : > { %v6353_v2 = vpop.xlane.xlu1 %6352  ;;  %v6347_v10 = vpop.xlane.xlu0 %6346 }
 0x7c1   : > { %v6397_v24 = vmul.f32 0.0078125, %v6353_v2  ;;  %v6394_v0 = vmul.f32 0.0078125, %v6347_v10 }
 0x7c3   : > { %v6419_v62 = vpack.c.bf16 %v6397_v24, %v6396_v21  ;;  %v6417_v40 = vpack.c.bf16 %v6394_v0, %v6393_v1 }
 0x7c4   : > { %v6355_v23 = vpop.xlane.xlu1 %6354  ;;  %v6349_v51 = vpop.xlane.xlu0 %6348 }
 0x7c5   : > { %v6398_v32 = vmul.f32 0.0078125, %v6355_v23  ;;  %v6395_v17 = vmul.f32 0.0078125, %v6349_v51  ;;  %v6462_v7 = vunpack.c.l.b16 %v6419_v62  ;;  %v6463_v34 = vunpack.c.h.b16 %v6419_v62 }
 0x7c6   : > { %v6459_v57 = vunpack.c.l.b16 %v6417_v40  ;;  %v6460_v37 = vunpack.c.h.b16 %v6417_v40 }
 0x7c7   : > { %v6420_v54 = vpack.c.bf16 %v6398_v32, %v6398_v32  ;;  %v6418_v35 = vpack.c.bf16 %v6395_v17, %v6395_v17  ;;  %v6506_v49 = vrot.slane %v6462_v7, %v11457_v33  ;;  %v6510_v11 = vrot.slane %v6463_v34, %v11460_v46 }
 0x7c8   : > { %v6359_v15 = vpop.xlane.xlu1 %6358  ;;  %v6357_v63 = vpop.xlane.xlu0 %6356  ;;  %v6488_v50 = vrot.slane %v6459_v57, %v11457_v33  ;;  %v6493_v44 = vrot.slane %v6460_v37, %v11460_v46 }
 0x7c9   : > { %v6400_v13 = vmul.f32 0.0078125, %v6359_v15  ;;  %v6399_v43 = vmul.f32 0.0078125, %v6357_v63  ;;  %v6464_v45 = vunpack.c.l.b16 %v6420_v54  ;;  %v6461_v39 = vunpack.c.l.b16 %v6418_v35 }
 0x7ca   : > { %v6511_v20 = vsel %vm6494_vm7, %v6510_v11, %v6506_v49  ;;  %v6495_v15 = vsel %vm6494_vm7, %v6493_v44, %v6488_v50 }
 0x7cb   : > { %v6421_v3 = vpack.c.bf16 %v6400_v13, %v6399_v43  ;;  %v6515_v60 = vrot.slane %v6464_v45, %v11463_v58  ;;  %v6500_v22 = vrot.slane %v6461_v39, %v11463_v58 }
 0x7cc   : > { %v6363_v61 = vpop.xlane.xlu1 %6362  ;;  %v6361_v12 = vpop.xlane.xlu0 %6360 }
 0x7cd   : > { %v6401_v25 = vmul.f32 0.0078125, %v6361_v12  ;;  %v6402_v28 = vmul.f32 0.0078125, %v6363_v61  ;;  %v6465_v30 = vunpack.c.l.b16 %v6421_v3  ;;  %v6466_v31 = vunpack.c.h.b16 %v6421_v3 }
 0x7ce   : > { %v6516_v51 = vsel %vm6501_vm8, %v6515_v60, %v6511_v20  ;;  %v6502_v24 = vsel %vm6501_vm8, %v6500_v22, %v6495_v15 }
 0x7cf   : > { %v6422_v14 = vpack.c.bf16 %v6401_v25, %v6401_v25  ;;  %v6520_v0 = vrot.slane %v6465_v30, %v11457_v33  ;;  %v6524_v32 = vrot.slane %v6466_v31, %v11460_v46  ;;  %v6602_v25 = vsel %vm6601_vm9, %v6516_v51, %v6502_v24 }
 0x7d0   : > { %v6367_v19 = vpop.xlane.xlu1 %6366  ;;  %v6365_v6 = vpop.xlane.xlu0 %6364 }
 0x7d1   : > { %v6403_v48 = vmul.f32 0.0078125, %v6365_v6  ;;  %v6404_v9 = vmul.f32 0.0078125, %v6367_v19  ;;  %v6467_v26 = vunpack.c.l.b16 %v6422_v14  ;;  %v6525_v7 = vsel %vm6494_vm7, %v6524_v32, %v6520_v0 }
 0x7d3   : > { %v6423_v16 = vpack.c.bf16 %v6403_v48, %v6402_v28  ;;  %v6424_v47 = vpack.c.bf16 %v6404_v9, %v6404_v9  ;;  %v6529_v17 = vrot.slane %v6467_v26, %v11463_v58 }
 0x7d5   : > { %v6468_v2 = vunpack.c.l.b16 %v6423_v16  ;;  %v6469_v10 = vunpack.c.h.b16 %v6423_v16  ;;  %v6470_v21 = vunpack.c.l.b16 %v6424_v47  ;;  %v6530_v28 = vsel %vm6501_vm8, %v6529_v17, %v6525_v7 }
 0x7d7   : > { %v6371_v29 = vpop.xlane.xlu1 %6370  ;;  %v6369_v55 = vpop.xlane.xlu0 %6368  ;;  %v6534_v5 = vrot.slane %v6468_v2, %v11457_v33  ;;  %v6538_v62 = vrot.slane %v6469_v10, %v11460_v46  ;;  %v6543_v57 = vrot.slane %v6470_v21, %v11463_v58 }
 0x7d8   : > { %v6406_v59 = vmul.f32 0.0078125, %v6371_v29  ;;  %v6405_v36 = vmul.f32 0.0078125, %v6369_v55 }
 0x7d9   : > { %v6539_v48 = vsel %vm6494_vm7, %v6538_v62, %v6534_v5 }
 0x7da   : > { %v6425_v63 = vpack.c.bf16 %v6406_v59, %v6405_v36  ;;  %v6544_v30 = vsel %vm6501_vm8, %v6543_v57, %v6539_v48 }
 0x7db   : > { %v6373_v41 = vpop.xlane.xlu0 %6372 }
 0x7dc   : > { %v6407_v18 = vmul.f32 0.0078125, %v6373_v41  ;;  %v6471_v54 = vunpack.c.l.b16 %v6425_v63  ;;  %v6472_v35 = vunpack.c.h.b16 %v6425_v63 }
 0x7de   : > { %v6426_v61 = vpack.c.bf16 %v6407_v18, %v6407_v18  ;;  %v6548_v14 = vrot.slane %v6471_v54, %v11457_v33  ;;  %v6552_v49 = vrot.slane %v6472_v35, %v11460_v46 }
 0x7e0   : > { %v6473_v13 = vunpack.c.l.b16 %v6426_v61 }
 0x7e2   : > { %v6557_v11 = vrot.slane %v6473_v13, %v11463_v58 }
 0x7e4   : > { %v6375_v42 = vpop.xlane.xlu1 %6374  ;;  %v6377_v38 = vpop.xlane.xlu0 %6376 }
 0x7e5   : > { %v6408_v56 = vmul.f32 0.0078125, %v6375_v42  ;;  %v6409_v27 = vmul.f32 0.0078125, %v6377_v38 }
 0x7e7   : > { %v6427_v23 = vpack.c.bf16 %v6409_v27, %v6408_v56  ;;  %v6604_v56 = vsel %vm6603_vm10, %v6530_v28, %v6602_v25  ;;  %v6553_v27 = vsel %vm6494_vm7, %v6552_v49, %v6548_v14 }
 0x7e8   : > { %v6379_v52 = vpop.xlane.xlu1 %6378  ;;  %v6558_v47 = vsel %vm6501_vm8, %v6557_v11, %v6553_v27  ;;  %v6606_v10 = vsel %vm6605_vm11, %v6544_v30, %v6604_v56 }
 0x7e9   : > { %v6410_v8 = vmul.f32 0.0078125, %v6379_v52  ;;  %v6474_v40 = vunpack.c.l.b16 %v6427_v23  ;;  %v6475_v4 = vunpack.c.h.b16 %v6427_v23 }
 0x7eb   : > { %v6428_v1 = vpack.c.bf16 %v6410_v8, %v6410_v8  ;;  %v6562_v3 = vrot.slane %v6474_v40, %v11457_v33  ;;  %v6566_v42 = vrot.slane %v6475_v4, %v11460_v46 }
 0x7ed   : > { %v6476_v37 = vunpack.c.l.b16 %v6428_v1  ;;  %v6567_v52 = vsel %vm6494_vm7, %v6566_v42, %v6562_v3 }
 0x7ef   : > { %v6571_v59 = vrot.slane %v6476_v37, %v11463_v58 }
 0x7f1   : > { %v6572_v51 = vsel %vm6501_vm8, %v6571_v59, %v6567_v52 }
 0x7f9   : > { %v6383_v12 = vpop.xlane.xlu1 %6382  ;;  %v6381_v53 = vpop.xlane.xlu0 %6380 }
 0x7fa   : > { %v6412_v19 = vmul.f32 0.0078125, %v6383_v12  ;;  %v6411_v6 = vmul.f32 0.0078125, %v6381_v53  ;;  %v6608_v53 = vsel %vm6607_vm12, %v6558_v47, %v6606_v10 }
 0x7fb   : > { %v6610_v0 = vsel %vm6609_vm13, %v6572_v51, %v6608_v53 }
 0x7fc   : > { %v6429_v43 = vpack.c.bf16 %v6412_v19, %v6411_v6  ;;  %v7193_v19 = vld [vmem:[#allocation11] ss:$0 sm:$0xff] }
 0x7fd   : > { %v6385_v29 = vpop.xlane.xlu0 %6384  ;;  %v6387_v55 = vpop.xlane.xlu1 %6386 }
 0x7fe   : > { %v6413_v34 = vmul.f32 0.0078125, %v6385_v29  ;;  %v6477_v45 = vunpack.c.l.b16 %v6429_v43  ;;  %v6478_v39 = vunpack.c.h.b16 %v6429_v43  ;;  %v6414_v60 = vmul.f32 0.0078125, %v6387_v55 }
 0x800   : > { %v6430_v41 = vpack.c.bf16 %v6413_v34, %v6413_v34  ;;  %v6576_v36 = vrot.slane %v6477_v45, %v11457_v33  ;;  %v6580_v18 = vrot.slane %v6478_v39, %v11460_v46 }
 0x801   : > { %v6389_v50 = vpop.xlane.xlu0 %6388  ;;  %v6391_v9 = vpop.xlane.xlu1 %6390 }
 0x802   : > { %v6479_v44 = vunpack.c.l.b16 %v6430_v41  ;;  %v6415_v22 = vmul.f32 0.0078125, %v6389_v50  ;;  %v6416_v16 = vmul.f32 0.0078125, %v6391_v9  ;;  %v6581_v23 = vsel %vm6494_vm7, %v6580_v18, %v6576_v36 }
 0x804   : > { %v6585_v38 = vrot.slane %v6479_v44, %v11463_v58  ;;  %v6431_v31 = vpack.c.bf16 %v6415_v22, %v6414_v60  ;;  %v6432_v26 = vpack.c.bf16 %v6416_v16, %v6416_v16 }
 0x806   : > { %v6480_v8 = vunpack.c.l.b16 %v6431_v31  ;;  %v6481_v20 = vunpack.c.h.b16 %v6431_v31  ;;  %v6482_v2 = vunpack.c.l.b16 %v6432_v26  ;;  %v6586_v15 = vsel %vm6501_vm8, %v6585_v38, %v6581_v23 }
 0x807   : > { %v6612_v17 = vsel %vm6611_vm14, %v6586_v15, %v6610_v0 }
 0x808   : > { %v6590_v63 = vrot.slane %v6480_v8, %v11457_v33  ;;  %v6594_v61 = vrot.slane %v6481_v20, %v11460_v46  ;;  %v6599_v12 = vrot.slane %v6482_v2, %v11463_v58 }
 0x80a   : > { %v6595_v24 = vsel %vm6494_vm7, %v6594_v61, %v6590_v63 }
 0x80b   : > { %v6600_v32 = vsel %vm6501_vm8, %v6599_v12, %v6595_v24 }
 0x80c   : > { %v6614_v21 = vsel %vm6613_vm15, %v6600_v32, %v6612_v17 }
 0x80d   : > { %v6615_v1 = vpack.c.b16 %v6614_v21, %v6614_v21 }
 0x80f   : > { %8169 = vmatmul.mubr.msk.bf16.vlgmr.msra.gmra.mrb[0].mxu0 %vm4886_vm4, %v6615_v1 }
 0x8e2   : > { %v6665_v33 = vpop.f32.mrb[0].mxu0 }
 0x8e3   : > { %v6666_v6 = vadd.f32 %v7193_v19, %v6665_v33  ;;  %v8170_v46 = vpop.f32.mrb[1].mxu0 }
 0x8e4   : > { %v6668_v5 = vpop.f32.mrb[2].mxu0 }
 0x8e5   : > { %6671 = vst [vmem:[%s665_s28] sm:$0xff] %v6666_v6  ;;  %v8171_v58 = vpop.f32.mrb[3].mxu0 }
 0x8e6 PF: > { %s11674_s14 = sld [smem:[#allocation21_spill]]  ;;  %s7198_s16 = sshll.u32 %s9037_s15, 7 }
 0x8e7   : > { %s11675_s9 = sld [smem:[#allocation39_spill]]  ;;  %s6686_s13 = sshll.u32 %s665_s28, 4  ;;  %s6687_s13 = int_to_ptr.vmem [resolvable:$true] %s6686_s13 }
 0x8e8   : > { %s11676_s3 = sand.u32 1, %s9013_s26   ;;  %s8919_s23 = scalar_lea.vmem %s6687_s13, 128 }
 0x8e9   : > { %s6673_s21 = scalar_lea.sflag [#allocation5], %s11676_s3  ;;  %p8920_p0 = scmp.ne.s32.totalorder %s6687_s13, %s8919_s23 }
 0x8ea   : > { %s9067_s6 = smov [#allocation12]  }
 0x8eb   : > { %s8923_s1 = sshll.u32 %s9067_s6, 4  ;;  %s8924_s1 = int_to_ptr.vmem [resolvable:$false] %s8923_s1 }
 0x8ec   : > { %p11677_p5 = scmp.ne.s32.totalorder %s11674_s14, 0  ;;  %s8925_s8 = scalar_lea.vmem %s8924_s1, 256 }
 0x8ed   : > { %s11516_s4 = scalar_lea.hbm %s11675_s9, %s7198_s16  ;;  %p8926_p1 = scmp.lt.s32.totalorder %s6687_s13, %s8924_s1 }
 0x8ee   : > { %p8921_p12 = pnand %p8920_p0, %p11677_p5  ;;  %p8927_p3 = scmp.lt.s32.totalorder %s8925_s8, %s8919_s23 }
 0x8f0   : > { %p8922_p8 = pneg %p8921_p12  ;;  %p8928_p9 = por %p8927_p3, %p8926_p1 }
 0x8f2   : > { %p8929_p11 = pnand %p8928_p9, %p8922_p8 }
 0x8f4   : > { %8932 = shalt.err (!%p8929_p11)
}
 0x8f5   : > { %s8933_s15 = scalar_lea.hbm %s11516_s4, 128  ;;  %s8937_s7 = scalar_lea.hbm %s11675_s9, 256 }
 0x8f6   : > { %p8934_p10 = scmp.ne.s32.totalorder %s11516_s4, %s8933_s15  ;;  %p8938_p4 = scmp.lt.u32.totalorder %s11516_s4, %s11675_s9 }
 0x8f7   : > { %p8939_p7 = scmp.lt.u32.totalorder %s8937_s7, %s8933_s15  ;;  %p8941_p0 = scmp.lt.u32.totalorder %s8933_s15, %s11516_s4 }
 0x8f8   : > { %p8935_p2 = pnand %p8934_p10, %p11677_p5 }
 0x8f9   : > { %p8940_p6 = por %p8939_p7, %p8938_p4 }
 0x8fa   : > { %p8936_p13 = pneg %p8935_p2 }
 0x8fb   : > { %p8942_p12 = por %p8941_p0, %p8940_p6 }
 0x8fd   : > { %p8943_p8 = pnand %p8942_p12, %p8936_p13 }
 0x8ff   : > { %8946 = shalt.err (!%p8943_p8)
}
 0x900   : > { %8211 = dma.vmem_to_hbm [thread:$0]  (%p11677_p5), %s6687_s13, 128, %s11516_s4, %s6673_s21  }
 0x901 PF: > { %s11678_s25 = sld [smem:[#allocation17_spill]]  ;;  %s11679_s30 = sld [smem:[#allocation22_spill]] }
 0x902   : > { %p8239_p1 = scmp.ge.s32.totalorder %s9049_s18, 2 }
 0x907   : > { %s6698_s24 = sand.u32 1, %s11678_s25   ;;  %p11680_p3 = scmp.ne.s32.totalorder %s11679_s30, 0 }
 0x908   : > { %s6699_s19 = scalar_lea.sflag [#allocation5], %s6698_s24 }
 0x909   : > { %p8231_p9 = pnand %p8239_p1, %p11680_p3 }
 0x90b   : > { %9004 = dma.done.wait (!%p8231_p9), %s6699_s19, 128  }
 0x90c   : > { %9006 = vsyncadd (!%p8231_p9), %s6699_s19, 4294967168  ;;  %s33_s18 = sadd.s32 1, %s9049_s18   ;;  %s11681_s12 = sld [smem:[#allocation26_spill]] }
 0x90d   : > { %p30_p11 = scmp.ge.s32.totalorder %s33_s18, 6   ;;  %s11682_s14 = sld [smem:[#allocation18_spill]] }
 0x90e   : > { %s11683_s30 = sld [smem:[#allocation25_spill]]  ;;  %s11684_s16 = sld [smem:[#allocation19_spill]] }
 0x90f   : > { %s11685_s15 = sld [smem:[#allocation20_spill]]  ;;  %s11686_s17 = sld [smem:[#allocation23_spill]] }
 0x910   : > { %s11687_s22 = sld [smem:[#allocation24_spill]]  ;;  %s11688_s25 = smov %s9013_s26 }
 0x911   : > { %s11689_s26 = smov %s9017_s27  ;;  %s11691_s28 = smov %s9025_s29 }
 0x912   : > { %s11690_s27 = smov %s11681_s12  ;;  %32 = sbr.rel (!%p30_p11) target bundleno = 26 (0x1a), region = 175 }
 0x913   : > { %s11692_s29 = smov %s11682_s14 }
 0x914   : > { %s11693_s14 = smov %s11684_s16 }
 0x915   : > { %s11694_s16 = smov %s11686_s17 }
 0x916   : > { %s11695_s17 = smov %s11687_s22 }
 0x919   :  { %6704 = vsyncpa [#allocation4], 1 }
 0x91a   :  { %6706 = vsyncpa [#allocation4 + $0x1], 1 }
 0x91b   :  { %6707 = vsyncpa [#allocation7], 1 }
 0x91c   :  { %6709 = vsyncpa [#allocation7 + $0x1], 1 }
 0x91d   :  { %6710 = vsyncpa [#allocation10], 1 }
 0x91e   :  { %6711 = vsyncpa [#allocation5], 1 }
 0x91f   :  { %6713 = vsyncpa [#allocation5 + $0x1], 1 }

</bundles_post_ra>
